<compile_context>
chip_gen: v7x
topology: tpu7x:2x2x1
jax: 0.10.0
libtpu: 0.0.40
codegen_flags: <defaults>
</compile_context>

<pallas_src>
import functools
import math

import jax
import jax.numpy as jnp
import numpy as np
from jax.experimental import pallas as pl
from jax.experimental.pallas import tpu as pltpu
from jax.scipy.linalg import block_diag


# ---------------------------------------------------------------------------
# Pallas kernel: one grid step scores BB (src, tgt) agent pairs.
# ---------------------------------------------------------------------------
def jfp_scorer_kernel(x_ref, wf_ref, fvec_ref, out_ref, *,
                      BB, m, T, Kp2, D2, H2, offs):
    # x_ref    : (BB*m*T, Kp2)  bf16   lanes = [src_input | tgt_input]
    # wf_ref   : (Wrows, WL)    bf16   packed weights (static row offsets `offs`)
    # fvec_ref : (8, VW)        f32    packed bias / small vectors
    # out_ref  : (1, 1, BB*m*m) f32    lane-dense scores
    HH = 2 * H2
    o_w1, o_w2, o_w3, o_f1, o_f2 = offs

    # Packed f32 vectors.
    b1 = fvec_ref[0:1, 0:D2]
    b2 = fvec_ref[1:2, 0:D2]
    b3 = fvec_ref[2:3, 0:HH]
    fb1 = fvec_ref[3:4, 0:H2]
    fb2 = fvec_ref[4:5, 0:H2]
    w3row = fvec_ref[5:6, 0:H2]
    fb3 = fvec_ref[6:7, 0:1]

    # --- src & tgt branch MLPs, fused block-diagonally (1 matmul per layer) ---
    h = jnp.dot(x_ref[...], wf_ref[o_w1:o_w1 + Kp2, 0:D2],
                preferred_element_type=jnp.float32) + b1
    h = jnp.maximum(h, 0.0)
    h = jnp.dot(h.astype(jnp.bfloat16), wf_ref[o_w2:o_w2 + D2, 0:D2],
                preferred_element_type=jnp.float32) + b2
    h = jnp.maximum(h, 0.0)
    h = jnp.dot(h.astype(jnp.bfloat16), wf_ref[o_w3:o_w3 + D2, 0:HH],
                preferred_element_type=jnp.float32) + b3          # (BB*m*T, HH)

    # max over time (torch: max(dim=-2)); lanes [0:H2]=src_feat, [H2:HH]=tgt_feat
    feat = jnp.max(h.reshape(BB * m, T, HH), axis=1)              # (BB*m, HH) f32
    featb = feat.astype(jnp.bfloat16)

    # --- fuse layer 1, decomposed: concat([s, t]) @ W == s @ W[:H2] + t @ W[H2:]
    ab = jnp.dot(featb, wf_ref[o_f1:o_f1 + HH, 0:HH],
                 preferred_element_type=jnp.float32)              # (BB*m, HH)
    a = ab[:, 0:H2]
    b = ab[:, H2:HH]
    h1 = jnp.maximum(a.reshape(BB, m, 1, H2) + b.reshape(BB, 1, m, H2) + fb1,
                     0.0)                                         # (BB, m, m, H2)
    h1 = h1.reshape(BB * m * m, H2)

    # --- fuse layer 2 ---
    h2 = jnp.maximum(
        jnp.dot(h1.astype(jnp.bfloat16), wf_ref[o_f2:o_f2 + H2, 0:H2],
                preferred_element_type=jnp.float32) + fb2, 0.0)   # (BB*m*m, H2)

    # --- fuse out layer (out_dim == 1) as a weighted lane reduction ---
    out = jnp.sum(h2 * w3row, axis=-1)                            # (BB*m*m,)
    out_ref[...] = (out.reshape(1, 1, BB * m * m) + fb3).astype(out_ref.dtype)


# ---------------------------------------------------------------------------
# Helpers
# ---------------------------------------------------------------------------
def _round_up(x, mult):
    return ((x + mult - 1) // mult) * mult


def _tensorcores_per_device():
    """TensorCores a single Pallas 'parallel' grid axis can be sharded over."""
    try:
        kind = jax.devices()[0].device_kind.lower()
    except Exception:
        return 1
    if ("v4" in kind) or ("v5p" in kind) or ("7" in kind):
        return 2          # megacore / v7x: 2 TensorCores per device
    return 1              # v2/v3 (1 TC per JAX device), v5e, v6e


def _choose_blocking(Bp, m, T, n_steps):
    """Pick pairs-per-step BB and the number of grid steps."""
    n_steps = max(1, min(n_steps, Bp))
    bb = -(-Bp // n_steps)                          # ceil
    # Keep the lane-dense output unmasked: round BB so BB*m*m % 128 == 0,
    # unless that would more than double the padding.
    lane_mult = 128 // math.gcd(128, m * m)
    bb_r = _round_up(bb, lane_mult)
    if bb_r <= 2 * bb:
        bb = bb_r
    num_blocks = -(-Bp // bb)
    if num_blocks > 1 and (bb * m * T) % 8 != 0:
        bb, num_blocks = Bp, 1                      # block == full array: always legal
    return bb, num_blocks


def left_hand_rotate(traj, curr):
    # traj: (Bp, m, T, d), curr: (Bp, 3) = [x, y, heading]
    cos = jnp.cos(curr[:, -1])[:, None, None]
    sin = jnp.sin(curr[:, -1])[:, None, None]
    x, y = traj[..., 0], traj[..., 1]
    new_x = cos * x - sin * y + curr[:, 0, None, None]
    new_y = sin * x + cos * y + curr[:, 1, None, None]
    return jnp.concatenate([new_x[..., None], new_y[..., None], traj[..., 2:]], axis=-1)


# ---------------------------------------------------------------------------
# Forward wrapper
# ---------------------------------------------------------------------------
def jfp_scorer_forward(pred_traj, curr, params, *, num_steps=None):
    """pred_traj: [B(=b*2), m, T, d]   curr: [B, 3]   ->   [B//2, m, m]"""
    B, m, T, d = pred_traj.shape
    Bp = B // 2
    pt = pred_traj.reshape(Bp, 2, m, T, d)
    cu = curr.reshape(Bp, 2, 3)
    src_traj, tgt_traj = pt[:, 0], pt[:, 1]
    src_curr, tgt_curr = cu[:, 0], cu[:, 1]

    # Cheap element-wise preprocessing stays in XLA (fuses with its producers).
    src_inputs = jnp.concatenate(
        [src_traj, left_hand_rotate(tgt_traj, src_curr)], axis=-1)   # (Bp, m, T, 2d)
    tgt_inputs = jnp.concatenate(
        [tgt_traj, left_hand_rotate(src_traj, tgt_curr)], axis=-1)

    sw1, sb1, sw2, sb2, sw3, sb3 = params["src"]
    tw1, tb1, tw2, tb2, tw3, tb3 = params["tgt"]
    fw1, fb1, fw2, fb2, fw3, fb3 = params["fuse"]
    dim = sw1.shape[1]
    H2 = sw3.shape[1]
    D2, HH = 2 * dim, 2 * H2

    K = 2 * d
    Kp = _round_up(K, 8)                       # pad contraction dim to sublanes
    Kp2 = 2 * Kp

    # ---- grid / blocking ---------------------------------------------------
    if num_steps is None:
        num_steps = _tensorcores_per_device()
    BB, num_blocks = _choose_blocking(Bp, m, T, num_steps)
    Bp_pad = num_blocks * BB

    # ---- single packed input operand: lanes = [src | tgt] -------------------
    # TODO(synk): coordinates pass through bf16 before the first matmul; if the
    # trajectories live in large map-frame units, normalize/center them here.
    def pad_last(a):
        return jnp.pad(a, ((0, 0), (0, 0), (0, 0), (0, Kp - K)))

    x = jnp.concatenate([pad_last(src_inputs), pad_last(tgt_inputs)], axis=-1)
    x = jnp.pad(x, ((0, Bp_pad - Bp), (0, 0), (0, 0), (0, 0)))
    x = x.reshape(Bp_pad * m * T, Kp2).astype(jnp.bfloat16)

    # ---- packed bf16 weight buffer (block-diagonal src/tgt fusion) ----------
    def pad_k(w):
        return jnp.pad(w, ((0, Kp - K), (0, 0)))

    w_blocks = [
        block_diag(pad_k(sw1), pad_k(tw1)),   # (Kp2, D2)  branch layer 1
        block_diag(sw2, tw2),                 # (D2,  D2)  branch layer 2
        block_diag(sw3, tw3),                 # (D2,  HH)  branch out layer
        block_diag(fw1[:H2], fw1[H2:]),       # (HH,  HH)  fuse layer 1 (split)
        fw2,                                  # (H2,  H2)  fuse layer 2
    ]
    WL = _round_up(max(w.shape[1] for w in w_blocks), 128)

    def pad_block(w):                         # 8-align rows, pad lanes to WL
        return jnp.pad(w, ((0, (-w.shape[0]) % 8), (0, WL - w.shape[1])))

    padded = [pad_block(w) for w in w_blocks]
    offs = tuple(int(o) for o in np.cumsum([0] + [p.shape[0] for p in padded])[:-1])
    wflat = jnp.concatenate(padded, axis=0).astype(jnp.bfloat16)

    # ---- packed f32 bias / small-vector buffer ------------------------------
    VW = _round_up(max(D2, HH), 128)

    def row(v):
        v = v.reshape(1, -1)
        return jnp.pad(v, ((0, 0), (0, VW - v.shape[1])))

    fvec = jnp.concatenate([
        row(jnp.concatenate([sb1, tb1], axis=-1)),   # 0: branch bias 1 (1, D2)
        row(jnp.concatenate([sb2, tb2], axis=-1)),   # 1: branch bias 2 (1, D2)
        row(jnp.concatenate([sb3, tb3], axis=-1)),   # 2: branch bias 3 (1, HH)
        row(fb1),                                    # 3: fuse bias 1   (1, H2)
        row(fb2),                                    # 4: fuse bias 2   (1, H2)
        row(fw3),                                    # 5: fuse out weight row (1, H2)
        row(fb3),                                    # 6: fuse out bias scalar
    ], axis=0)
    fvec = jnp.pad(fvec, ((0, 8 - fvec.shape[0]), (0, 0))).astype(jnp.float32)

    # ---- pallas call ---------------------------------------------------------
    rows_per_block = BB * m * T
    out_lanes = BB * m * m

    macs = Bp_pad * (m * T * (Kp2 * D2 + D2 * D2 + D2 * HH)
                     + m * HH * HH + m * m * H2 * H2 + m * m * H2)
    cost = pl.CostEstimate(
        flops=int(2 * macs),
        transcendentals=0,
        bytes_accessed=int(x.size * 2 + wflat.size * 2 + fvec.size * 4
                           + Bp_pad * m * m * 4))

    kernel = functools.partial(
        jfp_scorer_kernel, BB=BB, m=m, T=T, Kp2=Kp2, D2=D2, H2=H2, offs=offs)

    out = pl.pallas_call(
        kernel,
        out_shape=jax.ShapeDtypeStruct((num_blocks, 1, out_lanes), jnp.float32),
        grid=(num_blocks,),
        in_specs=[
            pl.BlockSpec((rows_per_block, Kp2), lambda g: (g, 0)),
            pl.BlockSpec(wflat.shape, lambda g: (0, 0)),
            pl.BlockSpec(fvec.shape, lambda g: (0, 0)),
        ],
        out_specs=pl.BlockSpec((1, 1, out_lanes), lambda g: (g, 0, 0)),
        compiler_params=pltpu.CompilerParams(dimension_semantics=("parallel",)),
        cost_estimate=cost,
    )(x, wflat, fvec)

    return out.reshape(Bp_pad, m, m)[:Bp]


# ---------------------------------------------------------------------------
# Pure-JAX reference (mirrors torch forward).  bf16_matmul=True applies the
# same bf16-operand / f32-accumulate policy as the kernel (tight check).
# ---------------------------------------------------------------------------
def _linear(x, w, b, bf16_matmul):
    if bf16_matmul:
        return jnp.dot(x.astype(jnp.bfloat16), w.astype(jnp.bfloat16),
                       preferred_element_type=jnp.float32) + b
    return x @ w + b


def _mlp_ref(x, w1, b1, w2, b2, w3, b3, bf16_matmul=False):
    h = jax.nn.relu(_linear(x, w1, b1, bf16_matmul))
    h = jax.nn.relu(_linear(h, w2, b2, bf16_matmul))
    return _linear(h, w3, b3, bf16_matmul)


def jfp_scorer_ref(pred_traj, curr, params, bf16_matmul=False):
    B, m, T, d = pred_traj.shape
    Bp = B // 2
    pt = pred_traj.reshape(Bp, 2, m, T, d)
    cu = curr.reshape(Bp, 2, 3)
    src_traj, tgt_traj = pt[:, 0], pt[:, 1]
    src_curr, tgt_curr = cu[:, 0], cu[:, 1]
    src_inputs = jnp.concatenate([src_traj, left_hand_rotate(tgt_traj, src_curr)], -1)
    tgt_inputs = jnp.concatenate([tgt_traj, left_hand_rotate(src_traj, tgt_curr)], -1)
    src_feat = jnp.max(_mlp_ref(src_inputs, *params["src"], bf16_matmul=bf16_matmul), axis=-2)
    tgt_feat = jnp.max(_mlp_ref(tgt_inputs, *params["tgt"], bf16_matmul=bf16_matmul), axis=-2)
    H2 = src_feat.shape[-1]
    sf = jnp.broadcast_to(src_feat[:, :, None, :], (Bp, m, m, H2))
    tf = jnp.broadcast_to(tgt_feat[:, None, :, :], (Bp, m, m, H2))
    feat = jnp.concatenate([sf, tf], axis=-1)
    return _mlp_ref(feat, *params["fuse"], bf16_matmul=bf16_matmul)[..., 0]


# ---------------------------------------------------------------------------
# Deterministic parameter init (shapes from JFPScorer.__init__)
# ---------------------------------------------------------------------------
def init_params(key, input_dim, dim):
    h2 = dim // 2

    def linear(k, fan_in, fan_out):
        kw, kb = jax.random.split(k)
        w = jax.random.normal(kw, (fan_in, fan_out), jnp.float32) / np.sqrt(fan_in)
        b = jax.random.normal(kb, (1, fan_out), jnp.float32) * 0.05
        return (w, b)

    keys = jax.random.split(key, 9)
    src = linear(keys[0], 2 * input_dim, dim) + linear(keys[1], dim, dim) + linear(keys[2], dim, h2)
    tgt = linear(keys[3], 2 * input_dim, dim) + linear(keys[4], dim, dim) + linear(keys[5], dim, h2)
    fuse = linear(keys[6], dim, h2) + linear(keys[7], h2, h2) + linear(keys[8], h2, 1)
    return {"src": src, "tgt": tgt, "fuse": fuse}


if __name__ == "__main__":
    key = jax.random.PRNGKey(0)
    kp, kt, kc1, kc2 = jax.random.split(key, 4)

    B, m, T, d = 8, 8, 16, 7      # B = b*2 (agent pairs), d = input_dim (7 per spec)
    dim = 32

    params = init_params(kp, d, dim)
    pred_traj = jax.random.normal(kt, (B, m, T, d), jnp.float32)
    curr_xy = jax.random.uniform(kc1, (B, 2), jnp.float32, -2.0, 2.0)
    curr_heading = jax.random.uniform(kc2, (B, 1), jnp.float32, -np.pi, np.pi)
    curr = jnp.concatenate([curr_xy, curr_heading], axis=-1)

    out = jax.block_until_ready(jfp_scorer_forward(pred_traj, curr, params))
    assert out.shape == (B // 2, m, m)

    # Tight check vs. a reference using the same bf16-matmul / f32-accumulate policy.
    ref_bf16 = jax.block_until_ready(jfp_scorer_ref(pred_traj, curr, params, bf16_matmul=True))
    np.testing.assert_allclose(np.asarray(out), np.asarray(ref_bf16), rtol=2e-2, atol=2e-2)

    # Loose check vs. the pure-f32 torch-equivalent reference (difference is the
    # bf16 quantization of MXU operands).
    ref_f32 = jax.block_until_ready(jfp_scorer_ref(pred_traj, curr, params, bf16_matmul=False))
    np.testing.assert_allclose(np.asarray(out), np.asarray(ref_f32), rtol=1e-1, atol=1e-1)

    print("KERNEL_OK")
</pallas_src>

<mosaic_0001>
module attributes {stable_mosaic.version = 11 : i64} {
  func.func @jfp_scorer_kernel(%arg0: i32, %arg1: memref<512x32xbf16, #tpu.memory_space<vmem>>, %arg2: memref<208x128xbf16, #tpu.memory_space<vmem>>, %arg3: memref<8x128xf32, #tpu.memory_space<vmem>>, %arg4: memref<1x1x256xf32, #tpu.memory_space<vmem>>) attributes {dimension_semantics = [#tpu.dimension_semantics<parallel>], iteration_bounds = array<i64: 1>, scalar_prefetch = 0 : i64, scratch_operands = 0 : i64, tpu.core_type = #tpu.core_type<tc>, window_params = [{transform_indices = @transform_0, window_bounds = array<i64: 512, 32>}, {pipeline_mode = #tpu.pipeline_mode<synchronous>, transform_indices = @transform_1, window_bounds = array<i64: 208, 128>}, {pipeline_mode = #tpu.pipeline_mode<synchronous>, transform_indices = @transform_2, window_bounds = array<i64: 8, 128>}, {transform_indices = @transform_3, window_bounds = array<i64: 1, 1, 256>}]} {
    %c0 = arith.constant 0 : index
    %c0_0 = arith.constant 0 : index
    %0 = vector.load %arg3[%c0, %c0_0] : memref<8x128xf32, #tpu.memory_space<vmem>>, vector<1x64xf32>
    %c1 = arith.constant 1 : index
    %c0_1 = arith.constant 0 : index
    %1 = vector.load %arg3[%c1, %c0_1] : memref<8x128xf32, #tpu.memory_space<vmem>>, vector<1x64xf32>
    %c2 = arith.constant 2 : index
    %c0_2 = arith.constant 0 : index
    %2 = vector.load %arg3[%c2, %c0_2] : memref<8x128xf32, #tpu.memory_space<vmem>>, vector<1x32xf32>
    %c3 = arith.constant 3 : index
    %c0_3 = arith.constant 0 : index
    %3 = vector.load %arg3[%c3, %c0_3] : memref<8x128xf32, #tpu.memory_space<vmem>>, vector<1x16xf32>
    %c4 = arith.constant 4 : index
    %c0_4 = arith.constant 0 : index
    %4 = vector.load %arg3[%c4, %c0_4] : memref<8x128xf32, #tpu.memory_space<vmem>>, vector<1x16xf32>
    %c5 = arith.constant 5 : index
    %c0_5 = arith.constant 0 : index
    %5 = vector.load %arg3[%c5, %c0_5] : memref<8x128xf32, #tpu.memory_space<vmem>>, vector<1x16xf32>
    %c6 = arith.constant 6 : index
    %c0_6 = arith.constant 0 : index
    %6 = vector.load %arg3[%c6, %c0_6] : memref<8x128xf32, #tpu.memory_space<vmem>>, vector<1x1xf32>
    %c0_7 = arith.constant 0 : index
    %c0_8 = arith.constant 0 : index
    %7 = vector.load %arg1[%c0_7, %c0_8] : memref<512x32xbf16, #tpu.memory_space<vmem>>, vector<512x32xbf16>
    %c0_9 = arith.constant 0 : index
    %c0_10 = arith.constant 0 : index
    %8 = vector.load %arg2[%c0_9, %c0_10] : memref<208x128xbf16, #tpu.memory_space<vmem>>, vector<32x64xbf16>
    %cst = arith.constant dense<0.000000e+00> : vector<512x64xf32>
    %9 = tpu.matmul %7, %8, %cst {dimension_numbers = #tpu.dot_dimension_numbers<[1], [0], [0], [1], [0, 0, 1, 1], [], []>} : vector<512x32xbf16>, vector<32x64xbf16>, vector<512x64xf32> -> vector<512x64xf32>
    %10 = vector.broadcast %0 : vector<1x64xf32> to vector<512x64xf32>
    %11 = arith.addf %9, %10 : vector<512x64xf32>
    %cst_11 = arith.constant 0.000000e+00 : f32
    %12 = vector.broadcast %cst_11 : f32 to vector<512x64xf32>
    %13 = arith.maximumf %11, %12 : vector<512x64xf32>
    %14 = arith.truncf %13 : vector<512x64xf32> to vector<512x64xbf16>
    %c32 = arith.constant 32 : index
    %c0_12 = arith.constant 0 : index
    %15 = vector.load %arg2[%c32, %c0_12] : memref<208x128xbf16, #tpu.memory_space<vmem>>, vector<64x64xbf16>
    %cst_13 = arith.constant dense<0.000000e+00> : vector<512x64xf32>
    %16 = tpu.matmul %14, %15, %cst_13 {dimension_numbers = #tpu.dot_dimension_numbers<[1], [0], [0], [1], [0, 0, 1, 1], [], []>} : vector<512x64xbf16>, vector<64x64xbf16>, vector<512x64xf32> -> vector<512x64xf32>
    %17 = vector.broadcast %1 : vector<1x64xf32> to vector<512x64xf32>
    %18 = arith.addf %16, %17 : vector<512x64xf32>
    %cst_14 = arith.constant 0.000000e+00 : f32
    %19 = vector.broadcast %cst_14 : f32 to vector<512x64xf32>
    %20 = arith.maximumf %18, %19 : vector<512x64xf32>
    %21 = arith.truncf %20 : vector<512x64xf32> to vector<512x64xbf16>
    %c96 = arith.constant 96 : index
    %c0_15 = arith.constant 0 : index
    %22 = vector.load %arg2[%c96, %c0_15] : memref<208x128xbf16, #tpu.memory_space<vmem>>, vector<64x32xbf16>
    %cst_16 = arith.constant dense<0.000000e+00> : vector<512x32xf32>
    %23 = tpu.matmul %21, %22, %cst_16 {dimension_numbers = #tpu.dot_dimension_numbers<[1], [0], [0], [1], [0, 0, 1, 1], [], []>} : vector<512x64xbf16>, vector<64x32xbf16>, vector<512x32xf32> -> vector<512x32xf32>
    %24 = vector.broadcast %2 : vector<1x32xf32> to vector<512x32xf32>
    %25 = arith.addf %23, %24 : vector<512x32xf32>
    %26 = vector.shape_cast %25 : vector<512x32xf32> to vector<32x16x32xf32>
    %cst_17 = arith.constant dense<0xFF800000> : vector<32x32xf32>
    %27 = vector.multi_reduction <maximumf>, %26, %cst_17 [1] : vector<32x16x32xf32> to vector<32x32xf32>
    %28 = arith.truncf %27 : vector<32x32xf32> to vector<32x32xbf16>
    %c160 = arith.constant 160 : index
    %c0_18 = arith.constant 0 : index
    %29 = vector.load %arg2[%c160, %c0_18] : memref<208x128xbf16, #tpu.memory_space<vmem>>, vector<32x32xbf16>
    %cst_19 = arith.constant dense<0.000000e+00> : vector<32x32xf32>
    %30 = tpu.matmul %28, %29, %cst_19 {dimension_numbers = #tpu.dot_dimension_numbers<[1], [0], [0], [1], [0, 0, 1, 1], [], []>} : vector<32x32xbf16>, vector<32x32xbf16>, vector<32x32xf32> -> vector<32x32xf32>
    %31 = vector.extract_strided_slice %30 {offsets = [0, 0], sizes = [32, 16], strides = [1, 1]} : vector<32x32xf32> to vector<32x16xf32>
    %32 = vector.extract_strided_slice %30 {offsets = [0, 16], sizes = [32, 16], strides = [1, 1]} : vector<32x32xf32> to vector<32x16xf32>
    %33 = vector.shape_cast %31 : vector<32x16xf32> to vector<4x8x1x16xf32>
    %34 = vector.shape_cast %32 : vector<32x16xf32> to vector<4x1x8x16xf32>
    %35 = vector.broadcast %33 : vector<4x8x1x16xf32> to vector<4x8x8x16xf32>
    %36 = vector.broadcast %34 : vector<4x1x8x16xf32> to vector<4x8x8x16xf32>
    %37 = arith.addf %35, %36 : vector<4x8x8x16xf32>
    %38 = vector.shape_cast %3 : vector<1x16xf32> to vector<1x1x1x16xf32>
    %39 = vector.broadcast %38 : vector<1x1x1x16xf32> to vector<4x8x8x16xf32>
    %40 = arith.addf %37, %39 : vector<4x8x8x16xf32>
    %cst_20 = arith.constant 0.000000e+00 : f32
    %41 = vector.broadcast %cst_20 : f32 to vector<4x8x8x16xf32>
    %42 = arith.maximumf %40, %41 : vector<4x8x8x16xf32>
    %43 = vector.shape_cast %42 : vector<4x8x8x16xf32> to vector<256x16xf32>
    %44 = arith.truncf %43 : vector<256x16xf32> to vector<256x16xbf16>
    %c192 = arith.constant 192 : index
    %c0_21 = arith.constant 0 : index
    %45 = vector.load %arg2[%c192, %c0_21] : memref<208x128xbf16, #tpu.memory_space<vmem>>, vector<16x16xbf16>
    %cst_22 = arith.constant dense<0.000000e+00> : vector<256x16xf32>
    %46 = tpu.matmul %44, %45, %cst_22 {dimension_numbers = #tpu.dot_dimension_numbers<[1], [0], [0], [1], [0, 0, 1, 1], [], []>} : vector<256x16xbf16>, vector<16x16xbf16>, vector<256x16xf32> -> vector<256x16xf32>
    %47 = vector.broadcast %4 : vector<1x16xf32> to vector<256x16xf32>
    %48 = arith.addf %46, %47 : vector<256x16xf32>
    %cst_23 = arith.constant 0.000000e+00 : f32
    %49 = vector.broadcast %cst_23 : f32 to vector<256x16xf32>
    %50 = arith.maximumf %48, %49 : vector<256x16xf32>
    %51 = vector.broadcast %5 : vector<1x16xf32> to vector<256x16xf32>
    %52 = arith.mulf %50, %51 : vector<256x16xf32>
    %cst_24 = arith.constant dense<0.000000e+00> : vector<256xf32>
    %53 = vector.multi_reduction <add>, %52, %cst_24 [1] : vector<256x16xf32> to vector<256xf32>
    %54 = vector.shape_cast %53 : vector<256xf32> to vector<1x1x256xf32>
    %55 = vector.shape_cast %6 : vector<1x1xf32> to vector<1x1x1xf32>
    %56 = vector.broadcast %55 : vector<1x1x1xf32> to vector<1x1x256xf32>
    %57 = arith.addf %54, %56 : vector<1x1x256xf32>
    %c0_25 = arith.constant 0 : index
    %c0_26 = arith.constant 0 : index
    %c0_27 = arith.constant 0 : index
    %58 = vector.load %arg4[%c0_25, %c0_26, %c0_27] : memref<1x1x256xf32, #tpu.memory_space<vmem>>, vector<1x1x256xf32>
    tpu.vector_store %arg4[%c0_25, %c0_26, %c0_27], %57 {strides = array<i32>} : memref<1x1x256xf32, #tpu.memory_space<vmem>>, vector<1x1x256xf32>,
    return
  }
  func.func @transform_0(%arg0: i32) -> (i32, i32) {
    %c0_i32 = arith.constant 0 : i32
    %c0_i32_0 = arith.constant 0 : i32
    return %arg0, %c0_i32 : i32, i32
  }
  func.func @transform_1(%arg0: i32) -> (i32, i32) {
    %c0_i32 = arith.constant 0 : i32
    %c0_i32_0 = arith.constant 0 : i32
    %c0_i32_1 = arith.constant 0 : i32
    return %c0_i32, %c0_i32_0 : i32, i32
  }
  func.func @transform_2(%arg0: i32) -> (i32, i32) {
    %c0_i32 = arith.constant 0 : i32
    %c0_i32_0 = arith.constant 0 : i32
    %c0_i32_1 = arith.constant 0 : i32
    return %c0_i32, %c0_i32_0 : i32, i32
  }
  func.func @transform_3(%arg0: i32) -> (i32, i32, i32) {
    %c0_i32 = arith.constant 0 : i32
    %c0_i32_0 = arith.constant 0 : i32
    %c0_i32_1 = arith.constant 0 : i32
    return %arg0, %c0_i32, %c0_i32_0 : i32, i32, i32
  }
}

</mosaic_0001>

<bundles_post_ra>
// kernel: tpu_custom_call.1
= control target key start
LH: loop header
LB: loop body
LE: loop exit
PB: predicated region body
PF: predicated region fallthrough
CT: control target
= control target key end

     0   :  { %vm267_vm0 = vcmask 261120   ;;  %s10166_s0 = inlined_call_operand.vmem [shape: bf16[512,32], index: 0, kind: input, shape index: {}]   ;;  %s10167_s1 = inlined_call_operand.vmem [shape: bf16[208,128], index: 1, kind: input, shape index: {}]   ;;  %s10168_s2 = inlined_call_operand.vmem [shape: f32[8,128], index: 2, kind: input, shape index: {}]   ;;  %s10169_s3 = inlined_call_operand.hbm [shape: f32[1,1,256], index: 3, kind: output, shape index: {}]  }
   0x1   :  { %v7204_v0 = vld [vmem:[%s10167_s1] sm:$0xff]   ;;  %v7205_v1 = vld [vmem:[%s10167_s1 + $0x8] sm:$0xff]   ;;  %v7208_v4 = vld [vmem:[%s10166_s0 + $0x10] sm:$0xff]  }
   0x2   :  { %6940 = vmatprep.subr.bf16.mxu0 %v7204_v0  ;;  %v7206_v2 = vld [vmem:[%s10166_s0] sm:$0xff]   ;;  %7194 = vmatprep.subr.bf16.mxu1 %v7204_v0  ;;  %v7207_v3 = vld [vmem:[%s10166_s0 + $0x8] sm:$0xff]   ;;  %v7209_v5 = vld [vmem:[%s10166_s0 + $0x18] sm:$0xff]  }
   0x3   :  { %6941 = vmatpush3.bf16.msra.mxu0 %v7204_v0  ;;  %7196 = vmatpush3.bf16.msra.mxu1 %v7204_v0  ;;  %v7210_v6 = vld [vmem:[%s10166_s0 + $0x20] sm:$0xff]   ;;  %v7211_v7 = vld [vmem:[%s10166_s0 + $0x28] sm:$0xff]   ;;  %v7212_v8 = vld [vmem:[%s10166_s0 + $0x30] sm:$0xff]  }
   0x4   :  { %6942 = vmatprep.subr.bf16.mxu0 %v7205_v1  ;;  %6944 = vmatprep.mubr.msk.bf16.mxu0 %vm267_vm0, %v7206_v2  ;;  %v7213_v9 = vld [vmem:[%s10166_s0 + $0x38] sm:$0xff]   ;;  %v7232_v10 = vld [vmem:[%s10166_s0 + $0xd0] sm:$0xff]   ;;  %v7234_v12 = vld [vmem:[%s10166_s0 + $0xe0] sm:$0xff]  }
   0x5   :  { %7195 = vmatprep.subr.bf16.mxu1 %v7205_v1  ;;  %v7233_v11 = vld [vmem:[%s10166_s0 + $0xd8] sm:$0xff]   ;;  %6996 = vmatprep.mubr.msk.bf16.mxu1 %vm267_vm0, %v7232_v10  ;;  %v7214_v13 = vld [vmem:[%s10166_s0 + $0x40] sm:$0xff]   ;;  %v7235_v14 = vld [vmem:[%s10166_s0 + $0xe8] sm:$0xff]  }
   0x6   :  { %v7236_v15 = vld [vmem:[%s10166_s0 + $0xf0] sm:$0xff]   ;;  %v7239_v17 = vld [vmem:[%s10167_s1 + $0x18] sm:$0xff]   ;;  %v7215_v18 = vld [vmem:[%s10166_s0 + $0x48] sm:$0xff]  }
   0x7   :  { %6943 = vmatpush3.bf16.msra.mxu0 %v7205_v1  ;;  %7197 = vmatpush3.bf16.msra.mxu1 %v7205_v1  ;;  %v7238_v16 = vld [vmem:[%s10167_s1 + $0x10] sm:$0xff]   ;;  %v7240_v19 = vld [vmem:[%s10167_s1 + $0x20] sm:$0xff]  }
   0x8   :  { %7008 = vmatprep.subr.bf16.mxu1 %v7238_v16  ;;  %v7216_v20 = vld [vmem:[%s10166_s0 + $0x50] sm:$0xff]  }
   0xa   :  { %6945 = vmatmul.mubr.msk.bf16.vlgmr.msra.gmra.mrb[0].mxu0 %vm267_vm0, %v7207_v3  ;;  %6997 = vmatmul.mubr.msk.bf16.vlgmr.msra.gmra.mrb[0].mxu1 %vm267_vm0, %v7233_v11 }
   0xb   :  { %6948 = vmatprep.mubr.msk.bf16.mxu0 %vm267_vm0, %v7208_v4  ;;  %7000 = vmatprep.mubr.msk.bf16.mxu1 %vm267_vm0, %v7234_v12 }
   0xc   :  { %7009 = vmatpush3.bf16.msra.mxu1 %v7238_v16 }
   0xd   :  { %7010 = vmatprep.subr.bf16.mxu1 %v7239_v17 }
  0x10   :  { %7011 = vmatpush3.bf16.msra.mxu1 %v7239_v17 }
  0x11   :  { %7012 = vmatprep.subr.bf16.mxu1 %v7240_v19 }
  0x12   :  { %6949 = vmatmul.mubr.msk.bf16.gmra.mrb[4].mxu0 %vm267_vm0, %v7209_v5  ;;  %7001 = vmatmul.mubr.msk.bf16.gmra.mrb[4].mxu1 %vm267_vm0, %v7235_v14 }
  0x13   :  { %6952 = vmatprep.mubr.msk.bf16.mxu0 %vm267_vm0, %v7210_v6  ;;  %7004 = vmatprep.mubr.msk.bf16.mxu1 %vm267_vm0, %v7236_v15 }
  0x1a   :  { %6953 = vmatmul.mubr.msk.bf16.gmra.mrb[8].mxu0 %vm267_vm0, %v7211_v7 }
  0x1b   :  { %6956 = vmatprep.mubr.msk.bf16.mxu0 %vm267_vm0, %v7212_v8 }
  0x22   :  { %6957 = vmatmul.mubr.msk.bf16.gmra.mrb[12].mxu0 %vm267_vm0, %v7213_v9 }
  0x23   :  { %6960 = vmatprep.mubr.msk.bf16.mxu0 %vm267_vm0, %v7214_v13 }
  0x2a   :  { %6961 = vmatmul.mubr.msk.bf16.gmra.mrb[16].mxu0 %vm267_vm0, %v7215_v18 }
  0x2b   :  { %8 = vsyncpa [#allocation3], 0  ;;  %6964 = vmatprep.mubr.msk.bf16.mxu0 %vm267_vm0, %v7216_v20  ;;  %v7237_v21 = vld [vmem:[%s10166_s0 + $0xf8] sm:$0xff]   ;;  %7013 = vmatpush3.bf16.msra.mxu1 %v7240_v19  ;;  %v7218_v23 = vld [vmem:[%s10166_s0 + $0x60] sm:$0xff]   ;;  %vm785_vm1 = vcmask 523264   ;;  %vm2076_vm2 = vcmask 1041409  }
  0x2c   :  { %v7217_v22 = vld [vmem:[%s10166_s0 + $0x58] sm:$0xff]   ;;  %7005 = vmatmul.mubr.msk.bf16.gmra.mrb[8].mxu1 %vm267_vm0, %v7237_v21  ;;  %v7219_v24 = vld [vmem:[%s10166_s0 + $0x68] sm:$0xff]   ;;  %v7220_v25 = vld [vmem:[%s10166_s0 + $0x70] sm:$0xff]   ;;  %vm2078_vm3 = vcmask 1042434   ;;  %vm2080_vm4 = vcmask 1043459   ;;  %vm2082_vm5 = vcmask 1044484  }
  0x2d   :  { %v7221_v26 = vld [vmem:[%s10166_s0 + $0x78] sm:$0xff]   ;;  %v7222_v27 = vld [vmem:[%s10166_s0 + $0x80] sm:$0xff]   ;;  %v7223_v28 = vld [vmem:[%s10166_s0 + $0x88] sm:$0xff]   ;;  %vm2084_vm6 = vcmask 1045509   ;;  %vm2086_vm7 = vcmask 1046534   ;;  %vm2088_vm8 = vcmask 1047559  }
  0x2e   :  { %v7224_v29 = vld [vmem:[%s10166_s0 + $0x90] sm:$0xff]   ;;  %v7225_v30 = vld [vmem:[%s10166_s0 + $0x98] sm:$0xff]   ;;  %v7226_v31 = vld [vmem:[%s10166_s0 + $0xa0] sm:$0xff]   ;;  %s7273_s26 = smov 112   ;;  %vm2680_vm9 = vcmask 130048   ;;  %vm6370_vm10 = vcmask 130112  }
  0x2f   :  { %v7227_v32 = vld [vmem:[%s10166_s0 + $0xa8] sm:$0xff]   ;;  %v7228_v33 = vld [vmem:[%s10166_s0 + $0xb0] sm:$0xff]   ;;  %v7229_v34 = vld [vmem:[%s10166_s0 + $0xb8] sm:$0xff]   ;;  %vm6377_vm11 = vcmask 195712   ;;  %vm6384_vm12 = vcmask 261312   ;;  %vm6391_vm13 = vcmask 326912  }
  0x30   :  { %v7230_v35 = vld [vmem:[%s10166_s0 + $0xc0] sm:$0xff]   ;;  %v7241_v36 = vld [vmem:[%s10167_s1 + $0x28] sm:$0xff]   ;;  %v7242_v38 = vld [vmem:[%s10167_s1 + $0x30] sm:$0xff]   ;;  %vm6398_vm14 = vcmask 392512   ;;  %vm6405_vm15 = vcmask 458112  }
  0x31   :  { %7014 = vmatprep.subr.bf16.mxu1 %v7241_v36  ;;  %v7231_v37 = vld [vmem:[%s10166_s0 + $0xc8] sm:$0xff]   ;;  %v7449_v39 = vld [vmem:[%s10168_s2] ss:$0 sm:$0xff]  ;;  %7080 = vmatprep.subr.bf16.mxu0 %v7242_v38  ;;  %v7243_v47 = vld [vmem:[%s10167_s1 + $0x38] sm:$0xff]  }
  0x32   :  { %6965 = vmatmul.mubr.msk.bf16.gmra.mrb[20].mxu0 %vm267_vm0, %v7217_v22  ;;  %7015 = vmatpush3.bf16.msra.mxu1 %v7241_v36  ;;  %v7244_v48 = vld [vmem:[%s10167_s1 + $0x40] sm:$0xff]   ;;  %v7245_v55 = vld [vmem:[%s10167_s1 + $0x48] sm:$0xff]  }
  0x33   :  { %6968 = vmatprep.mubr.msk.bf16.mxu0 %vm267_vm0, %v7218_v23  ;;  %7081 = vmatpush3.bf16.msra.mxu0 %v7242_v38 }
  0x34   :  { %7082 = vmatprep.subr.bf16.mxu0 %v7243_v47 }
  0x37   :  { %7083 = vmatpush3.bf16.msra.mxu0 %v7243_v47 }
  0x38   :  { %7084 = vmatprep.subr.bf16.mxu0 %v7244_v48 }
  0x3a   :  { %6969 = vmatmul.mubr.msk.bf16.gmra.mrb[24].mxu0 %vm267_vm0, %v7219_v24 }
  0x3b   :  { %6972 = vmatprep.mubr.msk.bf16.mxu0 %vm267_vm0, %v7220_v25  ;;  %7085 = vmatpush3.bf16.msra.mxu0 %v7244_v48 }
  0x3c   :  { %7086 = vmatprep.subr.bf16.mxu0 %v7245_v55 }
  0x3f   :  { %7087 = vmatpush3.bf16.msra.mxu0 %v7245_v55 }
  0x42   :  { %6973 = vmatmul.mubr.msk.bf16.gmra.mrb[28].mxu0 %vm267_vm0, %v7221_v26 }
  0x43   :  { %6976 = vmatprep.mubr.msk.bf16.mxu0 %vm267_vm0, %v7222_v27 }
  0x4a   :  { %6977 = vmatmul.mubr.msk.bf16.gmra.mrb[32].mxu0 %vm267_vm0, %v7223_v28 }
  0x4b   :  { %6980 = vmatprep.mubr.msk.bf16.mxu0 %vm267_vm0, %v7224_v29 }
  0x52   :  { %6981 = vmatmul.mubr.msk.bf16.gmra.mrb[36].mxu0 %vm267_vm0, %v7225_v30 }
  0x53   :  { %6984 = vmatprep.mubr.msk.bf16.mxu0 %vm267_vm0, %v7226_v31 }
  0x5a   :  { %6985 = vmatmul.mubr.msk.bf16.gmra.mrb[40].mxu0 %vm267_vm0, %v7227_v32 }
  0x5b   :  { %6988 = vmatprep.mubr.msk.bf16.mxu0 %vm267_vm0, %v7228_v33 }
  0x62   :  { %6989 = vmatmul.mubr.msk.bf16.gmra.mrb[44].mxu0 %vm267_vm0, %v7229_v34 }
  0x63   :  { %6992 = vmatprep.mubr.msk.bf16.mxu0 %vm267_vm0, %v7230_v35 }
  0x6a   :  { %6993 = vmatmul.mubr.msk.bf16.gmra.mrb[48].mxu0 %vm267_vm0, %v7231_v37 }
  0xdd   :  { %v6946_v40 = vpop.f32.mrb[0].mxu0  ;;  %v6998_v17 = vpop.f32.mrb[0].mxu1 }
  0xde   :  { %v407_v41 = vadd.f32 %v6946_v40, %v7449_v39  ;;  %v398_v42 = vpop.f32.mrb[1].mxu0  ;;  %v615_v20 = vadd.f32 %v6998_v17, %v7449_v39  ;;  %v606_v21 = vpop.f32.mrb[1].mxu1 }
  0xdf   :  { %v399_v43 = vadd.f32 %v7449_v39, %v398_v42  ;;  %v6947_v44 = vpop.f32.mrb[2].mxu0  ;;  %v607_v23 = vadd.f32 %v7449_v39, %v606_v21  ;;  %v6999_v24 = vpop.f32.mrb[2].mxu1 }
  0xe0   :  { %v410_v45 = vadd.f32 %v6947_v44, %v7449_v39  ;;  %v401_v46 = vpop.f32.mrb[3].mxu0  ;;  %v655_v50 = vmax.f32 %v407_v41, 0.0  ;;  %v707_v27 = vmax.f32 %v615_v20, 0.0  ;;  %v618_v28 = vadd.f32 %v6999_v24, %v7449_v39  ;;  %v609_v29 = vpop.f32.mrb[3].mxu1 }
  0xe1   :  { %v402_v49 = vadd.f32 %v7449_v39, %v401_v46  ;;  %v653_v52 = vmax.f32 %v399_v43, 0.0  ;;  %v705_v32 = vmax.f32 %v607_v23, 0.0  ;;  %v610_v33 = vadd.f32 %v7449_v39, %v609_v29 }
  0xe2   :  { %v656_v51 = vmax.f32 %v410_v45, 0.0  ;;  %v708_v36 = vmax.f32 %v618_v28, 0.0 }
  0xe3   :  { %v654_v53 = vmax.f32 %v402_v49, 0.0  ;;  %v706_v40 = vmax.f32 %v610_v33, 0.0 }
  0xe4   :  { %v718_v54 = vpack.c.bf16 %v656_v51, %v655_v50  ;;  %v7486_v42 = vpack.c.bf16 %v708_v36, %v707_v27 }
  0xe5   :  { %v717_v56 = vpack.c.bf16 %v654_v53, %v653_v52  ;;  %v6950_v57 = vpop.f32.mrb[4].mxu0  ;;  %v7488_v45 = vpack.c.bf16 %v706_v40, %v705_v32  ;;  %v7002_v46 = vpop.f32.mrb[4].mxu1 }
  0xe6   :  { %v423_v58 = vadd.f32 %v6950_v57, %v7449_v39  ;;  %v414_v59 = vpop.f32.mrb[5].mxu0  ;;  %v631_v49 = vadd.f32 %v7002_v46, %v7449_v39  ;;  %v622_v50 = vpop.f32.mrb[5].mxu1 }
  0xe7   :  { %v415_v60 = vadd.f32 %v7449_v39, %v414_v59  ;;  %v6951_v61 = vpop.f32.mrb[6].mxu0  ;;  %7016 = vmatprep.mubr.msk.bf16.mxu1 %vm785_vm1, %v717_v56  ;;  %v623_v52 = vadd.f32 %v7449_v39, %v622_v50  ;;  %v7003_v53 = vpop.f32.mrb[6].mxu1 }
  0xe8   :  { %v426_v62 = vadd.f32 %v6951_v61, %v7449_v39  ;;  %v417_v63 = vpop.f32.mrb[7].mxu0  ;;  %7017 = vmatmul.mubr.msk.bf16.vlgmr.msra.gmra.mrb[12].mxu1 %vm785_vm1, %v718_v54  ;;  %v659_v1 = vmax.f32 %v423_v58, 0.0  ;;  %v711_v56 = vmax.f32 %v631_v49, 0.0  ;;  %v634_v57 = vadd.f32 %v7003_v53, %v7449_v39  ;;  %v625_v58 = vpop.f32.mrb[7].mxu1 }
  0xe9   :  { %v418_v0 = vadd.f32 %v7449_v39, %v417_v63  ;;  %v657_v3 = vmax.f32 %v415_v60, 0.0  ;;  %v709_v61 = vmax.f32 %v623_v52, 0.0 }
  0xea   :  { %v660_v2 = vmax.f32 %v426_v62, 0.0  ;;  %v626_v62 = vadd.f32 %v7449_v39, %v625_v58 }
  0xeb   :  { %v658_v4 = vmax.f32 %v418_v0, 0.0 }
  0xec   :  { %v720_v5 = vpack.c.bf16 %v660_v2, %v659_v1  ;;  %v712_v1 = vmax.f32 %v634_v57, 0.0 }
  0xed   :  { %v719_v6 = vpack.c.bf16 %v658_v4, %v657_v3  ;;  %v6954_v7 = vpop.f32.mrb[8].mxu0  ;;  %v710_v4 = vmax.f32 %v626_v62, 0.0 }
  0xee   :  { %v439_v8 = vadd.f32 %v6954_v7, %v7449_v39  ;;  %v430_v9 = vpop.f32.mrb[9].mxu0 }
  0xef   :  { %v431_v10 = vadd.f32 %v7449_v39, %v430_v9  ;;  %v6955_v11 = vpop.f32.mrb[10].mxu0  ;;  %7020 = vmatprep.mubr.msk.bf16.mxu1 %vm785_vm1, %v719_v6  ;;  %v7500_v6 = vpack.c.bf16 %v712_v1, %v711_v56  ;;  %v7502_v9 = vpack.c.bf16 %v710_v4, %v709_v61 }
  0xf0   :  { %v442_v12 = vadd.f32 %v6955_v11, %v7449_v39  ;;  %v433_v13 = vpop.f32.mrb[11].mxu0  ;;  %7021 = vmatmul.mubr.msk.bf16.gmra.mrb[16].mxu1 %vm785_vm1, %v720_v5  ;;  %v663_v15 = vmax.f32 %v439_v8, 0.0 }
  0xf1   :  { %v434_v14 = vadd.f32 %v7449_v39, %v433_v13  ;;  %v661_v18 = vmax.f32 %v431_v10, 0.0 }
  0xf2   :  { %v664_v16 = vmax.f32 %v442_v12, 0.0 }
  0xf3   :  { %v662_v19 = vmax.f32 %v434_v14, 0.0 }
  0xf4   :  { %v722_v22 = vpack.c.bf16 %v664_v16, %v663_v15 }
  0xf5   :  { %v721_v25 = vpack.c.bf16 %v662_v19, %v661_v18  ;;  %v6958_v26 = vpop.f32.mrb[12].mxu0 }
  0xf6   :  { %v455_v30 = vadd.f32 %v6958_v26, %v7449_v39  ;;  %v446_v31 = vpop.f32.mrb[13].mxu0 }
  0xf7   :  { %v447_v34 = vadd.f32 %v7449_v39, %v446_v31  ;;  %v6959_v35 = vpop.f32.mrb[14].mxu0  ;;  %7024 = vmatprep.mubr.msk.bf16.mxu1 %vm785_vm1, %v721_v25 }
  0xf8   :  { %v458_v37 = vadd.f32 %v6959_v35, %v7449_v39  ;;  %v449_v38 = vpop.f32.mrb[15].mxu0  ;;  %7025 = vmatmul.mubr.msk.bf16.gmra.mrb[20].mxu1 %vm785_vm1, %v722_v22  ;;  %v667_v43 = vmax.f32 %v455_v30, 0.0 }
  0xf9   :  { %v450_v41 = vadd.f32 %v7449_v39, %v449_v38  ;;  %v665_v47 = vmax.f32 %v447_v34, 0.0 }
  0xfa   :  { %v668_v44 = vmax.f32 %v458_v37, 0.0 }
  0xfb   :  { %v666_v48 = vmax.f32 %v450_v41, 0.0 }
  0xfc   :  { %v724_v51 = vpack.c.bf16 %v668_v44, %v667_v43 }
  0xfd   :  { %v723_v54 = vpack.c.bf16 %v666_v48, %v665_v47  ;;  %v6962_v55 = vpop.f32.mrb[16].mxu0 }
  0xfe   :  { %v471_v59 = vadd.f32 %v6962_v55, %v7449_v39  ;;  %v462_v60 = vpop.f32.mrb[17].mxu0 }
  0xff   :  { %v463_v63 = vadd.f32 %v7449_v39, %v462_v60  ;;  %v6963_v0 = vpop.f32.mrb[18].mxu0  ;;  %7028 = vmatprep.mubr.msk.bf16.mxu1 %vm785_vm1, %v723_v54  ;;  %v7006_v10 = vpop.f32.mrb[8].mxu1 }
 0x100   :  { %v474_v2 = vadd.f32 %v6963_v0, %v7449_v39  ;;  %v465_v3 = vpop.f32.mrb[19].mxu0  ;;  %7029 = vmatmul.mubr.msk.bf16.gmra.mrb[24].mxu1 %vm785_vm1, %v724_v51  ;;  %v671_v7 = vmax.f32 %v471_v59, 0.0  ;;  %v647_v13 = vadd.f32 %v7006_v10, %v7449_v39  ;;  %v638_v14 = vpop.f32.mrb[9].mxu1 }
 0x101   :  { %v466_v5 = vadd.f32 %v7449_v39, %v465_v3  ;;  %v669_v11 = vmax.f32 %v463_v63, 0.0  ;;  %v639_v16 = vadd.f32 %v7449_v39, %v638_v14  ;;  %v7007_v17 = vpop.f32.mrb[10].mxu1 }
 0x102   :  { %v672_v8 = vmax.f32 %v474_v2, 0.0  ;;  %v715_v20 = vmax.f32 %v647_v13, 0.0  ;;  %v650_v21 = vadd.f32 %v7007_v17, %v7449_v39  ;;  %v641_v22 = vpop.f32.mrb[11].mxu1 }
 0x103   :  { %v670_v12 = vmax.f32 %v466_v5, 0.0  ;;  %v713_v25 = vmax.f32 %v639_v16, 0.0  ;;  %v642_v26 = vadd.f32 %v7449_v39, %v641_v22 }
 0x104   :  { %v726_v15 = vpack.c.bf16 %v672_v8, %v671_v7  ;;  %v716_v29 = vmax.f32 %v650_v21, 0.0 }
 0x105   :  { %v725_v18 = vpack.c.bf16 %v670_v12, %v669_v11  ;;  %v6966_v19 = vpop.f32.mrb[20].mxu0  ;;  %v714_v32 = vmax.f32 %v642_v26, 0.0 }
 0x106   :  { %v487_v23 = vadd.f32 %v6966_v19, %v7449_v39  ;;  %v478_v24 = vpop.f32.mrb[21].mxu0  ;;  %v7514_v34 = vpack.c.bf16 %v716_v29, %v715_v20 }
 0x107   :  { %v479_v27 = vadd.f32 %v7449_v39, %v478_v24  ;;  %v6967_v28 = vpop.f32.mrb[22].mxu0  ;;  %7032 = vmatprep.mubr.msk.bf16.mxu1 %vm785_vm1, %v725_v18  ;;  %v7516_v37 = vpack.c.bf16 %v714_v32, %v713_v25 }
 0x108   :  { %v490_v30 = vadd.f32 %v6967_v28, %v7449_v39  ;;  %v481_v31 = vpop.f32.mrb[23].mxu0  ;;  %7033 = vmatmul.mubr.msk.bf16.gmra.mrb[28].mxu1 %vm785_vm1, %v726_v15  ;;  %v675_v35 = vmax.f32 %v487_v23, 0.0 }
 0x109   :  { %v482_v33 = vadd.f32 %v7449_v39, %v481_v31  ;;  %v673_v38 = vmax.f32 %v479_v27, 0.0 }
 0x10a   :  { %v676_v36 = vmax.f32 %v490_v30, 0.0 }
 0x10b   :  { %v674_v40 = vmax.f32 %v482_v33, 0.0 }
 0x10c   :  { %v728_v41 = vpack.c.bf16 %v676_v36, %v675_v35 }
 0x10d   :  { %v727_v43 = vpack.c.bf16 %v674_v40, %v673_v38  ;;  %v6970_v44 = vpop.f32.mrb[24].mxu0 }
 0x10e   :  { %v503_v46 = vadd.f32 %v6970_v44, %v7449_v39  ;;  %v494_v47 = vpop.f32.mrb[25].mxu0 }
 0x10f   :  { %v495_v48 = vadd.f32 %v7449_v39, %v494_v47  ;;  %v6971_v49 = vpop.f32.mrb[26].mxu0  ;;  %7036 = vmatprep.mubr.msk.bf16.mxu1 %vm785_vm1, %v727_v43 }
 0x110   :  { %v506_v50 = vadd.f32 %v6971_v49, %v7449_v39  ;;  %v497_v51 = vpop.f32.mrb[27].mxu0  ;;  %7037 = vmatmul.mubr.msk.bf16.gmra.mrb[32].mxu1 %vm785_vm1, %v728_v41  ;;  %v679_v53 = vmax.f32 %v503_v46, 0.0 }
 0x111   :  { %v498_v52 = vadd.f32 %v7449_v39, %v497_v51  ;;  %v677_v55 = vmax.f32 %v495_v48, 0.0 }
 0x112   :  { %v680_v54 = vmax.f32 %v506_v50, 0.0 }
 0x113   :  { %v678_v56 = vmax.f32 %v498_v52, 0.0 }
 0x114   :  { %v730_v57 = vpack.c.bf16 %v680_v54, %v679_v53 }
 0x115   :  { %v729_v58 = vpack.c.bf16 %v678_v56, %v677_v55  ;;  %v6974_v59 = vpop.f32.mrb[28].mxu0 }
 0x116   :  { %v519_v60 = vadd.f32 %v6974_v59, %v7449_v39  ;;  %v510_v61 = vpop.f32.mrb[29].mxu0 }
 0x117   :  { %v511_v62 = vadd.f32 %v7449_v39, %v510_v61  ;;  %v6975_v63 = vpop.f32.mrb[30].mxu0  ;;  %7040 = vmatprep.mubr.msk.bf16.mxu1 %vm785_vm1, %v729_v58 }
 0x118   :  { %v522_v0 = vadd.f32 %v6975_v63, %v7449_v39  ;;  %v513_v1 = vpop.f32.mrb[31].mxu0  ;;  %7041 = vmatmul.mubr.msk.bf16.gmra.mrb[36].mxu1 %vm785_vm1, %v730_v57  ;;  %v683_v3 = vmax.f32 %v519_v60, 0.0 }
 0x119   :  { %v514_v2 = vadd.f32 %v7449_v39, %v513_v1  ;;  %v681_v5 = vmax.f32 %v511_v62, 0.0 }
 0x11a   :  { %v684_v4 = vmax.f32 %v522_v0, 0.0 }
 0x11b   :  { %v682_v7 = vmax.f32 %v514_v2, 0.0 }
 0x11c   :  { %v732_v8 = vpack.c.bf16 %v684_v4, %v683_v3 }
 0x11d   :  { %v731_v10 = vpack.c.bf16 %v682_v7, %v681_v5  ;;  %v6978_v11 = vpop.f32.mrb[32].mxu0 }
 0x11e   :  { %v535_v12 = vadd.f32 %v6978_v11, %v7449_v39  ;;  %v526_v13 = vpop.f32.mrb[33].mxu0 }
 0x11f   :  { %v527_v14 = vadd.f32 %v7449_v39, %v526_v13  ;;  %v6979_v15 = vpop.f32.mrb[34].mxu0  ;;  %7044 = vmatprep.mubr.msk.bf16.mxu1 %vm785_vm1, %v731_v10 }
 0x120   :  { %v538_v16 = vadd.f32 %v6979_v15, %v7449_v39  ;;  %v529_v17 = vpop.f32.mrb[35].mxu0  ;;  %7045 = vmatmul.mubr.msk.bf16.gmra.mrb[40].mxu1 %vm785_vm1, %v732_v8  ;;  %v687_v19 = vmax.f32 %v535_v12, 0.0 }
 0x121   :  { %v530_v18 = vadd.f32 %v7449_v39, %v529_v17  ;;  %v685_v21 = vmax.f32 %v527_v14, 0.0 }
 0x122   :  { %v688_v20 = vmax.f32 %v538_v16, 0.0 }
 0x123   :  { %v686_v22 = vmax.f32 %v530_v18, 0.0 }
 0x124   :  { %v734_v23 = vpack.c.bf16 %v688_v20, %v687_v19 }
 0x125   :  { %v733_v24 = vpack.c.bf16 %v686_v22, %v685_v21  ;;  %v6982_v25 = vpop.f32.mrb[36].mxu0 }
 0x126   :  { %v551_v26 = vadd.f32 %v6982_v25, %v7449_v39  ;;  %v542_v27 = vpop.f32.mrb[37].mxu0 }
 0x127   :  { %v543_v28 = vadd.f32 %v7449_v39, %v542_v27  ;;  %v6983_v29 = vpop.f32.mrb[38].mxu0  ;;  %7048 = vmatprep.mubr.msk.bf16.mxu1 %vm785_vm1, %v733_v24 }
 0x128   :  { %v554_v30 = vadd.f32 %v6983_v29, %v7449_v39  ;;  %v545_v31 = vpop.f32.mrb[39].mxu0  ;;  %7049 = vmatmul.mubr.msk.bf16.gmra.mrb[44].mxu1 %vm785_vm1, %v734_v23  ;;  %v691_v33 = vmax.f32 %v551_v26, 0.0 }
 0x129   :  { %v546_v32 = vadd.f32 %v7449_v39, %v545_v31  ;;  %v689_v36 = vmax.f32 %v543_v28, 0.0 }
 0x12a   :  { %v692_v35 = vmax.f32 %v554_v30, 0.0 }
 0x12b   :  { %v690_v38 = vmax.f32 %v546_v32, 0.0 }
 0x12c   :  { %v736_v40 = vpack.c.bf16 %v692_v35, %v691_v33 }
 0x12d   :  { %v735_v41 = vpack.c.bf16 %v690_v38, %v689_v36  ;;  %v6986_v43 = vpop.f32.mrb[40].mxu0 }
 0x12e   :  { %v567_v44 = vadd.f32 %v6986_v43, %v7449_v39  ;;  %v558_v46 = vpop.f32.mrb[41].mxu0 }
 0x12f   :  { %v559_v47 = vadd.f32 %v7449_v39, %v558_v46  ;;  %v6987_v48 = vpop.f32.mrb[42].mxu0  ;;  %7052 = vmatprep.mubr.msk.bf16.mxu1 %vm785_vm1, %v735_v41 }
 0x130   :  { %v570_v49 = vadd.f32 %v6987_v48, %v7449_v39  ;;  %v561_v50 = vpop.f32.mrb[43].mxu0  ;;  %7053 = vmatmul.mubr.msk.bf16.gmra.mrb[48].mxu1 %vm785_vm1, %v736_v40  ;;  %v695_v52 = vmax.f32 %v567_v44, 0.0 }
 0x131   :  { %v562_v51 = vadd.f32 %v7449_v39, %v561_v50  ;;  %v693_v54 = vmax.f32 %v559_v47, 0.0 }
 0x132   :  { %v696_v53 = vmax.f32 %v570_v49, 0.0 }
 0x133   :  { %v694_v55 = vmax.f32 %v562_v51, 0.0 }
 0x134   :  { %v738_v56 = vpack.c.bf16 %v696_v53, %v695_v52 }
 0x135   :  { %v737_v57 = vpack.c.bf16 %v694_v55, %v693_v54  ;;  %v6990_v58 = vpop.f32.mrb[44].mxu0 }
 0x136   :  { %v583_v59 = vadd.f32 %v6990_v58, %v7449_v39  ;;  %v574_v60 = vpop.f32.mrb[45].mxu0 }
 0x137   :  { %v575_v61 = vadd.f32 %v7449_v39, %v574_v60  ;;  %v6991_v62 = vpop.f32.mrb[46].mxu0  ;;  %7056 = vmatprep.mubr.msk.bf16.mxu1 %vm785_vm1, %v737_v57 }
 0x138   :  { %v586_v63 = vadd.f32 %v6991_v62, %v7449_v39  ;;  %v577_v0 = vpop.f32.mrb[47].mxu0  ;;  %7057 = vmatmul.mubr.msk.bf16.gmra.mrb[52].mxu1 %vm785_vm1, %v738_v56  ;;  %v699_v2 = vmax.f32 %v583_v59, 0.0 }
 0x139   :  { %v578_v1 = vadd.f32 %v7449_v39, %v577_v0  ;;  %v697_v4 = vmax.f32 %v575_v61, 0.0 }
 0x13a   :  { %v700_v3 = vmax.f32 %v586_v63, 0.0 }
 0x13b   :  { %v698_v5 = vmax.f32 %v578_v1, 0.0 }
 0x13c   :  { %v740_v7 = vpack.c.bf16 %v700_v3, %v699_v2 }
 0x13d   :  { %v739_v8 = vpack.c.bf16 %v698_v5, %v697_v4  ;;  %v6994_v10 = vpop.f32.mrb[48].mxu0 }
 0x13e   :  { %v599_v11 = vadd.f32 %v6994_v10, %v7449_v39  ;;  %v590_v12 = vpop.f32.mrb[49].mxu0 }
 0x13f   :  { %v591_v13 = vadd.f32 %v7449_v39, %v590_v12  ;;  %v6995_v14 = vpop.f32.mrb[50].mxu0  ;;  %7060 = vmatprep.mubr.msk.bf16.mxu1 %vm785_vm1, %v739_v8 }
 0x140   :  { %v602_v15 = vadd.f32 %v6995_v14, %v7449_v39  ;;  %v593_v16 = vpop.f32.mrb[51].mxu0  ;;  %7061 = vmatmul.mubr.msk.bf16.gmra.mrb[56].mxu1 %vm785_vm1, %v740_v7  ;;  %v703_v18 = vmax.f32 %v599_v11, 0.0 }
 0x141   :  { %v594_v17 = vadd.f32 %v7449_v39, %v593_v16  ;;  %v701_v20 = vmax.f32 %v591_v13, 0.0  ;;  %v7577_v39 = vld [vmem:[%s10168_s2 + $0x1] ss:$0 sm:$0xff] }
 0x142   :  { %v704_v19 = vmax.f32 %v602_v15, 0.0 }
 0x143   :  { %v702_v21 = vmax.f32 %v594_v17, 0.0 }
 0x144   :  { %v742_v22 = vpack.c.bf16 %v704_v19, %v703_v18 }
 0x145   :  { %v741_v23 = vpack.c.bf16 %v702_v21, %v701_v20 }
 0x147   :  { %7064 = vmatprep.mubr.msk.bf16.mxu1 %vm785_vm1, %v741_v23 }
 0x148   :  { %7065 = vmatmul.mubr.msk.bf16.gmra.mrb[60].mxu1 %vm785_vm1, %v742_v22 }
 0x149   :  { %7068 = vmatprep.mubr.msk.bf16.mxu1 %vm785_vm1, %v7488_v45 }
 0x150   :  { %7069 = vmatmul.mubr.msk.bf16.gmra.mrb[64].mxu1 %vm785_vm1, %v7486_v42 }
 0x151   :  { %7072 = vmatprep.mubr.msk.bf16.mxu1 %vm785_vm1, %v7502_v9 }
 0x158   :  { %7073 = vmatmul.mubr.msk.bf16.gmra.mrb[68].mxu1 %vm785_vm1, %v7500_v6 }
 0x159   :  { %7076 = vmatprep.mubr.msk.bf16.mxu1 %vm785_vm1, %v7516_v37 }
 0x160   :  { %7077 = vmatmul.mubr.msk.bf16.gmra.mrb[72].mxu1 %vm785_vm1, %v7514_v34 }
 0x1bb   :  { %v7018_v45 = vpop.f32.mrb[12].mxu1 }
 0x1bc   :  { %v925_v42 = vadd.f32 %v7018_v45, %v7577_v39  ;;  %v916_v24 = vpop.f32.mrb[13].mxu1 }
 0x1bd   :  { %v917_v9 = vadd.f32 %v7577_v39, %v916_v24  ;;  %v7019_v25 = vpop.f32.mrb[14].mxu1 }
 0x1be   :  { %v928_v6 = vadd.f32 %v7019_v25, %v7577_v39  ;;  %v919_v26 = vpop.f32.mrb[15].mxu1  ;;  %v1173_v27 = vmax.f32 %v925_v42, 0.0 }
 0x1bf   :  { %v920_v37 = vadd.f32 %v7577_v39, %v919_v26  ;;  %v1171_v34 = vmax.f32 %v917_v9, 0.0 }
 0x1c0   :  { %v1174_v28 = vmax.f32 %v928_v6, 0.0 }
 0x1c1   :  { %v1172_v29 = vmax.f32 %v920_v37, 0.0 }
 0x1c2   :  { %v1236_v30 = vpack.c.bf16 %v1174_v28, %v1173_v27 }
 0x1c3   :  { %v1235_v31 = vpack.c.bf16 %v1172_v29, %v1171_v34  ;;  %v7022_v32 = vpop.f32.mrb[16].mxu1 }
 0x1c4   :  { %v941_v33 = vadd.f32 %v7022_v32, %v7577_v39  ;;  %v932_v35 = vpop.f32.mrb[17].mxu1 }
 0x1c5   :  { %v933_v36 = vadd.f32 %v7577_v39, %v932_v35  ;;  %v7023_v38 = vpop.f32.mrb[18].mxu1  ;;  %7088 = vmatprep.mubr.msk.bf16.mxu0 %vm785_vm1, %v1235_v31 }
 0x1c6   :  { %v944_v40 = vadd.f32 %v7023_v38, %v7577_v39  ;;  %v935_v41 = vpop.f32.mrb[19].mxu1  ;;  %7089 = vmatmul.mubr.msk.bf16.vlgmr.msra.gmra.mrb[52].mxu0 %vm785_vm1, %v1236_v30  ;;  %v1177_v44 = vmax.f32 %v941_v33, 0.0 }
 0x1c7   :  { %v936_v43 = vadd.f32 %v7577_v39, %v935_v41  ;;  %v1175_v47 = vmax.f32 %v933_v36, 0.0 }
 0x1c8   :  { %v1178_v46 = vmax.f32 %v944_v40, 0.0 }
 0x1c9   :  { %v1176_v48 = vmax.f32 %v936_v43, 0.0 }
 0x1ca   :  { %v1238_v49 = vpack.c.bf16 %v1178_v46, %v1177_v44 }
 0x1cb   :  { %v1237_v50 = vpack.c.bf16 %v1176_v48, %v1175_v47  ;;  %v7026_v51 = vpop.f32.mrb[20].mxu1 }
 0x1cc   :  { %v957_v52 = vadd.f32 %v7026_v51, %v7577_v39  ;;  %v948_v53 = vpop.f32.mrb[21].mxu1 }
 0x1cd   :  { %v949_v54 = vadd.f32 %v7577_v39, %v948_v53  ;;  %v7027_v55 = vpop.f32.mrb[22].mxu1  ;;  %7092 = vmatprep.mubr.msk.bf16.mxu0 %vm785_vm1, %v1237_v50 }
 0x1ce   :  { %v960_v56 = vadd.f32 %v7027_v55, %v7577_v39  ;;  %v951_v57 = vpop.f32.mrb[23].mxu1  ;;  %7093 = vmatmul.mubr.msk.bf16.gmra.mrb[56].mxu0 %vm785_vm1, %v1238_v49  ;;  %v1181_v59 = vmax.f32 %v957_v52, 0.0 }
 0x1cf   :  { %v952_v58 = vadd.f32 %v7577_v39, %v951_v57  ;;  %v1179_v61 = vmax.f32 %v949_v54, 0.0 }
 0x1d0   :  { %v1182_v60 = vmax.f32 %v960_v56, 0.0 }
 0x1d1   :  { %v1180_v62 = vmax.f32 %v952_v58, 0.0 }
 0x1d2   :  { %v1240_v63 = vpack.c.bf16 %v1182_v60, %v1181_v59 }
 0x1d3   :  { %v1239_v0 = vpack.c.bf16 %v1180_v62, %v1179_v61  ;;  %v7030_v1 = vpop.f32.mrb[24].mxu1 }
 0x1d4   :  { %v973_v2 = vadd.f32 %v7030_v1, %v7577_v39  ;;  %v964_v3 = vpop.f32.mrb[25].mxu1 }
 0x1d5   :  { %v965_v4 = vadd.f32 %v7577_v39, %v964_v3  ;;  %v7031_v5 = vpop.f32.mrb[26].mxu1  ;;  %7096 = vmatprep.mubr.msk.bf16.mxu0 %vm785_vm1, %v1239_v0 }
 0x1d6   :  { %v976_v7 = vadd.f32 %v7031_v5, %v7577_v39  ;;  %v967_v8 = vpop.f32.mrb[27].mxu1  ;;  %7097 = vmatmul.mubr.msk.bf16.gmra.mrb[60].mxu0 %vm785_vm1, %v1240_v63  ;;  %v1185_v11 = vmax.f32 %v973_v2, 0.0 }
 0x1d7   :  { %v968_v10 = vadd.f32 %v7577_v39, %v967_v8  ;;  %v1183_v13 = vmax.f32 %v965_v4, 0.0 }
 0x1d8   :  { %v1186_v12 = vmax.f32 %v976_v7, 0.0 }
 0x1d9   :  { %v1184_v14 = vmax.f32 %v968_v10, 0.0 }
 0x1da   :  { %v1242_v15 = vpack.c.bf16 %v1186_v12, %v1185_v11 }
 0x1db   :  { %v1241_v16 = vpack.c.bf16 %v1184_v14, %v1183_v13  ;;  %v7034_v17 = vpop.f32.mrb[28].mxu1 }
 0x1dc   :  { %v989_v18 = vadd.f32 %v7034_v17, %v7577_v39  ;;  %v980_v19 = vpop.f32.mrb[29].mxu1 }
 0x1dd   :  { %v981_v20 = vadd.f32 %v7577_v39, %v980_v19  ;;  %v7035_v21 = vpop.f32.mrb[30].mxu1  ;;  %7100 = vmatprep.mubr.msk.bf16.mxu0 %vm785_vm1, %v1241_v16 }
 0x1de   :  { %v992_v22 = vadd.f32 %v7035_v21, %v7577_v39  ;;  %v983_v23 = vpop.f32.mrb[31].mxu1  ;;  %7101 = vmatmul.mubr.msk.bf16.gmra.mrb[64].mxu0 %vm785_vm1, %v1242_v15  ;;  %v1189_v42 = vmax.f32 %v989_v18, 0.0 }
 0x1df   :  { %v984_v45 = vadd.f32 %v7577_v39, %v983_v23  ;;  %v1187_v9 = vmax.f32 %v981_v20, 0.0 }
 0x1e0   :  { %v1190_v24 = vmax.f32 %v992_v22, 0.0 }
 0x1e1   :  { %v1188_v25 = vmax.f32 %v984_v45, 0.0 }
 0x1e2   :  { %v1244_v6 = vpack.c.bf16 %v1190_v24, %v1189_v42 }
 0x1e3   :  { %v1243_v26 = vpack.c.bf16 %v1188_v25, %v1187_v9  ;;  %v7038_v37 = vpop.f32.mrb[32].mxu1 }
 0x1e4   :  { %v1005_v27 = vadd.f32 %v7038_v37, %v7577_v39  ;;  %v996_v28 = vpop.f32.mrb[33].mxu1 }
 0x1e5   :  { %v997_v34 = vadd.f32 %v7577_v39, %v996_v28  ;;  %v7039_v29 = vpop.f32.mrb[34].mxu1  ;;  %7104 = vmatprep.mubr.msk.bf16.mxu0 %vm785_vm1, %v1243_v26 }
 0x1e6   :  { %v1008_v30 = vadd.f32 %v7039_v29, %v7577_v39  ;;  %v999_v31 = vpop.f32.mrb[35].mxu1  ;;  %7105 = vmatmul.mubr.msk.bf16.gmra.mrb[68].mxu0 %vm785_vm1, %v1244_v6  ;;  %v1193_v33 = vmax.f32 %v1005_v27, 0.0 }
 0x1e7   :  { %v1000_v32 = vadd.f32 %v7577_v39, %v999_v31  ;;  %v1191_v36 = vmax.f32 %v997_v34, 0.0 }
 0x1e8   :  { %v1194_v35 = vmax.f32 %v1008_v30, 0.0 }
 0x1e9   :  { %v1192_v38 = vmax.f32 %v1000_v32, 0.0 }
 0x1ea   :  { %v1246_v40 = vpack.c.bf16 %v1194_v35, %v1193_v33 }
 0x1eb   :  { %v1245_v41 = vpack.c.bf16 %v1192_v38, %v1191_v36  ;;  %v7042_v43 = vpop.f32.mrb[36].mxu1 }
 0x1ec   :  { %v1021_v44 = vadd.f32 %v7042_v43, %v7577_v39  ;;  %v1012_v46 = vpop.f32.mrb[37].mxu1 }
 0x1ed   :  { %v1013_v47 = vadd.f32 %v7577_v39, %v1012_v46  ;;  %v7043_v48 = vpop.f32.mrb[38].mxu1  ;;  %7108 = vmatprep.mubr.msk.bf16.mxu0 %vm785_vm1, %v1245_v41 }
 0x1ee   :  { %v1024_v49 = vadd.f32 %v7043_v48, %v7577_v39  ;;  %v1015_v50 = vpop.f32.mrb[39].mxu1  ;;  %7109 = vmatmul.mubr.msk.bf16.gmra.mrb[72].mxu0 %vm785_vm1, %v1246_v40  ;;  %v1197_v52 = vmax.f32 %v1021_v44, 0.0 }
 0x1ef   :  { %v1016_v51 = vadd.f32 %v7577_v39, %v1015_v50  ;;  %v1195_v54 = vmax.f32 %v1013_v47, 0.0 }
 0x1f0   :  { %v1198_v53 = vmax.f32 %v1024_v49, 0.0 }
 0x1f1   :  { %v1196_v55 = vmax.f32 %v1016_v51, 0.0 }
 0x1f2   :  { %v1248_v56 = vpack.c.bf16 %v1198_v53, %v1197_v52 }
 0x1f3   :  { %v1247_v57 = vpack.c.bf16 %v1196_v55, %v1195_v54  ;;  %v7046_v58 = vpop.f32.mrb[40].mxu1 }
 0x1f4   :  { %v1037_v59 = vadd.f32 %v7046_v58, %v7577_v39  ;;  %v1028_v60 = vpop.f32.mrb[41].mxu1 }
 0x1f5   :  { %v1029_v61 = vadd.f32 %v7577_v39, %v1028_v60  ;;  %v7047_v62 = vpop.f32.mrb[42].mxu1  ;;  %7112 = vmatprep.mubr.msk.bf16.mxu0 %vm785_vm1, %v1247_v57 }
 0x1f6   :  { %v1040_v63 = vadd.f32 %v7047_v62, %v7577_v39  ;;  %v1031_v0 = vpop.f32.mrb[43].mxu1  ;;  %7113 = vmatmul.mubr.msk.bf16.gmra.mrb[76].mxu0 %vm785_vm1, %v1248_v56  ;;  %v1201_v2 = vmax.f32 %v1037_v59, 0.0 }
 0x1f7   :  { %v1032_v1 = vadd.f32 %v7577_v39, %v1031_v0  ;;  %v1199_v4 = vmax.f32 %v1029_v61, 0.0 }
 0x1f8   :  { %v1202_v3 = vmax.f32 %v1040_v63, 0.0 }
 0x1f9   :  { %v1200_v5 = vmax.f32 %v1032_v1, 0.0 }
 0x1fa   :  { %v1250_v7 = vpack.c.bf16 %v1202_v3, %v1201_v2 }
 0x1fb   :  { %v1249_v8 = vpack.c.bf16 %v1200_v5, %v1199_v4  ;;  %v7050_v10 = vpop.f32.mrb[44].mxu1 }
 0x1fc   :  { %v1053_v11 = vadd.f32 %v7050_v10, %v7577_v39  ;;  %v1044_v12 = vpop.f32.mrb[45].mxu1 }
 0x1fd   :  { %v1045_v13 = vadd.f32 %v7577_v39, %v1044_v12  ;;  %v7051_v14 = vpop.f32.mrb[46].mxu1  ;;  %7116 = vmatprep.mubr.msk.bf16.mxu0 %vm785_vm1, %v1249_v8 }
 0x1fe   :  { %v1056_v15 = vadd.f32 %v7051_v14, %v7577_v39  ;;  %v1047_v16 = vpop.f32.mrb[47].mxu1  ;;  %7117 = vmatmul.mubr.msk.bf16.gmra.mrb[80].mxu0 %vm785_vm1, %v1250_v7  ;;  %v1205_v18 = vmax.f32 %v1053_v11, 0.0 }
 0x1ff   :  { %v1048_v17 = vadd.f32 %v7577_v39, %v1047_v16  ;;  %v1203_v20 = vmax.f32 %v1045_v13, 0.0 }
 0x200   :  { %v1206_v19 = vmax.f32 %v1056_v15, 0.0 }
 0x201   :  { %v1204_v21 = vmax.f32 %v1048_v17, 0.0 }
 0x202   :  { %v1252_v22 = vpack.c.bf16 %v1206_v19, %v1205_v18 }
 0x203   :  { %v1251_v23 = vpack.c.bf16 %v1204_v21, %v1203_v20  ;;  %v7054_v45 = vpop.f32.mrb[48].mxu1 }
 0x204   :  { %v1069_v42 = vadd.f32 %v7054_v45, %v7577_v39  ;;  %v1060_v24 = vpop.f32.mrb[49].mxu1 }
 0x205   :  { %v1061_v9 = vadd.f32 %v7577_v39, %v1060_v24  ;;  %v7055_v25 = vpop.f32.mrb[50].mxu1  ;;  %7120 = vmatprep.mubr.msk.bf16.mxu0 %vm785_vm1, %v1251_v23 }
 0x206   :  { %v1072_v6 = vadd.f32 %v7055_v25, %v7577_v39  ;;  %v1063_v26 = vpop.f32.mrb[51].mxu1  ;;  %7121 = vmatmul.mubr.msk.bf16.gmra.mrb[84].mxu0 %vm785_vm1, %v1252_v22  ;;  %v1209_v27 = vmax.f32 %v1069_v42, 0.0 }
 0x207   :  { %v1064_v37 = vadd.f32 %v7577_v39, %v1063_v26  ;;  %v1207_v34 = vmax.f32 %v1061_v9, 0.0 }
 0x208   :  { %v1210_v28 = vmax.f32 %v1072_v6, 0.0 }
 0x209   :  { %v1208_v29 = vmax.f32 %v1064_v37, 0.0 }
 0x20a   :  { %v1254_v30 = vpack.c.bf16 %v1210_v28, %v1209_v27 }
 0x20b   :  { %v1253_v31 = vpack.c.bf16 %v1208_v29, %v1207_v34  ;;  %v7058_v32 = vpop.f32.mrb[52].mxu1 }
 0x20c   :  { %v1085_v33 = vadd.f32 %v7058_v32, %v7577_v39  ;;  %v1076_v35 = vpop.f32.mrb[53].mxu1 }
 0x20d   :  { %v1077_v36 = vadd.f32 %v7577_v39, %v1076_v35  ;;  %v7059_v38 = vpop.f32.mrb[54].mxu1  ;;  %7124 = vmatprep.mubr.msk.bf16.mxu0 %vm785_vm1, %v1253_v31 }
 0x20e   :  { %v1088_v40 = vadd.f32 %v7059_v38, %v7577_v39  ;;  %v1079_v41 = vpop.f32.mrb[55].mxu1  ;;  %7125 = vmatmul.mubr.msk.bf16.gmra.mrb[88].mxu0 %vm785_vm1, %v1254_v30  ;;  %v1213_v44 = vmax.f32 %v1085_v33, 0.0 }
 0x20f   :  { %v1080_v43 = vadd.f32 %v7577_v39, %v1079_v41  ;;  %v1211_v47 = vmax.f32 %v1077_v36, 0.0 }
 0x210   :  { %v1214_v46 = vmax.f32 %v1088_v40, 0.0 }
 0x211   :  { %v1212_v48 = vmax.f32 %v1080_v43, 0.0 }
 0x212   :  { %v1256_v49 = vpack.c.bf16 %v1214_v46, %v1213_v44 }
 0x213   :  { %v1255_v50 = vpack.c.bf16 %v1212_v48, %v1211_v47  ;;  %v7062_v51 = vpop.f32.mrb[56].mxu1 }
 0x214   :  { %v1101_v52 = vadd.f32 %v7062_v51, %v7577_v39  ;;  %v1092_v53 = vpop.f32.mrb[57].mxu1 }
 0x215   :  { %v1093_v54 = vadd.f32 %v7577_v39, %v1092_v53  ;;  %v7063_v55 = vpop.f32.mrb[58].mxu1  ;;  %7128 = vmatprep.mubr.msk.bf16.mxu0 %vm785_vm1, %v1255_v50 }
 0x216   :  { %v1104_v56 = vadd.f32 %v7063_v55, %v7577_v39  ;;  %v1095_v57 = vpop.f32.mrb[59].mxu1  ;;  %7129 = vmatmul.mubr.msk.bf16.gmra.mrb[92].mxu0 %vm785_vm1, %v1256_v49  ;;  %v1217_v59 = vmax.f32 %v1101_v52, 0.0 }
 0x217   :  { %v1096_v58 = vadd.f32 %v7577_v39, %v1095_v57  ;;  %v1215_v61 = vmax.f32 %v1093_v54, 0.0 }
 0x218   :  { %v1218_v60 = vmax.f32 %v1104_v56, 0.0 }
 0x219   :  { %v1216_v62 = vmax.f32 %v1096_v58, 0.0  ;;  %v7246_v58 = vld [vmem:[%s10167_s1 + $0x50] sm:$0xff]  }
 0x21a   :  { %v1258_v63 = vpack.c.bf16 %v1218_v60, %v1217_v59  ;;  %7152 = vmatprep.subr.bf16.mxu1 %v7246_v58  ;;  %v7684_v59 = vld [vmem:[%s10168_s2 + $0x2] ss:$0 sm:$0xff] }
 0x21b   :  { %v1257_v0 = vpack.c.bf16 %v1216_v62, %v1215_v61  ;;  %v7066_v1 = vpop.f32.mrb[60].mxu1  ;;  %7153 = vmatpush3.bf16.msra.mxu1 %v7246_v58 }
 0x21c   :  { %v1117_v2 = vadd.f32 %v7066_v1, %v7577_v39  ;;  %v1108_v3 = vpop.f32.mrb[61].mxu1 }
 0x21d   :  { %v1109_v4 = vadd.f32 %v7577_v39, %v1108_v3  ;;  %v7067_v5 = vpop.f32.mrb[62].mxu1  ;;  %7132 = vmatprep.mubr.msk.bf16.mxu0 %vm785_vm1, %v1257_v0 }
 0x21e   :  { %v1120_v7 = vadd.f32 %v7067_v5, %v7577_v39  ;;  %v1111_v8 = vpop.f32.mrb[63].mxu1  ;;  %7133 = vmatmul.mubr.msk.bf16.gmra.mrb[96].mxu0 %vm785_vm1, %v1258_v63  ;;  %v1221_v11 = vmax.f32 %v1117_v2, 0.0 }
 0x21f   :  { %v1112_v10 = vadd.f32 %v7577_v39, %v1111_v8  ;;  %v1219_v13 = vmax.f32 %v1109_v4, 0.0 }
 0x220   :  { %v1222_v12 = vmax.f32 %v1120_v7, 0.0 }
 0x221   :  { %v1220_v14 = vmax.f32 %v1112_v10, 0.0 }
 0x222   :  { %v1260_v15 = vpack.c.bf16 %v1222_v12, %v1221_v11 }
 0x223   :  { %v1259_v16 = vpack.c.bf16 %v1220_v14, %v1219_v13  ;;  %v7070_v17 = vpop.f32.mrb[64].mxu1 }
 0x224   :  { %v1133_v18 = vadd.f32 %v7070_v17, %v7577_v39  ;;  %v1124_v19 = vpop.f32.mrb[65].mxu1 }
 0x225   :  { %v1125_v20 = vadd.f32 %v7577_v39, %v1124_v19  ;;  %v7071_v21 = vpop.f32.mrb[66].mxu1  ;;  %7136 = vmatprep.mubr.msk.bf16.mxu0 %vm785_vm1, %v1259_v16 }
 0x226   :  { %v1136_v22 = vadd.f32 %v7071_v21, %v7577_v39  ;;  %v1127_v23 = vpop.f32.mrb[67].mxu1  ;;  %7137 = vmatmul.mubr.msk.bf16.gmra.mrb[100].mxu0 %vm785_vm1, %v1260_v15  ;;  %v1225_v42 = vmax.f32 %v1133_v18, 0.0 }
 0x227   :  { %v1128_v45 = vadd.f32 %v7577_v39, %v1127_v23  ;;  %v1223_v9 = vmax.f32 %v1125_v20, 0.0 }
 0x228   :  { %v1226_v24 = vmax.f32 %v1136_v22, 0.0 }
 0x229   :  { %v1224_v25 = vmax.f32 %v1128_v45, 0.0 }
 0x22a   :  { %v1262_v6 = vpack.c.bf16 %v1226_v24, %v1225_v42 }
 0x22b   :  { %v1261_v26 = vpack.c.bf16 %v1224_v25, %v1223_v9  ;;  %v7074_v37 = vpop.f32.mrb[68].mxu1 }
 0x22c   :  { %v1149_v27 = vadd.f32 %v7074_v37, %v7577_v39  ;;  %v1140_v28 = vpop.f32.mrb[69].mxu1 }
 0x22d   :  { %v1141_v34 = vadd.f32 %v7577_v39, %v1140_v28  ;;  %v7075_v29 = vpop.f32.mrb[70].mxu1  ;;  %7140 = vmatprep.mubr.msk.bf16.mxu0 %vm785_vm1, %v1261_v26 }
 0x22e   :  { %v1152_v30 = vadd.f32 %v7075_v29, %v7577_v39  ;;  %v1143_v31 = vpop.f32.mrb[71].mxu1  ;;  %7141 = vmatmul.mubr.msk.bf16.gmra.mrb[104].mxu0 %vm785_vm1, %v1262_v6  ;;  %v1229_v33 = vmax.f32 %v1149_v27, 0.0 }
 0x22f   :  { %v1144_v32 = vadd.f32 %v7577_v39, %v1143_v31  ;;  %v1227_v36 = vmax.f32 %v1141_v34, 0.0 }
 0x230   :  { %v1230_v35 = vmax.f32 %v1152_v30, 0.0 }
 0x231   :  { %v1228_v38 = vmax.f32 %v1144_v32, 0.0 }
 0x232   :  { %v1264_v40 = vpack.c.bf16 %v1230_v35, %v1229_v33 }
 0x233   :  { %v1263_v41 = vpack.c.bf16 %v1228_v38, %v1227_v36  ;;  %v7078_v43 = vpop.f32.mrb[72].mxu1 }
 0x234   :  { %v1165_v44 = vadd.f32 %v7078_v43, %v7577_v39  ;;  %v1156_v46 = vpop.f32.mrb[73].mxu1 }
 0x235   :  { %v1157_v47 = vadd.f32 %v7577_v39, %v1156_v46  ;;  %v7079_v48 = vpop.f32.mrb[74].mxu1  ;;  %7144 = vmatprep.mubr.msk.bf16.mxu0 %vm785_vm1, %v1263_v41 }
 0x236   :  { %v1168_v49 = vadd.f32 %v7079_v48, %v7577_v39  ;;  %v1159_v50 = vpop.f32.mrb[75].mxu1  ;;  %7145 = vmatmul.mubr.msk.bf16.gmra.mrb[108].mxu0 %vm785_vm1, %v1264_v40  ;;  %v1233_v52 = vmax.f32 %v1165_v44, 0.0 }
 0x237   :  { %v1160_v51 = vadd.f32 %v7577_v39, %v1159_v50  ;;  %v1231_v54 = vmax.f32 %v1157_v47, 0.0  ;;  %v7247_v39 = vld [vmem:[%s10167_s1 + $0x58] sm:$0xff]  }
 0x238   :  { %v1234_v53 = vmax.f32 %v1168_v49, 0.0  ;;  %7154 = vmatprep.subr.bf16.mxu1 %v7247_v39 }
 0x239   :  { %v1232_v55 = vmax.f32 %v1160_v51, 0.0  ;;  %7155 = vmatpush3.bf16.msra.mxu1 %v7247_v39 }
 0x23a   :  { %v1266_v56 = vpack.c.bf16 %v1234_v53, %v1233_v52 }
 0x23b   :  { %v1265_v57 = vpack.c.bf16 %v1232_v55, %v1231_v54 }
 0x23d   :  { %7148 = vmatprep.mubr.msk.bf16.mxu0 %vm785_vm1, %v1265_v57 }
 0x23e   :  { %7149 = vmatmul.mubr.msk.bf16.gmra.mrb[112].mxu0 %vm785_vm1, %v1266_v56  ;;  %vm6419_vm1 = vcmask 589312  }
 0x299   :  { %v7090_v60 = vpop.f32.mrb[52].mxu0 }
 0x29a   :  { %v1442_v61 = vadd.f32 %v7090_v60, %v7684_v59  ;;  %v1433_v62 = vpop.f32.mrb[53].mxu0 }
 0x29b   :  { %v1434_v63 = vadd.f32 %v7684_v59, %v1433_v62  ;;  %v7091_v0 = vpop.f32.mrb[54].mxu0 }
 0x29c   :  { %v1445_v1 = vadd.f32 %v7091_v0, %v7684_v59  ;;  %v1436_v2 = vpop.f32.mrb[55].mxu0  ;;  %v1697_v4 = vsel %vm267_vm0, %v1442_v61, -inf }
 0x29d   :  { %v1437_v3 = vadd.f32 %v7684_v59, %v1436_v2  ;;  %v1688_v7 = vsel %vm267_vm0, %v1434_v63, -inf }
 0x29e   :  { %v1698_v5 = vsel %vm267_vm0, %v1445_v1, -inf }
 0x29f   :  { %v1699_v8 = vmax.f32 %v1697_v4, %v1698_v5  ;;  %v1689_v10 = vsel %vm267_vm0, %v1437_v3, -inf }
 0x2a0   :  { %v1690_v11 = vmax.f32 %v1688_v7, %v1689_v10 }
 0x2a1   :  { %v1700_v12 = vrot.slane %v1699_v8, 4  ;;  %v7094_v13 = vpop.f32.mrb[56].mxu0 }
 0x2a2   :  { %v1691_v14 = vrot.slane %v1690_v11, 4  ;;  %v1458_v15 = vadd.f32 %v7094_v13, %v7684_v59  ;;  %v1449_v16 = vpop.f32.mrb[57].mxu0 }
 0x2a3   :  { %v1701_v17 = vmax.f32 %v1699_v8, %v1700_v12  ;;  %v1450_v18 = vadd.f32 %v7684_v59, %v1449_v16  ;;  %v7095_v19 = vpop.f32.mrb[58].mxu0 }
 0x2a4   :  { %v1692_v20 = vmax.f32 %v1690_v11, %v1691_v14  ;;  %v1461_v21 = vadd.f32 %v7095_v19, %v7684_v59  ;;  %v1452_v22 = vpop.f32.mrb[59].mxu0  ;;  %v1715_v24 = vsel %vm267_vm0, %v1458_v15, -inf }
 0x2a5   :  { %v1702_v23 = vrot.slane %v1701_v17, 2  ;;  %v1453_v45 = vadd.f32 %v7684_v59, %v1452_v22  ;;  %v1706_v6 = vsel %vm267_vm0, %v1450_v18, -inf }
 0x2a6   :  { %v1693_v42 = vrot.slane %v1692_v20, 2  ;;  %v1716_v9 = vsel %vm267_vm0, %v1461_v21, -inf }
 0x2a7   :  { %v1703_v25 = vmax.f32 %v1701_v17, %v1702_v23  ;;  %v1717_v26 = vmax.f32 %v1715_v24, %v1716_v9  ;;  %v1707_v37 = vsel %vm267_vm0, %v1453_v45, -inf }
 0x2a8   :  { %v1694_v27 = vmax.f32 %v1692_v20, %v1693_v42  ;;  %v1708_v28 = vmax.f32 %v1706_v6, %v1707_v37 }
 0x2a9   :  { %v1704_v34 = vrot.slane %v1703_v25, 1  ;;  %v1718_v29 = vrot.slane %v1717_v26, 4  ;;  %v7098_v30 = vpop.f32.mrb[60].mxu0 }
 0x2aa   :  { %v1695_v31 = vrot.slane %v1694_v27, 1  ;;  %v1709_v32 = vrot.slane %v1708_v28, 4  ;;  %v1474_v33 = vadd.f32 %v7098_v30, %v7684_v59  ;;  %v1465_v35 = vpop.f32.mrb[61].mxu0 }
 0x2ab   :  { %v1705_v36 = vmax.f32 %v1703_v25, %v1704_v34  ;;  %v1719_v38 = vmax.f32 %v1717_v26, %v1718_v29  ;;  %v1466_v40 = vadd.f32 %v7684_v59, %v1465_v35  ;;  %v7099_v41 = vpop.f32.mrb[62].mxu0 }
 0x2ac   :  { %v1696_v43 = vmax.f32 %v1694_v27, %v1695_v31  ;;  %v1710_v44 = vmax.f32 %v1708_v28, %v1709_v32  ;;  %v1477_v46 = vadd.f32 %v7099_v41, %v7684_v59  ;;  %v1468_v47 = vpop.f32.mrb[63].mxu0  ;;  %v1733_v50 = vsel %vm267_vm0, %v1474_v33, -inf }
 0x2ad   :  { %v1977_v48 = vpack.c.bf16 %v1705_v36, %v1705_v36  ;;  %v1720_v49 = vrot.slane %v1719_v38, 2  ;;  %v1469_v51 = vadd.f32 %v7684_v59, %v1468_v47  ;;  %v1724_v54 = vsel %vm267_vm0, %v1466_v40, -inf }
 0x2ae   :  { %v1976_v52 = vpack.c.bf16 %v1696_v43, %v1696_v43  ;;  %v1711_v53 = vrot.slane %v1710_v44, 2  ;;  %v1734_v55 = vsel %vm267_vm0, %v1477_v46, -inf }
 0x2af   :  { %v2045_v56 = vunpack.c.l.b16 %v1977_v48  ;;  %v1721_v57 = vmax.f32 %v1719_v38, %v1720_v49  ;;  %v1735_v58 = vmax.f32 %v1733_v50, %v1734_v55  ;;  %v1725_v39 = vsel %vm267_vm0, %v1469_v51, -inf }
 0x2b0   :  { %v2044_v60 = vunpack.c.l.b16 %v1976_v52  ;;  %v1712_v61 = vmax.f32 %v1710_v44, %v1711_v53  ;;  %v1726_v62 = vmax.f32 %v1724_v54, %v1725_v39 }
 0x2b1   :  { %v1722_v63 = vrot.slane %v1721_v57, 1  ;;  %v1736_v0 = vrot.slane %v1735_v58, 4  ;;  %v7102_v1 = vpop.f32.mrb[64].mxu0 }
 0x2b2   :  { %v2077_v2 = vsel %vm2076_vm2, %v2045_v56, %v2044_v60  ;;  %v1713_v3 = vrot.slane %v1712_v61, 1  ;;  %v1727_v4 = vrot.slane %v1726_v62, 4  ;;  %v1490_v5 = vadd.f32 %v7102_v1, %v7684_v59  ;;  %v1481_v7 = vpop.f32.mrb[65].mxu0 }
 0x2b3   :  { %v1723_v8 = vmax.f32 %v1721_v57, %v1722_v63  ;;  %v1737_v10 = vmax.f32 %v1735_v58, %v1736_v0  ;;  %v1482_v11 = vadd.f32 %v7684_v59, %v1481_v7  ;;  %v7103_v12 = vpop.f32.mrb[66].mxu0 }
 0x2b4   :  { %v1714_v13 = vmax.f32 %v1712_v61, %v1713_v3  ;;  %v1728_v14 = vmax.f32 %v1726_v62, %v1727_v4  ;;  %v1493_v15 = vadd.f32 %v7103_v12, %v7684_v59  ;;  %v1484_v16 = vpop.f32.mrb[67].mxu0  ;;  %v1751_v22 = vsel %vm267_vm0, %v1490_v5, -inf }
 0x2b5   :  { %v1979_v17 = vpack.c.bf16 %v1723_v8, %v1723_v8  ;;  %v1738_v18 = vrot.slane %v1737_v10, 2  ;;  %v1485_v19 = vadd.f32 %v7684_v59, %v1484_v16  ;;  %v1742_v42 = vsel %vm267_vm0, %v1482_v11, -inf }
 0x2b6   :  { %v1978_v20 = vpack.c.bf16 %v1714_v13, %v1714_v13  ;;  %v1729_v21 = vrot.slane %v1728_v14, 2  ;;  %v1752_v23 = vsel %vm267_vm0, %v1493_v15, -inf }
 0x2b7   :  { %v1739_v45 = vmax.f32 %v1737_v10, %v1738_v18  ;;  %v1753_v24 = vmax.f32 %v1751_v22, %v1752_v23  ;;  %v1743_v9 = vsel %vm267_vm0, %v1485_v19, -inf  ;;  %v2047_v37 = vunpack.c.l.b16 %v1979_v17 }
 0x2b8   :  { %v2046_v25 = vunpack.c.l.b16 %v1978_v20  ;;  %v1730_v6 = vmax.f32 %v1728_v14, %v1729_v21  ;;  %v1744_v26 = vmax.f32 %v1742_v42, %v1743_v9 }
 0x2b9   :  { %v1740_v27 = vrot.slane %v1739_v45, 1  ;;  %v1754_v28 = vrot.slane %v1753_v24, 4  ;;  %v7106_v34 = vpop.f32.mrb[68].mxu0 }
 0x2ba   :  { %v2079_v29 = vsel %vm2078_vm3, %v2046_v25, %v2077_v2  ;;  %v1731_v30 = vrot.slane %v1730_v6, 1  ;;  %v1745_v31 = vrot.slane %v1744_v26, 4  ;;  %v1506_v32 = vadd.f32 %v7106_v34, %v7684_v59  ;;  %v1497_v33 = vpop.f32.mrb[69].mxu0 }
 0x2bb   :  { %v1741_v35 = vmax.f32 %v1739_v45, %v1740_v27  ;;  %v2081_v36 = vsel %vm2080_vm4, %v2047_v37, %v2079_v29  ;;  %v1755_v38 = vmax.f32 %v1753_v24, %v1754_v28  ;;  %v1498_v40 = vadd.f32 %v7684_v59, %v1497_v33  ;;  %v7107_v41 = vpop.f32.mrb[70].mxu0 }
 0x2bc   :  { %v1732_v43 = vmax.f32 %v1730_v6, %v1731_v30  ;;  %v1746_v44 = vmax.f32 %v1744_v26, %v1745_v31  ;;  %v1509_v46 = vadd.f32 %v7107_v41, %v7684_v59  ;;  %v1500_v47 = vpop.f32.mrb[71].mxu0  ;;  %v1769_v53 = vsel %vm267_vm0, %v1506_v32, -inf }
 0x2bd   :  { %v1981_v48 = vpack.c.bf16 %v1741_v35, %v1741_v35  ;;  %v1756_v49 = vrot.slane %v1755_v38, 2  ;;  %v1501_v50 = vadd.f32 %v7684_v59, %v1500_v47  ;;  %v1760_v56 = vsel %vm267_vm0, %v1498_v40, -inf }
 0x2be   :  { %v1980_v51 = vpack.c.bf16 %v1732_v43, %v1732_v43  ;;  %v1747_v52 = vrot.slane %v1746_v44, 2  ;;  %v1770_v54 = vsel %vm267_vm0, %v1509_v46, -inf }
 0x2bf   :  { %v1757_v55 = vmax.f32 %v1755_v38, %v1756_v49  ;;  %v1771_v57 = vmax.f32 %v1769_v53, %v1770_v54  ;;  %v1761_v58 = vsel %vm267_vm0, %v1501_v50, -inf  ;;  %v2049_v62 = vunpack.c.l.b16 %v1981_v48 }
 0x2c0   :  { %v2048_v39 = vunpack.c.l.b16 %v1980_v51  ;;  %v1748_v60 = vmax.f32 %v1746_v44, %v1747_v52  ;;  %v1762_v61 = vmax.f32 %v1760_v56, %v1761_v58 }
 0x2c1   :  { %v1758_v63 = vrot.slane %v1757_v55, 1  ;;  %v1772_v0 = vrot.slane %v1771_v57, 4  ;;  %v7110_v1 = vpop.f32.mrb[72].mxu0 }
 0x2c2   :  { %v2083_v2 = vsel %vm2082_vm5, %v2048_v39, %v2081_v36  ;;  %v1749_v3 = vrot.slane %v1748_v60, 1  ;;  %v1763_v4 = vrot.slane %v1762_v61, 4  ;;  %v1522_v5 = vadd.f32 %v7110_v1, %v7684_v59  ;;  %v1513_v7 = vpop.f32.mrb[73].mxu0 }
 0x2c3   :  { %v1759_v8 = vmax.f32 %v1757_v55, %v1758_v63  ;;  %v1773_v10 = vmax.f32 %v1771_v57, %v1772_v0  ;;  %v1514_v11 = vadd.f32 %v7684_v59, %v1513_v7  ;;  %v7111_v12 = vpop.f32.mrb[74].mxu0  ;;  %v2085_v13 = vsel %vm2084_vm6, %v2049_v62, %v2083_v2 }
 0x2c4   :  { %v1750_v14 = vmax.f32 %v1748_v60, %v1749_v3  ;;  %v1764_v15 = vmax.f32 %v1762_v61, %v1763_v4  ;;  %v1525_v16 = vadd.f32 %v7111_v12, %v7684_v59  ;;  %v1516_v17 = vpop.f32.mrb[75].mxu0  ;;  %v1787_v23 = vsel %vm267_vm0, %v1522_v5, -inf }
 0x2c5   :  { %v1983_v18 = vpack.c.bf16 %v1759_v8, %v1759_v8  ;;  %v1774_v19 = vrot.slane %v1773_v10, 2  ;;  %v1517_v20 = vadd.f32 %v7684_v59, %v1516_v17  ;;  %v1778_v24 = vsel %vm267_vm0, %v1514_v11, -inf }
 0x2c6   :  { %v1982_v21 = vpack.c.bf16 %v1750_v14, %v1750_v14  ;;  %v1765_v22 = vrot.slane %v1764_v15, 2  ;;  %v1788_v45 = vsel %vm267_vm0, %v1525_v16, -inf }
 0x2c7   :  { %v1775_v42 = vmax.f32 %v1773_v10, %v1774_v19  ;;  %v1789_v9 = vmax.f32 %v1787_v23, %v1788_v45  ;;  %v1779_v25 = vsel %vm267_vm0, %v1517_v20, -inf  ;;  %v2051_v27 = vunpack.c.l.b16 %v1983_v18 }
 0x2c8   :  { %v2050_v6 = vunpack.c.l.b16 %v1982_v21  ;;  %v1766_v26 = vmax.f32 %v1764_v15, %v1765_v22  ;;  %v1780_v37 = vmax.f32 %v1778_v24, %v1779_v25 }
 0x2c9   :  { %v1776_v28 = vrot.slane %v1775_v42, 1  ;;  %v1790_v34 = vrot.slane %v1789_v9, 4  ;;  %v7114_v29 = vpop.f32.mrb[76].mxu0 }
 0x2ca   :  { %v1767_v30 = vrot.slane %v1766_v26, 1  ;;  %v1781_v31 = vrot.slane %v1780_v37, 4  ;;  %v1538_v32 = vadd.f32 %v7114_v29, %v7684_v59  ;;  %v1529_v33 = vpop.f32.mrb[77].mxu0  ;;  %v2087_v35 = vsel %vm2086_vm7, %v2050_v6, %v2085_v13 }
 0x2cb   :  { %v1777_v36 = vmax.f32 %v1775_v42, %v1776_v28  ;;  %v1791_v38 = vmax.f32 %v1789_v9, %v1790_v34  ;;  %v1530_v40 = vadd.f32 %v7684_v59, %v1529_v33  ;;  %v7115_v41 = vpop.f32.mrb[78].mxu0  ;;  %v7743_v43 = vsel %vm2088_vm8, %v2051_v27, %v2087_v35 }
 0x2cc   :  { %v1768_v44 = vmax.f32 %v1766_v26, %v1767_v30  ;;  %v1782_v46 = vmax.f32 %v1780_v37, %v1781_v31  ;;  %v1541_v47 = vadd.f32 %v7115_v41, %v7684_v59  ;;  %v1532_v48 = vpop.f32.mrb[79].mxu0  ;;  %v1805_v51 = vsel %vm267_vm0, %v1538_v32, -inf }
 0x2cd   :  { %v1985_v49 = vpack.c.bf16 %v1777_v36, %v1777_v36  ;;  %v1792_v50 = vrot.slane %v1791_v38, 2  ;;  %v1533_v52 = vadd.f32 %v7684_v59, %v1532_v48  ;;  %v1796_v55 = vsel %vm267_vm0, %v1530_v40, -inf }
 0x2ce   :  { %v1984_v53 = vpack.c.bf16 %v1768_v44, %v1768_v44  ;;  %v1783_v54 = vrot.slane %v1782_v46, 2  ;;  %v1806_v56 = vsel %vm267_vm0, %v1541_v47, -inf }
 0x2cf   :  { %v2053_v57 = vunpack.c.l.b16 %v1985_v49  ;;  %v1793_v58 = vmax.f32 %v1791_v38, %v1792_v50  ;;  %v1807_v39 = vmax.f32 %v1805_v51, %v1806_v56  ;;  %v1797_v60 = vsel %vm267_vm0, %v1533_v52, -inf }
 0x2d0   :  { %v2052_v61 = vunpack.c.l.b16 %v1984_v53  ;;  %v1784_v62 = vmax.f32 %v1782_v46, %v1783_v54  ;;  %v1798_v63 = vmax.f32 %v1796_v55, %v1797_v60 }
 0x2d1   :  { %v1794_v0 = vrot.slane %v1793_v58, 1  ;;  %v1808_v1 = vrot.slane %v1807_v39, 4  ;;  %v7118_v2 = vpop.f32.mrb[80].mxu0 }
 0x2d2   :  { %v2090_v3 = vsel %vm2076_vm2, %v2053_v57, %v2052_v61  ;;  %v1785_v4 = vrot.slane %v1784_v62, 1  ;;  %v1799_v5 = vrot.slane %v1798_v63, 4  ;;  %v1554_v7 = vadd.f32 %v7118_v2, %v7684_v59  ;;  %v1545_v8 = vpop.f32.mrb[81].mxu0 }
 0x2d3   :  { %v1795_v10 = vmax.f32 %v1793_v58, %v1794_v0  ;;  %v1809_v11 = vmax.f32 %v1807_v39, %v1808_v1  ;;  %v1546_v12 = vadd.f32 %v7684_v59, %v1545_v8  ;;  %v7119_v13 = vpop.f32.mrb[82].mxu0 }
 0x2d4   :  { %v1786_v14 = vmax.f32 %v1784_v62, %v1785_v4  ;;  %v1800_v15 = vmax.f32 %v1798_v63, %v1799_v5  ;;  %v1557_v16 = vadd.f32 %v7119_v13, %v7684_v59  ;;  %v1548_v17 = vpop.f32.mrb[83].mxu0  ;;  %v1823_v23 = vsel %vm267_vm0, %v1554_v7, -inf }
 0x2d5   :  { %v1987_v18 = vpack.c.bf16 %v1795_v10, %v1795_v10  ;;  %v1810_v19 = vrot.slane %v1809_v11, 2  ;;  %v1549_v20 = vadd.f32 %v7684_v59, %v1548_v17  ;;  %v1814_v24 = vsel %vm267_vm0, %v1546_v12, -inf }
 0x2d6   :  { %v1986_v21 = vpack.c.bf16 %v1786_v14, %v1786_v14  ;;  %v1801_v22 = vrot.slane %v1800_v15, 2  ;;  %v1824_v45 = vsel %vm267_vm0, %v1557_v16, -inf }
 0x2d7   :  { %v1811_v42 = vmax.f32 %v1809_v11, %v1810_v19  ;;  %v1825_v9 = vmax.f32 %v1823_v23, %v1824_v45  ;;  %v1815_v25 = vsel %vm267_vm0, %v1549_v20, -inf  ;;  %v2055_v27 = vunpack.c.l.b16 %v1987_v18 }
 0x2d8   :  { %v2054_v6 = vunpack.c.l.b16 %v1986_v21  ;;  %v1802_v26 = vmax.f32 %v1800_v15, %v1801_v22  ;;  %v1816_v37 = vmax.f32 %v1814_v24, %v1815_v25 }
 0x2d9   :  { %v1812_v28 = vrot.slane %v1811_v42, 1  ;;  %v1826_v34 = vrot.slane %v1825_v9, 4  ;;  %v7122_v29 = vpop.f32.mrb[84].mxu0 }
 0x2da   :  { %v2091_v30 = vsel %vm2078_vm3, %v2054_v6, %v2090_v3  ;;  %v1803_v31 = vrot.slane %v1802_v26, 1  ;;  %v1817_v32 = vrot.slane %v1816_v37, 4  ;;  %v1570_v33 = vadd.f32 %v7122_v29, %v7684_v59  ;;  %v1561_v35 = vpop.f32.mrb[85].mxu0 }
 0x2db   :  { %v1813_v36 = vmax.f32 %v1811_v42, %v1812_v28  ;;  %v2092_v38 = vsel %vm2080_vm4, %v2055_v27, %v2091_v30  ;;  %v1827_v40 = vmax.f32 %v1825_v9, %v1826_v34  ;;  %v1562_v41 = vadd.f32 %v7684_v59, %v1561_v35  ;;  %v7123_v44 = vpop.f32.mrb[86].mxu0 }
 0x2dc   :  { %v1804_v46 = vmax.f32 %v1802_v26, %v1803_v31  ;;  %v1818_v47 = vmax.f32 %v1816_v37, %v1817_v32  ;;  %v1573_v48 = vadd.f32 %v7123_v44, %v7684_v59  ;;  %v1564_v49 = vpop.f32.mrb[87].mxu0  ;;  %v1841_v55 = vsel %vm267_vm0, %v1570_v33, -inf }
 0x2dd   :  { %v1989_v50 = vpack.c.bf16 %v1813_v36, %v1813_v36  ;;  %v1828_v51 = vrot.slane %v1827_v40, 2  ;;  %v1565_v52 = vadd.f32 %v7684_v59, %v1564_v49  ;;  %v1832_v58 = vsel %vm267_vm0, %v1562_v41, -inf }
 0x2de   :  { %v1988_v53 = vpack.c.bf16 %v1804_v46, %v1804_v46  ;;  %v1819_v54 = vrot.slane %v1818_v47, 2  ;;  %v1842_v56 = vsel %vm267_vm0, %v1573_v48, -inf }
 0x2df   :  { %v1829_v57 = vmax.f32 %v1827_v40, %v1828_v51  ;;  %v1843_v39 = vmax.f32 %v1841_v55, %v1842_v56  ;;  %v1833_v60 = vsel %vm267_vm0, %v1565_v52, -inf  ;;  %v2057_v0 = vunpack.c.l.b16 %v1989_v50 }
 0x2e0   :  { %v2056_v61 = vunpack.c.l.b16 %v1988_v53  ;;  %v1820_v62 = vmax.f32 %v1818_v47, %v1819_v54  ;;  %v1834_v63 = vmax.f32 %v1832_v58, %v1833_v60 }
 0x2e1   :  { %v1830_v1 = vrot.slane %v1829_v57, 1  ;;  %v1844_v2 = vrot.slane %v1843_v39, 4  ;;  %v7126_v3 = vpop.f32.mrb[88].mxu0 }
 0x2e2   :  { %v2093_v4 = vsel %vm2082_vm5, %v2056_v61, %v2092_v38  ;;  %v1821_v5 = vrot.slane %v1820_v62, 1  ;;  %v1835_v7 = vrot.slane %v1834_v63, 4  ;;  %v1586_v8 = vadd.f32 %v7126_v3, %v7684_v59  ;;  %v1577_v10 = vpop.f32.mrb[89].mxu0 }
 0x2e3   :  { %v1831_v11 = vmax.f32 %v1829_v57, %v1830_v1  ;;  %v1845_v12 = vmax.f32 %v1843_v39, %v1844_v2  ;;  %v1578_v13 = vadd.f32 %v7684_v59, %v1577_v10  ;;  %v7127_v14 = vpop.f32.mrb[90].mxu0  ;;  %v2094_v15 = vsel %vm2084_vm6, %v2057_v0, %v2093_v4 }
 0x2e4   :  { %v1822_v16 = vmax.f32 %v1820_v62, %v1821_v5  ;;  %v1836_v17 = vmax.f32 %v1834_v63, %v1835_v7  ;;  %v1589_v18 = vadd.f32 %v7127_v14, %v7684_v59  ;;  %v1580_v19 = vpop.f32.mrb[91].mxu0  ;;  %v1859_v42 = vsel %vm267_vm0, %v1586_v8, -inf }
 0x2e5   :  { %v1991_v20 = vpack.c.bf16 %v1831_v11, %v1831_v11  ;;  %v1846_v21 = vrot.slane %v1845_v12, 2  ;;  %v1581_v22 = vadd.f32 %v7684_v59, %v1580_v19  ;;  %v1850_v25 = vsel %vm267_vm0, %v1578_v13, -inf }
 0x2e6   :  { %v1990_v23 = vpack.c.bf16 %v1822_v16, %v1822_v16  ;;  %v1837_v45 = vrot.slane %v1836_v17, 2  ;;  %v1860_v24 = vsel %vm267_vm0, %v1589_v18, -inf }
 0x2e7   :  { %v1847_v9 = vmax.f32 %v1845_v12, %v1846_v21  ;;  %v1861_v6 = vmax.f32 %v1859_v42, %v1860_v24  ;;  %v1851_v26 = vsel %vm267_vm0, %v1581_v22, -inf  ;;  %v2059_v34 = vunpack.c.l.b16 %v1991_v20 }
 0x2e8   :  { %v2058_v37 = vunpack.c.l.b16 %v1990_v23  ;;  %v1838_v27 = vmax.f32 %v1836_v17, %v1837_v45  ;;  %v1852_v28 = vmax.f32 %v1850_v25, %v1851_v26 }
 0x2e9   :  { %v1848_v29 = vrot.slane %v1847_v9, 1  ;;  %v1862_v30 = vrot.slane %v1861_v6, 4  ;;  %v7130_v31 = vpop.f32.mrb[92].mxu0 }
 0x2ea   :  { %v1839_v32 = vrot.slane %v1838_v27, 1  ;;  %v1853_v33 = vrot.slane %v1852_v28, 4  ;;  %v1602_v35 = vadd.f32 %v7130_v31, %v7684_v59  ;;  %v1593_v36 = vpop.f32.mrb[93].mxu0  ;;  %v2095_v38 = vsel %vm2086_vm7, %v2058_v37, %v2094_v15 }
 0x2eb   :  { %v1849_v40 = vmax.f32 %v1847_v9, %v1848_v29  ;;  %v1863_v41 = vmax.f32 %v1861_v6, %v1862_v30  ;;  %v1594_v44 = vadd.f32 %v7684_v59, %v1593_v36  ;;  %v7131_v46 = vpop.f32.mrb[94].mxu0  ;;  %v2096_v47 = vsel %vm2088_vm8, %v2059_v34, %v2095_v38 }
 0x2ec   :  { %v1840_v48 = vmax.f32 %v1838_v27, %v1839_v32  ;;  %v1854_v49 = vmax.f32 %v1852_v28, %v1853_v33  ;;  %v1877_v50 = vsel %vm267_vm0, %v1602_v35, -inf  ;;  %v1605_v51 = vadd.f32 %v7131_v46, %v7684_v59  ;;  %v1596_v52 = vpop.f32.mrb[95].mxu0 }
 0x2ed   :  { %v1993_v53 = vpack.c.bf16 %v1849_v40, %v1849_v40  ;;  %v1864_v54 = vrot.slane %v1863_v41, 2  ;;  %v1868_v55 = vsel %vm267_vm0, %v1594_v44, -inf  ;;  %v1597_v56 = vadd.f32 %v7684_v59, %v1596_v52 }
 0x2ee   :  { %v1992_v57 = vpack.c.bf16 %v1840_v48, %v1840_v48  ;;  %v1855_v58 = vrot.slane %v1854_v49, 2  ;;  %v1878_v39 = vsel %vm267_vm0, %v1605_v51, -inf  ;;  %v2111_v60 = vpack.c.b16 %v2096_v47, %v7743_v43 }
 0x2ef   :  { %v2061_v61 = vunpack.c.l.b16 %v1993_v53  ;;  %v1865_v62 = vmax.f32 %v1863_v41, %v1864_v54  ;;  %v1879_v63 = vmax.f32 %v1877_v50, %v1878_v39  ;;  %v1869_v0 = vsel %vm267_vm0, %v1597_v56, -inf }
 0x2f0   :  { %v2060_v1 = vunpack.c.l.b16 %v1992_v57  ;;  %v1856_v2 = vmax.f32 %v1854_v49, %v1855_v58  ;;  %v1870_v3 = vmax.f32 %v1868_v55, %v1869_v0  ;;  %7156 = vmatprep.mubr.msk.bf16.mxu1 %vm267_vm0, %v2111_v60 }
 0x2f1   :  { %v1866_v4 = vrot.slane %v1865_v62, 1  ;;  %v1880_v5 = vrot.slane %v1879_v63, 4  ;;  %v7134_v7 = vpop.f32.mrb[96].mxu0 }
 0x2f2   :  { %v2097_v8 = vsel %vm2076_vm2, %v2061_v61, %v2060_v1  ;;  %v1857_v10 = vrot.slane %v1856_v2, 1  ;;  %v1871_v11 = vrot.slane %v1870_v3, 4  ;;  %v1618_v12 = vadd.f32 %v7134_v7, %v7684_v59  ;;  %v1609_v43 = vpop.f32.mrb[97].mxu0 }
 0x2f3   :  { %v1867_v13 = vmax.f32 %v1865_v62, %v1866_v4  ;;  %v1881_v14 = vmax.f32 %v1879_v63, %v1880_v5  ;;  %v1610_v15 = vadd.f32 %v7684_v59, %v1609_v43  ;;  %v7135_v16 = vpop.f32.mrb[98].mxu0 }
 0x2f4   :  { %v1858_v17 = vmax.f32 %v1856_v2, %v1857_v10  ;;  %v1872_v18 = vmax.f32 %v1870_v3, %v1871_v11  ;;  %v1621_v19 = vadd.f32 %v7135_v16, %v7684_v59  ;;  %v1612_v20 = vpop.f32.mrb[99].mxu0  ;;  %v1895_v24 = vsel %vm267_vm0, %v1618_v12, -inf }
 0x2f5   :  { %v1995_v21 = vpack.c.bf16 %v1867_v13, %v1867_v13  ;;  %v1882_v22 = vrot.slane %v1881_v14, 2  ;;  %v1613_v23 = vadd.f32 %v7684_v59, %v1612_v20  ;;  %v1886_v6 = vsel %vm267_vm0, %v1610_v15, -inf }
 0x2f6   :  { %v1994_v45 = vpack.c.bf16 %v1858_v17, %v1858_v17  ;;  %v1873_v42 = vrot.slane %v1872_v18, 2  ;;  %v1896_v9 = vsel %vm267_vm0, %v1621_v19, -inf }
 0x2f7   :  { %v1883_v25 = vmax.f32 %v1881_v14, %v1882_v22  ;;  %v1897_v26 = vmax.f32 %v1895_v24, %v1896_v9  ;;  %v1887_v37 = vsel %vm267_vm0, %v1613_v23, -inf  ;;  %v2063_v29 = vunpack.c.l.b16 %v1995_v21 }
 0x2f8   :  { %v2062_v27 = vunpack.c.l.b16 %v1994_v45  ;;  %v1874_v28 = vmax.f32 %v1872_v18, %v1873_v42  ;;  %v1888_v34 = vmax.f32 %v1886_v6, %v1887_v37 }
 0x2f9   :  { %v1884_v30 = vrot.slane %v1883_v25, 1  ;;  %v1898_v31 = vrot.slane %v1897_v26, 4  ;;  %v7138_v32 = vpop.f32.mrb[100].mxu0 }
 0x2fa   :  { %v2098_v33 = vsel %vm2078_vm3, %v2062_v27, %v2097_v8  ;;  %v1875_v35 = vrot.slane %v1874_v28, 1  ;;  %v1889_v36 = vrot.slane %v1888_v34, 4  ;;  %v1634_v38 = vadd.f32 %v7138_v32, %v7684_v59  ;;  %v1625_v40 = vpop.f32.mrb[101].mxu0 }
 0x2fb   :  { %v1885_v41 = vmax.f32 %v1883_v25, %v1884_v30  ;;  %v2099_v44 = vsel %vm2080_vm4, %v2063_v29, %v2098_v33  ;;  %v1899_v46 = vmax.f32 %v1897_v26, %v1898_v31  ;;  %v1626_v47 = vadd.f32 %v7684_v59, %v1625_v40  ;;  %v7139_v48 = vpop.f32.mrb[102].mxu0 }
 0x2fc   :  { %v1876_v49 = vmax.f32 %v1874_v28, %v1875_v35  ;;  %v1890_v50 = vmax.f32 %v1888_v34, %v1889_v36  ;;  %v1637_v51 = vadd.f32 %v7139_v48, %v7684_v59  ;;  %v1628_v52 = vpop.f32.mrb[103].mxu0  ;;  %v1913_v58 = vsel %vm267_vm0, %v1634_v38, -inf }
 0x2fd   :  { %v1997_v53 = vpack.c.bf16 %v1885_v41, %v1885_v41  ;;  %v1900_v54 = vrot.slane %v1899_v46, 2  ;;  %v1629_v55 = vadd.f32 %v7684_v59, %v1628_v52  ;;  %v1904_v61 = vsel %vm267_vm0, %v1626_v47, -inf }
 0x2fe   :  { %v1996_v56 = vpack.c.bf16 %v1876_v49, %v1876_v49  ;;  %v1891_v57 = vrot.slane %v1890_v50, 2  ;;  %v1914_v39 = vsel %vm267_vm0, %v1637_v51, -inf }
 0x2ff   :  { %v1901_v60 = vmax.f32 %v1899_v46, %v1900_v54  ;;  %v1915_v62 = vmax.f32 %v1913_v58, %v1914_v39  ;;  %v1905_v63 = vsel %vm267_vm0, %v1629_v55, -inf  ;;  %v2065_v3 = vunpack.c.l.b16 %v1997_v53 }
 0x300   :  { %v2064_v0 = vunpack.c.l.b16 %v1996_v56  ;;  %v1892_v1 = vmax.f32 %v1890_v50, %v1891_v57  ;;  %v1906_v2 = vmax.f32 %v1904_v61, %v1905_v63 }
 0x301   :  { %v1902_v4 = vrot.slane %v1901_v60, 1  ;;  %v1916_v5 = vrot.slane %v1915_v62, 4  ;;  %v7142_v7 = vpop.f32.mrb[104].mxu0 }
 0x302   :  { %v2100_v8 = vsel %vm2082_vm5, %v2064_v0, %v2099_v44  ;;  %v1893_v10 = vrot.slane %v1892_v1, 1  ;;  %v1907_v11 = vrot.slane %v1906_v2, 4  ;;  %v1650_v12 = vadd.f32 %v7142_v7, %v7684_v59  ;;  %v1641_v43 = vpop.f32.mrb[105].mxu0 }
 0x303   :  { %v1903_v13 = vmax.f32 %v1901_v60, %v1902_v4  ;;  %v2101_v14 = vsel %vm2084_vm6, %v2065_v3, %v2100_v8  ;;  %v1917_v15 = vmax.f32 %v1915_v62, %v1916_v5  ;;  %v1642_v16 = vadd.f32 %v7684_v59, %v1641_v43  ;;  %v7143_v17 = vpop.f32.mrb[106].mxu0 }
 0x304   :  { %v1894_v18 = vmax.f32 %v1892_v1, %v1893_v10  ;;  %v1908_v19 = vmax.f32 %v1906_v2, %v1907_v11  ;;  %v1653_v20 = vadd.f32 %v7143_v17, %v7684_v59  ;;  %v1644_v21 = vpop.f32.mrb[107].mxu0  ;;  %v1931_v9 = vsel %vm267_vm0, %v1650_v12, -inf }
 0x305   :  { %v1999_v22 = vpack.c.bf16 %v1903_v13, %v1903_v13  ;;  %v1918_v23 = vrot.slane %v1917_v15, 2  ;;  %v1645_v45 = vadd.f32 %v7684_v59, %v1644_v21  ;;  %v1922_v26 = vsel %vm267_vm0, %v1642_v16, -inf }
 0x306   :  { %v1998_v42 = vpack.c.bf16 %v1894_v18, %v1894_v18  ;;  %v1909_v24 = vrot.slane %v1908_v19, 2  ;;  %v1932_v25 = vsel %vm267_vm0, %v1653_v20, -inf }
 0x307   :  { %v1919_v6 = vmax.f32 %v1917_v15, %v1918_v23  ;;  %v1933_v37 = vmax.f32 %v1931_v9, %v1932_v25  ;;  %v1923_v27 = vsel %vm267_vm0, %v1645_v45, -inf  ;;  %v2067_v30 = vunpack.c.l.b16 %v1999_v22 }
 0x308   :  { %v2066_v28 = vunpack.c.l.b16 %v1998_v42  ;;  %v1910_v34 = vmax.f32 %v1908_v19, %v1909_v24  ;;  %v1924_v29 = vmax.f32 %v1922_v26, %v1923_v27 }
 0x309   :  { %v1920_v31 = vrot.slane %v1919_v6, 1  ;;  %v1934_v32 = vrot.slane %v1933_v37, 4  ;;  %v7146_v33 = vpop.f32.mrb[108].mxu0 }
 0x30a   :  { %v2102_v35 = vsel %vm2086_vm7, %v2066_v28, %v2101_v14  ;;  %v1911_v36 = vrot.slane %v1910_v34, 1  ;;  %v1925_v38 = vrot.slane %v1924_v29, 4  ;;  %v1666_v40 = vadd.f32 %v7146_v33, %v7684_v59  ;;  %v1657_v41 = vpop.f32.mrb[109].mxu0 }
 0x30b   :  { %v7824_v44 = vsel %vm2088_vm8, %v2067_v30, %v2102_v35  ;;  %v1921_v46 = vmax.f32 %v1919_v6, %v1920_v31  ;;  %v1935_v47 = vmax.f32 %v1933_v37, %v1934_v32  ;;  %v1658_v48 = vadd.f32 %v7684_v59, %v1657_v41  ;;  %v7147_v49 = vpop.f32.mrb[110].mxu0 }
 0x30c   :  { %v1912_v50 = vmax.f32 %v1910_v34, %v1911_v36  ;;  %v1926_v51 = vmax.f32 %v1924_v29, %v1925_v38  ;;  %v1669_v52 = vadd.f32 %v7147_v49, %v7684_v59  ;;  %v1660_v53 = vpop.f32.mrb[111].mxu0  ;;  %v1949_v56 = vsel %vm267_vm0, %v1666_v40, -inf }
 0x30d   :  { %v2001_v54 = vpack.c.bf16 %v1921_v46, %v1921_v46  ;;  %v1936_v55 = vrot.slane %v1935_v47, 2  ;;  %v1661_v57 = vadd.f32 %v7684_v59, %v1660_v53  ;;  %v1940_v60 = vsel %vm267_vm0, %v1658_v48, -inf }
 0x30e   :  { %v2000_v58 = vpack.c.bf16 %v1912_v50, %v1912_v50  ;;  %v1927_v39 = vrot.slane %v1926_v51, 2  ;;  %v1950_v61 = vsel %vm267_vm0, %v1669_v52, -inf }
 0x30f   :  { %v2069_v62 = vunpack.c.l.b16 %v2001_v54  ;;  %v1937_v63 = vmax.f32 %v1935_v47, %v1936_v55  ;;  %v1951_v0 = vmax.f32 %v1949_v56, %v1950_v61  ;;  %v1941_v1 = vsel %vm267_vm0, %v1661_v57, -inf }
 0x310   :  { %v2068_v2 = vunpack.c.l.b16 %v2000_v58  ;;  %v1928_v3 = vmax.f32 %v1926_v51, %v1927_v39  ;;  %v1942_v4 = vmax.f32 %v1940_v60, %v1941_v1 }
 0x311   :  { %v1938_v5 = vrot.slane %v1937_v63, 1  ;;  %v1952_v7 = vrot.slane %v1951_v0, 4  ;;  %v7150_v8 = vpop.f32.mrb[112].mxu0 }
 0x312   :  { %v2104_v10 = vsel %vm2076_vm2, %v2069_v62, %v2068_v2  ;;  %v1929_v11 = vrot.slane %v1928_v3, 1  ;;  %v1943_v12 = vrot.slane %v1942_v4, 4  ;;  %v1682_v43 = vadd.f32 %v7150_v8, %v7684_v59  ;;  %v1673_v13 = vpop.f32.mrb[113].mxu0 }
 0x313   :  { %v1939_v14 = vmax.f32 %v1937_v63, %v1938_v5  ;;  %v1953_v15 = vmax.f32 %v1951_v0, %v1952_v7  ;;  %v1674_v16 = vadd.f32 %v7684_v59, %v1673_v13  ;;  %v7151_v17 = vpop.f32.mrb[114].mxu0  ;;  %vm6426_vm2 = vcmask 654912  }
 0x314   :  { %v1930_v18 = vmax.f32 %v1928_v3, %v1929_v11  ;;  %v1944_v19 = vmax.f32 %v1942_v4, %v1943_v12  ;;  %v1685_v20 = vadd.f32 %v7151_v17, %v7684_v59  ;;  %v1676_v21 = vpop.f32.mrb[115].mxu0  ;;  %v1967_v9 = vsel %vm267_vm0, %v1682_v43, -inf  ;;  %v7248_v4 = vld [vmem:[%s10167_s1 + $0x60] sm:$0xff]  }
 0x315   :  { %v2003_v22 = vpack.c.bf16 %v1939_v14, %v1939_v14  ;;  %v1954_v23 = vrot.slane %v1953_v15, 2  ;;  %v1677_v45 = vadd.f32 %v7684_v59, %v1676_v21  ;;  %v1958_v26 = vsel %vm267_vm0, %v1674_v16, -inf  ;;  %7160 = vmatprep.subr.bf16.mxu1 %v7248_v4 }
 0x316   :  { %v2002_v42 = vpack.c.bf16 %v1930_v18, %v1930_v18  ;;  %v1945_v24 = vrot.slane %v1944_v19, 2  ;;  %v1968_v25 = vsel %vm267_vm0, %v1685_v20, -inf  ;;  %v10170_v12 = vlaneseq }
 0x317   :  { %v1955_v6 = vmax.f32 %v1953_v15, %v1954_v23  ;;  %v1969_v37 = vmax.f32 %v1967_v9, %v1968_v25  ;;  %v1959_v27 = vsel %vm267_vm0, %v1677_v45, -inf  ;;  %v2071_v30 = vunpack.c.l.b16 %v2003_v22 }
 0x318   :  { %v2070_v28 = vunpack.c.l.b16 %v2002_v42  ;;  %v1946_v34 = vmax.f32 %v1944_v19, %v1945_v24  ;;  %v1960_v29 = vmax.f32 %v1958_v26, %v1959_v27  ;;  %v7860_v13 = vshrl.u32 %v10170_v12, 7 }
 0x319   :  { %v1956_v31 = vrot.slane %v1955_v6, 1  ;;  %v1970_v32 = vrot.slane %v1969_v37, 4 }
 0x31a   :  { %v2105_v59 = vsel %vm2078_vm3, %v2070_v28, %v2104_v10  ;;  %v1947_v33 = vrot.slane %v1946_v34, 1  ;;  %v1961_v35 = vrot.slane %v1960_v29, 4  ;;  %10311 = vst [vmem:[#allocation5_spill] sm:$0xff] %v7860_v13  ;;  %v7874_v9 = vsub.s32 0, %v7860_v13 }
 0x31b   :  { %v1957_v36 = vmax.f32 %v1955_v6, %v1956_v31  ;;  %v2106_v38 = vsel %vm2080_vm4, %v2071_v30, %v2105_v59  ;;  %v1971_v40 = vmax.f32 %v1969_v37, %v1970_v32  ;;  %vm6433_vm3 = vcmask 720512  }
 0x31c   :  { %v1948_v41 = vmax.f32 %v1946_v34, %v1947_v33  ;;  %v1962_v46 = vmax.f32 %v1960_v29, %v1961_v35  ;;  %vm6440_vm4 = vcmask 786112  }
 0x31d   :  { %v2005_v47 = vpack.c.bf16 %v1957_v36, %v1957_v36  ;;  %v1972_v48 = vrot.slane %v1971_v40, 2 }
 0x31e   :  { %v2004_v49 = vpack.c.bf16 %v1948_v41, %v1948_v41  ;;  %v1963_v50 = vrot.slane %v1962_v46, 2 }
 0x31f   :  { %v1973_v51 = vmax.f32 %v1971_v40, %v1972_v48  ;;  %v2073_v54 = vunpack.c.l.b16 %v2005_v47  ;;  %v7899_v48 = vld [vmem:[%s10168_s2 + $0x3] ss:$0 sm:$0xff] }
 0x320   :  { %v2072_v52 = vunpack.c.l.b16 %v2004_v49  ;;  %v1964_v53 = vmax.f32 %v1962_v46, %v1963_v50 }
 0x321   :  { %v1974_v55 = vrot.slane %v1973_v51, 1 }
 0x322   :  { %v2107_v56 = vsel %vm2082_vm5, %v2072_v52, %v2106_v38  ;;  %v1965_v57 = vrot.slane %v1964_v53, 1  ;;  %vm6447_vm5 = vcmask 851712  }
 0x323   :  { %v1975_v58 = vmax.f32 %v1973_v51, %v1974_v55  ;;  %v2108_v39 = vsel %vm2084_vm6, %v2073_v54, %v2107_v56  ;;  %vm6454_vm6 = vcmask 917312  }
 0x324   :  { %v1966_v60 = vmax.f32 %v1964_v53, %v1965_v57 }
 0x325   :  { %v2007_v61 = vpack.c.bf16 %v1975_v58, %v1975_v58 }
 0x326   :  { %v2006_v62 = vpack.c.bf16 %v1966_v60, %v1966_v60 }
 0x327   :  { %v2075_v0 = vunpack.c.l.b16 %v2007_v61 }
 0x328   :  { %v2074_v63 = vunpack.c.l.b16 %v2006_v62 }
 0x32a   :  { %v2109_v1 = vsel %vm2086_vm7, %v2074_v63, %v2108_v39  ;;  %vm6461_vm7 = vcmask 982912  }
 0x32b   :  { %v2110_v2 = vsel %vm2088_vm8, %v2075_v0, %v2109_v1  ;;  %vm6468_vm8 = vcmask 1048512  }
 0x32c   :  { %v2112_v3 = vpack.c.b16 %v2110_v2, %v7824_v44  ;;  %v7274_v44 = vmov 1966171168  }
 0x32d   :  { %v2186_v11 = vunpack.c.l.s4 %v7274_v44 }
 0x32e   :  { %7157 = vmatmul.mubr.msk.bf16.vlgmr.msra.gmra.mrb[76].mxu1 %vm267_vm0, %v2112_v3  ;;  %vm6412_vm0 = vcmask 523712  }
 0x32f   :  { %7161 = vmatpush3.bf16.msra.mxu1 %v7248_v4  ;;  %v2187_v43 = vunpack.c.0.s8 %v2186_v11 }
 0x331   :  { %v7863_v14 = vsub.s32 %v2187_v43, %v7860_v13 }
 0x401   :  { %v7853_v5 = vpop.f32.mrb[76].mxu1 }
 0x402   :  { %2544 = vrot.lane.b32.xlu1 %v7853_v5, %s7273_s26  ;;  %v2165_v7 = vpop.f32.mrb[77].mxu1  ;;  %v7878_v34 = vrot.slane %v7853_v5, %v7863_v14 }
 0x403   :  { %2540 = vrot.lane.b32.xlu0 %v2165_v7, %s7273_s26  ;;  %v7856_v8 = vpop.f32.mrb[78].mxu1  ;;  %v2184_v15 = vcombine.high %v2165_v7, %v2165_v7  ;;  %v2191_v16 = vrot.slane %v2165_v7, %v7863_v14 }
 0x404   :  { %v2168_v10 = vpop.f32.mrb[79].mxu1 }
 0x405   :  { %v2198_v17 = vrot.slane %v2184_v15, %v7863_v14  ;;  %v2199_v18 = vcombine.high %v2191_v16, %v2191_v16  ;;  %v2233_v20 = vcombine.high %v2168_v10, %v2168_v10  ;;  %v2240_v21 = vrot.slane %v2168_v10, %v7863_v14 }
 0x406   :  { %2546 = vrot.lane.b32.xlu1 %v7856_v8, %s7273_s26  ;;  %v2207_v22 = vrot.slane %v2191_v16, %v7863_v14 }
 0x407   :  { %2542 = vrot.lane.b32.xlu0 %v2168_v10, %s7273_s26  ;;  %v2200_v19 = vcombine.high %v2198_v17, %v2198_v17  ;;  %v2221_v23 = vrot.slane %v2199_v18, %v7863_v14  ;;  %v2214_v45 = vrot.slane %v2198_v17, %v7863_v14  ;;  %v2247_v24 = vrot.slane %v2233_v20, %v7863_v14 }
 0x408   :  { %v2248_v25 = vcombine.high %v2240_v21, %v2240_v21  ;;  %v2229_v6 = vcombine.high %v2207_v22, %v2207_v22  ;;  %v2383_v29 = vrot.slane %v2207_v22, %v7874_v9  ;;  %v2256_v31 = vrot.slane %v2240_v21, %v7863_v14 }
 0x409   :  { %v2228_v42 = vrot.slane %v2200_v19, %v7863_v14  ;;  %v2231_v26 = vcombine.high %v2221_v23, %v2221_v23  ;;  %v2230_v37 = vcombine.high %v2214_v45, %v2214_v45  ;;  %v2249_v28 = vcombine.high %v2247_v24, %v2247_v24 }
 0x40a   :  { %v2387_v30 = vrot.slane %v2221_v23, %v7874_v9  ;;  %v2270_v32 = vrot.slane %v2248_v25, %v7863_v14  ;;  %v2391_v59 = vrot.slane %v2229_v6, %v7874_v9  ;;  %v2399_v35 = vrot.slane %v2214_v45, %v7874_v9 }
 0x40b   :  { %v2232_v27 = vcombine.high %v2228_v42, %v2228_v42  ;;  %v2395_v33 = vrot.slane %v2231_v26, %v7874_v9  ;;  %v2403_v36 = vrot.slane %v2228_v42, %v7874_v9  ;;  %v2407_v38 = vrot.slane %v2230_v37, %v7874_v9 }
 0x40c   :  { %v7891_v41 = vrot.slane %v2247_v24, %v7863_v14  ;;  %v7894_v46 = vrot.slane %v2249_v28, %v7863_v14  ;;  %v2415_v53 = vrot.slane %v2256_v31, %v7874_v9  ;;  %v2419_v54 = vrot.slane %v2270_v32, %v7874_v9 }
 0x40d   :  { %v2411_v40 = vrot.slane %v2232_v27, %v7874_v9  ;;  %v2278_v10 = vcombine.high %v2256_v31, %v2256_v31  ;;  %v2280_v44 = vcombine.high %v2270_v32, %v2270_v32  ;;  %v2282_v24 = vcombine.high %v7853_v5, %v7853_v5 }
 0x40e   :  { %v2297_v25 = vcombine.high %v7878_v34, %v7878_v34  ;;  %v2431_v6 = vrot.slane %v7891_v41, %v7874_v9  ;;  %v2435_v26 = vrot.slane %v7894_v46, %v7874_v9  ;;  %v2279_v5 = vcombine.high %v7891_v41, %v7891_v41 }
 0x40f   :  { %v2423_v45 = vrot.slane %v2278_v10, %v7874_v9  ;;  %v2427_v42 = vrot.slane %v2280_v44, %v7874_v9 }
 0x475   :  { %v2541_v47 = vpop.permute.xlu0 %2540 }
 0x476   :  { %v2552_v49 = vadd.f32 %v2541_v47, %v2383_v29  ;;  %v2553_v50 = vadd.f32 %v2541_v47, %v2387_v30  ;;  %v2554_v51 = vadd.f32 %v2541_v47, %v2391_v59  ;;  %v2555_v52 = vadd.f32 %v2541_v47, %v2395_v33 }
 0x477   :  { %v2556_v55 = vadd.f32 %v2541_v47, %v2399_v35  ;;  %v2557_v56 = vadd.f32 %v2541_v47, %v2403_v36  ;;  %v2558_v0 = vadd.f32 %v2541_v47, %v2407_v38  ;;  %v2559_v1 = vadd.f32 %v2541_v47, %v2411_v40 }
 0x478   :  { %v2588_v57 = vadd.f32 %v7899_v48, %v2552_v49  ;;  %v2589_v58 = vadd.f32 %v7899_v48, %v2553_v50  ;;  %v2590_v39 = vadd.f32 %v7899_v48, %v2554_v51  ;;  %v2591_v60 = vadd.f32 %v7899_v48, %v2555_v52 }
 0x479   :  { %v2543_v61 = vpop.permute.xlu0 %2542  ;;  %v2592_v62 = vadd.f32 %v7899_v48, %v2556_v55  ;;  %v2593_v63 = vadd.f32 %v7899_v48, %v2557_v56  ;;  %v2594_v19 = vadd.f32 %v7899_v48, %v2558_v0  ;;  %v2595_v20 = vadd.f32 %v7899_v48, %v2559_v1 }
 0x47a   :  { %v2620_v2 = vmax.f32 %v2588_v57, 0.0  ;;  %v2621_v3 = vmax.f32 %v2589_v58, 0.0  ;;  %v2622_v4 = vmax.f32 %v2590_v39, 0.0  ;;  %v2623_v7 = vmax.f32 %v2591_v60, 0.0 }
 0x47b   :  { %v2624_v11 = vmax.f32 %v2592_v62, 0.0  ;;  %v2625_v43 = vmax.f32 %v2593_v63, 0.0  ;;  %v2560_v17 = vadd.f32 %v2543_v61, %v2415_v53  ;;  %v2561_v18 = vadd.f32 %v2543_v61, %v2419_v54  ;;  %v7940_v53 = vpop.permute.xlu1 %2544 }
 0x47c   :  { %v2652_v15 = vpack.c.bf16 %v2621_v3, %v2620_v2  ;;  %v2653_v16 = vpack.c.bf16 %v2623_v7, %v2622_v4  ;;  %v2626_v37 = vmax.f32 %v2594_v19, 0.0  ;;  %v2627_v27 = vmax.f32 %v2595_v20, 0.0 }
 0x47d   :  { %v2654_v21 = vpack.c.bf16 %v2625_v43, %v2624_v11  ;;  %v2596_v22 = vadd.f32 %v7899_v48, %v2560_v17  ;;  %v2597_v23 = vadd.f32 %v7899_v48, %v2561_v18  ;;  %v2562_v28 = vadd.f32 %v2543_v61, %v2423_v45 }
 0x47e   :  { %7162 = vmatprep.mubr.msk.bf16.mxu1 %vm2680_vm9, %v2652_v15  ;;  %v2563_v29 = vadd.f32 %v2543_v61, %v2427_v42  ;;  %v2564_v32 = vadd.f32 %v2543_v61, %v2431_v6  ;;  %v2565_v59 = vadd.f32 %v2543_v61, %v2435_v26  ;;  %v2281_v33 = vcombine.high %v7894_v46, %v7894_v46 }
 0x47f   :  { %7163 = vmatmul.mubr.msk.bf16.vlgmr.msra.gmra.mrb[80].mxu1 %vm2680_vm9, %v2653_v16  ;;  %v2628_v30 = vmax.f32 %v2596_v22, 0.0  ;;  %v2629_v31 = vmax.f32 %v2597_v23, 0.0  ;;  %v2296_v35 = vrot.slane %v2282_v24, %v7863_v14  ;;  %v2305_v36 = vrot.slane %v7878_v34, %v7863_v14 }
 0x480   :  { %7166 = vmatprep.mubr.msk.bf16.mxu1 %vm2680_vm9, %v2654_v21  ;;  %v2319_v38 = vrot.slane %v2297_v25, %v7863_v14  ;;  %v2655_v40 = vpack.c.bf16 %v2627_v27, %v2626_v37  ;;  %v2598_v47 = vadd.f32 %v7899_v48, %v2562_v28  ;;  %v2599_v49 = vadd.f32 %v7899_v48, %v2563_v29 }
 0x481   :  { %v2656_v50 = vpack.c.bf16 %v2629_v31, %v2628_v30  ;;  %v2600_v51 = vadd.f32 %v7899_v48, %v2564_v32  ;;  %v2601_v41 = vadd.f32 %v7899_v48, %v2565_v59  ;;  %v2439_v52 = vrot.slane %v2279_v5, %v7874_v9 }
 0x482   :  { %v2443_v46 = vrot.slane %v2281_v33, %v7874_v9  ;;  %v2298_v34 = vcombine.high %v2296_v35, %v2296_v35  ;;  %v2447_v54 = vrot.slane %v2305_v36, %v7874_v9  ;;  %v2451_v55 = vrot.slane %v2319_v38, %v7874_v9 }
 0x483   :  { %v2630_v56 = vmax.f32 %v2598_v47, 0.0  ;;  %v2631_v57 = vmax.f32 %v2599_v49, 0.0  ;;  %v2566_v58 = vadd.f32 %v2543_v61, %v2439_v52  ;;  %v2632_v60 = vmax.f32 %v2600_v51, 0.0 }
 0x484   :  { %v2567_v39 = vadd.f32 %v2543_v61, %v2443_v46  ;;  %v2633_v62 = vmax.f32 %v2601_v41, 0.0  ;;  %v2568_v63 = vadd.f32 %v7940_v53, %v2447_v54  ;;  %v2569_v0 = vadd.f32 %v7940_v53, %v2451_v55 }
 0x485   :  { %v2327_v1 = vcombine.high %v2305_v36, %v2305_v36  ;;  %v2329_v2 = vcombine.high %v2319_v38, %v2319_v38  ;;  %v2312_v3 = vrot.slane %v2296_v35, %v7863_v14  ;;  %v2326_v4 = vrot.slane %v2298_v34, %v7863_v14  ;;  %v2547_v38 = vpop.permute.xlu1 %2546 }
 0x486   :  { %v2338_v7 = vrot.slane %v7856_v8, %v7863_v14  ;;  %v2657_v10 = vpack.c.bf16 %v2631_v57, %v2630_v56  ;;  %v2602_v44 = vadd.f32 %v7899_v48, %v2566_v58  ;;  %v2603_v61 = vadd.f32 %v7899_v48, %v2567_v39 }
 0x487   :  { %7167 = vmatmul.mubr.msk.bf16.gmra.mrb[84].mxu1 %vm2680_vm9, %v2655_v40  ;;  %v2658_v11 = vpack.c.bf16 %v2633_v62, %v2632_v60  ;;  %v2604_v43 = vadd.f32 %v7899_v48, %v2568_v63  ;;  %v2605_v15 = vadd.f32 %v7899_v48, %v2569_v0  ;;  %v2455_v16 = vrot.slane %v2327_v1, %v7874_v9 }
 0x488   :  { %7170 = vmatprep.mubr.msk.bf16.mxu1 %vm2680_vm9, %v2656_v50  ;;  %v2459_v17 = vrot.slane %v2329_v2, %v7874_v9  ;;  %v2463_v18 = vrot.slane %v2312_v3, %v7874_v9  ;;  %v2467_v19 = vrot.slane %v2326_v4, %v7874_v9  ;;  %v2331_v20 = vcombine.high %v7856_v8, %v7856_v8 }
 0x489   :  { %v2346_v21 = vcombine.high %v2338_v7, %v2338_v7  ;;  %v2634_v22 = vmax.f32 %v2602_v44, 0.0  ;;  %v2635_v23 = vmax.f32 %v2603_v61, 0.0  ;;  %v2570_v45 = vadd.f32 %v7940_v53, %v2455_v16 }
 0x48a   :  { %v2571_v42 = vadd.f32 %v7940_v53, %v2459_v17  ;;  %v2636_v24 = vmax.f32 %v2604_v43, 0.0  ;;  %v2637_v25 = vmax.f32 %v2605_v15, 0.0  ;;  %v2572_v6 = vadd.f32 %v7940_v53, %v2463_v18 }
 0x48b   :  { %v2573_v26 = vadd.f32 %v7940_v53, %v2467_v19  ;;  %v2328_v37 = vcombine.high %v2312_v3, %v2312_v3  ;;  %v2330_v27 = vcombine.high %v2326_v4, %v2326_v4  ;;  %v2345_v28 = vrot.slane %v2331_v20, %v7863_v14 }
 0x48c   :  { %v2354_v8 = vrot.slane %v2338_v7, %v7863_v14  ;;  %v2368_v29 = vrot.slane %v2346_v21, %v7863_v14  ;;  %v2659_v30 = vpack.c.bf16 %v2635_v23, %v2634_v22  ;;  %v2606_v31 = vadd.f32 %v7899_v48, %v2570_v45 }
 0x48d   :  { %v2607_v32 = vadd.f32 %v7899_v48, %v2571_v42  ;;  %v2660_v59 = vpack.c.bf16 %v2637_v25, %v2636_v24  ;;  %v2608_v5 = vadd.f32 %v7899_v48, %v2572_v6  ;;  %v2609_v33 = vadd.f32 %v7899_v48, %v2573_v26 }
 0x48e   :  { %v2471_v35 = vrot.slane %v2328_v37, %v7874_v9  ;;  %v2475_v36 = vrot.slane %v2330_v27, %v7874_v9  ;;  %v2347_v40 = vcombine.high %v2345_v28, %v2345_v28  ;;  %v2479_v47 = vrot.slane %v2354_v8, %v7874_v9 }
 0x48f   :  { %7171 = vmatmul.mubr.msk.bf16.gmra.mrb[88].mxu1 %vm2680_vm9, %v2657_v10  ;;  %v2483_v49 = vrot.slane %v2368_v29, %v7874_v9  ;;  %v2638_v50 = vmax.f32 %v2606_v31, 0.0  ;;  %v2639_v51 = vmax.f32 %v2607_v32, 0.0  ;;  %v2640_v46 = vmax.f32 %v2608_v5, 0.0 }
 0x490   :  { %7174 = vmatprep.mubr.msk.bf16.mxu1 %vm2680_vm9, %v2658_v11  ;;  %v2574_v41 = vadd.f32 %v7940_v53, %v2471_v35  ;;  %v2575_v52 = vadd.f32 %v7940_v53, %v2475_v36  ;;  %v2641_v34 = vmax.f32 %v2609_v33, 0.0  ;;  %v2576_v54 = vadd.f32 %v2547_v38, %v2479_v47  ;;  %v8011_v36 = vld [vmem:[%s10168_s2 + $0x4] ss:$0 sm:$0xff] }
 0x491   :  { %v2577_v55 = vadd.f32 %v2547_v38, %v2483_v49  ;;  %v2376_v56 = vcombine.high %v2354_v8, %v2354_v8  ;;  %v2378_v57 = vcombine.high %v2368_v29, %v2368_v29  ;;  %v2361_v58 = vrot.slane %v2345_v28, %v7863_v14 }
 0x492   :  { %v2375_v39 = vrot.slane %v2347_v40, %v7863_v14  ;;  %v2661_v60 = vpack.c.bf16 %v2639_v51, %v2638_v50  ;;  %v2610_v62 = vadd.f32 %v7899_v48, %v2574_v41  ;;  %v2611_v63 = vadd.f32 %v7899_v48, %v2575_v52  ;;  %v8018_v50 = vld [vmem:[%s10168_s2 + $0x5] ss:$0 sm:$0xff] }
 0x493   :  { %v2662_v0 = vpack.c.bf16 %v2641_v34, %v2640_v46  ;;  %v2612_v1 = vadd.f32 %v7899_v48, %v2576_v54  ;;  %v2613_v53 = vadd.f32 %v7899_v48, %v2577_v55  ;;  %v2487_v2 = vrot.slane %v2376_v56, %v7874_v9 }
 0x494   :  { %v2491_v3 = vrot.slane %v2378_v57, %v7874_v9  ;;  %v2495_v4 = vrot.slane %v2361_v58, %v7874_v9  ;;  %v2499_v7 = vrot.slane %v2375_v39, %v7874_v9  ;;  %v2642_v10 = vmax.f32 %v2610_v62, 0.0 }
 0x495   :  { %v2643_v44 = vmax.f32 %v2611_v63, 0.0  ;;  %v2578_v61 = vadd.f32 %v2547_v38, %v2487_v2  ;;  %v2644_v43 = vmax.f32 %v2612_v1, 0.0  ;;  %v2645_v15 = vmax.f32 %v2613_v53, 0.0 }
 0x496   :  { %v2579_v11 = vadd.f32 %v2547_v38, %v2491_v3  ;;  %v2580_v16 = vadd.f32 %v2547_v38, %v2495_v4  ;;  %v2581_v17 = vadd.f32 %v2547_v38, %v2499_v7  ;;  %v2377_v18 = vcombine.high %v2361_v58, %v2361_v58 }
 0x497   :  { %7175 = vmatmul.mubr.msk.bf16.gmra.mrb[92].mxu1 %vm2680_vm9, %v2659_v30  ;;  %v2379_v19 = vcombine.high %v2375_v39, %v2375_v39  ;;  %v2663_v20 = vpack.c.bf16 %v2643_v44, %v2642_v10  ;;  %v2614_v21 = vadd.f32 %v7899_v48, %v2578_v61  ;;  %v2664_v23 = vpack.c.bf16 %v2645_v15, %v2644_v43 }
 0x498   :  { %7178 = vmatprep.mubr.msk.bf16.mxu1 %vm2680_vm9, %v2660_v59  ;;  %v2615_v22 = vadd.f32 %v7899_v48, %v2579_v11  ;;  %v2616_v45 = vadd.f32 %v7899_v48, %v2580_v16  ;;  %v2617_v42 = vadd.f32 %v7899_v48, %v2581_v17  ;;  %v2503_v24 = vrot.slane %v2377_v18, %v7874_v9 }
 0x499   :  { %v2507_v25 = vrot.slane %v2379_v19, %v7874_v9  ;;  %v2646_v6 = vmax.f32 %v2614_v21, 0.0  ;;  %v7275_v35 = vmov 0  }
 0x49a   :  { %v2647_v26 = vmax.f32 %v2615_v22, 0.0  ;;  %v2582_v37 = vadd.f32 %v2547_v38, %v2503_v24  ;;  %v2648_v28 = vmax.f32 %v2616_v45, 0.0  ;;  %v2649_v8 = vmax.f32 %v2617_v42, 0.0  ;;  %7202 = vset.pattern.permute.xlu0 %v7275_v35  ;;  %7203 = vset.pattern.permute.xlu1 %v7275_v35 }
 0x49b   :  { %v2583_v27 = vadd.f32 %v2547_v38, %v2507_v25 }
 0x49c   :  { %v2665_v29 = vpack.c.bf16 %v2647_v26, %v2646_v6  ;;  %v2618_v30 = vadd.f32 %v7899_v48, %v2582_v37  ;;  %v2666_v32 = vpack.c.bf16 %v2649_v8, %v2648_v28 }
 0x49d   :  { %v2619_v31 = vadd.f32 %v7899_v48, %v2583_v27 }
 0x49e   :  { %v2650_v59 = vmax.f32 %v2618_v30, 0.0 }
 0x49f   :  { %7179 = vmatmul.mubr.msk.bf16.gmra.mrb[96].mxu1 %vm2680_vm9, %v2661_v60  ;;  %v2651_v5 = vmax.f32 %v2619_v31, 0.0 }
 0x4a0   :  { %7182 = vmatprep.mubr.msk.bf16.mxu1 %vm2680_vm9, %v2662_v0 }
 0x4a1   :  { %v2667_v33 = vpack.c.bf16 %v2651_v5, %v2650_v59 }
 0x4a7   :  { %7183 = vmatmul.mubr.msk.bf16.gmra.mrb[100].mxu1 %vm2680_vm9, %v2663_v20 }
 0x4a8   :  { %7186 = vmatprep.mubr.msk.bf16.mxu1 %vm2680_vm9, %v2664_v23 }
 0x4af   :  { %7187 = vmatmul.mubr.msk.bf16.gmra.mrb[104].mxu1 %vm2680_vm9, %v2665_v29 }
 0x4b0   :  { %7190 = vmatprep.mubr.msk.bf16.mxu1 %vm2680_vm9, %v2666_v32 }
 0x4b7   :  { %7191 = vmatmul.mubr.msk.bf16.gmra.mrb[108].mxu1 %vm2680_vm9, %v2667_v33 }
 0x552   :  { %v7164_v38 = vpop.f32.mrb[80].mxu1 }
 0x553   :  { %v2772_v48 = vadd.f32 %v7164_v38, %v8011_v36  ;;  %v2763_v40 = vpop.f32.mrb[81].mxu1 }
 0x554   :  { %v2764_v47 = vadd.f32 %v8011_v36, %v2763_v40  ;;  %v7165_v49 = vpop.f32.mrb[82].mxu1 }
 0x555   :  { %v2892_v51 = vmax.f32 %v2772_v48, 0.0  ;;  %v2775_v41 = vadd.f32 %v7165_v49, %v8011_v36  ;;  %v2766_v52 = vpop.f32.mrb[83].mxu1 }
 0x556   :  { %v2890_v46 = vmax.f32 %v2764_v47, 0.0  ;;  %v2767_v34 = vadd.f32 %v8011_v36, %v2766_v52 }
 0x557   :  { %v2928_v54 = vmul.f32 %v8018_v50, %v2892_v51  ;;  %v2893_v56 = vmax.f32 %v2775_v41, 0.0 }
 0x558   :  { %v2891_v55 = vmax.f32 %v2767_v34, 0.0  ;;  %v2926_v58 = vmul.f32 %v8018_v50, %v2890_v46 }
 0x559   :  { %v2964_v57 = vsel %vm2680_vm9, %v2928_v54, 0.0  ;;  %v2929_v10 = vmul.f32 %v8018_v50, %v2893_v56 }
 0x55a   :  { %2965 = vadd.xlane.f32.xlu0 %v2964_v57  ;;  %v7168_v39 = vpop.f32.mrb[84].mxu1  ;;  %v2927_v60 = vmul.f32 %v8018_v50, %v2891_v55  ;;  %v2958_v7 = vsel %vm2680_vm9, %v2926_v58, 0.0 }
 0x55b   :  { %v2788_v62 = vadd.f32 %v7168_v39, %v8011_v36  ;;  %v2779_v63 = vpop.f32.mrb[85].mxu1  ;;  %v2967_v18 = vsel %vm2680_vm9, %v2929_v10, 0.0 }
 0x55c   :  { %v2780_v0 = vadd.f32 %v8011_v36, %v2779_v63  ;;  %v7169_v1 = vpop.f32.mrb[86].mxu1  ;;  %v2961_v53 = vsel %vm2680_vm9, %v2927_v60, 0.0 }
 0x55d   :  { %v2896_v2 = vmax.f32 %v2788_v62, 0.0  ;;  %v2791_v3 = vadd.f32 %v7169_v1, %v8011_v36  ;;  %v2782_v4 = vpop.f32.mrb[87].mxu1  ;;  %2962 = vadd.xlane.f32.xlu1 %v2961_v53 }
 0x55e   :  { %v2894_v44 = vmax.f32 %v2780_v0, 0.0  ;;  %v2783_v61 = vadd.f32 %v8011_v36, %v2782_v4  ;;  %2959 = vadd.xlane.f32.xlu0 %v2958_v7 }
 0x55f   :  { %v2897_v11 = vmax.f32 %v2791_v3, 0.0  ;;  %v2932_v43 = vmul.f32 %v8018_v50, %v2896_v2 }
 0x560   :  { %v2930_v15 = vmul.f32 %v8018_v50, %v2894_v44  ;;  %v2895_v16 = vmax.f32 %v2783_v61, 0.0 }
 0x561   :  { %v2976_v17 = vsel %vm2680_vm9, %v2932_v43, 0.0  ;;  %v2933_v19 = vmul.f32 %v8018_v50, %v2897_v11 }
 0x562   :  { %v7172_v20 = vpop.f32.mrb[88].mxu1  ;;  %2977 = vadd.xlane.f32.xlu1 %v2976_v17  ;;  %2968 = vadd.xlane.f32.xlu0 %v2967_v18  ;;  %v2970_v42 = vsel %vm2680_vm9, %v2930_v15, 0.0  ;;  %v2931_v37 = vmul.f32 %v8018_v50, %v2895_v16 }
 0x563   :  { %v2804_v21 = vadd.f32 %v7172_v20, %v8011_v36  ;;  %v2795_v22 = vpop.f32.mrb[89].mxu1  ;;  %v2979_v26 = vsel %vm2680_vm9, %v2933_v19, 0.0 }
 0x564   :  { %v2796_v23 = vadd.f32 %v8011_v36, %v2795_v22  ;;  %v7173_v45 = vpop.f32.mrb[90].mxu1  ;;  %v2973_v59 = vsel %vm2680_vm9, %v2931_v37, 0.0 }
 0x565   :  { %v2900_v24 = vmax.f32 %v2804_v21, 0.0  ;;  %v2807_v25 = vadd.f32 %v7173_v45, %v8011_v36  ;;  %v2798_v6 = vpop.f32.mrb[91].mxu1 }
 0x566   :  { %v2898_v27 = vmax.f32 %v2796_v23, 0.0  ;;  %v2799_v28 = vadd.f32 %v8011_v36, %v2798_v6  ;;  %2971 = vadd.xlane.f32.xlu1 %v2970_v42  ;;  %2980 = vadd.xlane.f32.xlu0 %v2979_v26 }
 0x567   :  { %v2901_v8 = vmax.f32 %v2807_v25, 0.0  ;;  %v2936_v29 = vmul.f32 %v8018_v50, %v2900_v24 }
 0x568   :  { %v2934_v30 = vmul.f32 %v8018_v50, %v2898_v27  ;;  %v2899_v31 = vmax.f32 %v2799_v28, 0.0 }
 0x569   :  { %v2988_v32 = vsel %vm2680_vm9, %v2936_v29, 0.0  ;;  %v2937_v5 = vmul.f32 %v8018_v50, %v2901_v8 }
 0x56a   :  { %v7176_v33 = vpop.f32.mrb[92].mxu1  ;;  %2989 = vadd.xlane.f32.xlu1 %v2988_v32  ;;  %2974 = vadd.xlane.f32.xlu0 %v2973_v59  ;;  %v2982_v47 = vsel %vm2680_vm9, %v2934_v30, 0.0  ;;  %v2935_v46 = vmul.f32 %v8018_v50, %v2899_v31 }
 0x56b   :  { %v2820_v35 = vadd.f32 %v7176_v33, %v8011_v36  ;;  %v2811_v38 = vpop.f32.mrb[93].mxu1  ;;  %v2991_v52 = vsel %vm2680_vm9, %v2937_v5, 0.0 }
 0x56c   :  { %v2812_v48 = vadd.f32 %v8011_v36, %v2811_v38  ;;  %v7177_v40 = vpop.f32.mrb[94].mxu1  ;;  %v2985_v60 = vsel %vm2680_vm9, %v2935_v46, 0.0 }
 0x56d   :  { %v2904_v49 = vmax.f32 %v2820_v35, 0.0  ;;  %v2823_v51 = vadd.f32 %v7177_v40, %v8011_v36  ;;  %v2814_v41 = vpop.f32.mrb[95].mxu1 }
 0x56e   :  { %v2902_v34 = vmax.f32 %v2812_v48, 0.0  ;;  %v2815_v54 = vadd.f32 %v8011_v36, %v2814_v41  ;;  %2983 = vadd.xlane.f32.xlu1 %v2982_v47  ;;  %2992 = vadd.xlane.f32.xlu0 %v2991_v52 }
 0x56f   :  { %v2905_v55 = vmax.f32 %v2823_v51, 0.0  ;;  %v2940_v56 = vmul.f32 %v8018_v50, %v2904_v49 }
 0x570   :  { %v2938_v57 = vmul.f32 %v8018_v50, %v2902_v34  ;;  %v2903_v58 = vmax.f32 %v2815_v54, 0.0 }
 0x571   :  { %v3000_v39 = vsel %vm2680_vm9, %v2940_v56, 0.0  ;;  %v2941_v62 = vmul.f32 %v8018_v50, %v2905_v55 }
 0x572   :  { %v7180_v63 = vpop.f32.mrb[96].mxu1  ;;  %3001 = vadd.xlane.f32.xlu1 %v3000_v39  ;;  %2986 = vadd.xlane.f32.xlu0 %v2985_v60  ;;  %v2994_v3 = vsel %vm2680_vm9, %v2938_v57, 0.0  ;;  %v2939_v61 = vmul.f32 %v8018_v50, %v2903_v58 }
 0x573   :  { %v2836_v0 = vadd.f32 %v7180_v63, %v8011_v36  ;;  %v2827_v1 = vpop.f32.mrb[97].mxu1  ;;  %v3003_v44 = vsel %vm2680_vm9, %v2941_v62, 0.0 }
 0x574   :  { %v2828_v53 = vadd.f32 %v8011_v36, %v2827_v1  ;;  %v7181_v2 = vpop.f32.mrb[98].mxu1  ;;  %v2997_v20 = vsel %vm2680_vm9, %v2939_v61, 0.0 }
 0x575   :  { %v2908_v4 = vmax.f32 %v2836_v0, 0.0  ;;  %v2839_v7 = vadd.f32 %v7181_v2, %v8011_v36  ;;  %v2830_v10 = vpop.f32.mrb[99].mxu1 }
 0x576   :  { %v2906_v11 = vmax.f32 %v2828_v53, 0.0  ;;  %v2831_v43 = vadd.f32 %v8011_v36, %v2830_v10  ;;  %2995 = vadd.xlane.f32.xlu1 %v2994_v3  ;;  %3004 = vadd.xlane.f32.xlu0 %v3003_v44 }
 0x577   :  { %v2909_v15 = vmax.f32 %v2839_v7, 0.0  ;;  %v2944_v16 = vmul.f32 %v8018_v50, %v2908_v4 }
 0x578   :  { %v2942_v17 = vmul.f32 %v8018_v50, %v2906_v11  ;;  %v2907_v18 = vmax.f32 %v2831_v43, 0.0 }
 0x579   :  { %v3012_v19 = vsel %vm2680_vm9, %v2944_v16, 0.0  ;;  %v2945_v21 = vmul.f32 %v8018_v50, %v2909_v15 }
 0x57a   :  { %v7184_v22 = vpop.f32.mrb[100].mxu1  ;;  %3013 = vadd.xlane.f32.xlu1 %v3012_v19  ;;  %2998 = vadd.xlane.f32.xlu0 %v2997_v20  ;;  %v3006_v25 = vsel %vm2680_vm9, %v2942_v17, 0.0  ;;  %v2943_v28 = vmul.f32 %v8018_v50, %v2907_v18 }
 0x57b   :  { %v2852_v23 = vadd.f32 %v7184_v22, %v8011_v36  ;;  %v2843_v45 = vpop.f32.mrb[101].mxu1  ;;  %v3015_v27 = vsel %vm2680_vm9, %v2945_v21, 0.0 }
 0x57c   :  { %v2844_v42 = vadd.f32 %v8011_v36, %v2843_v45  ;;  %v7185_v24 = vpop.f32.mrb[102].mxu1  ;;  %v3009_v5 = vsel %vm2680_vm9, %v2943_v28, 0.0 }
 0x57d   :  { %v2912_v6 = vmax.f32 %v2852_v23, 0.0  ;;  %v2855_v26 = vadd.f32 %v7185_v24, %v8011_v36  ;;  %v2846_v37 = vpop.f32.mrb[103].mxu1  ;;  %v22_v23 = vld [vmem:[%s10168_s2 + $0x6] sm:$0x1]  ;;  %s7276_s2 = smov [#allocation2]  }
 0x57e   :  { %v2910_v8 = vmax.f32 %v2844_v42, 0.0  ;;  %v2847_v29 = vadd.f32 %v8011_v36, %v2846_v37  ;;  %3007 = vadd.xlane.f32.xlu1 %v3006_v25  ;;  %3016 = vadd.xlane.f32.xlu0 %v3015_v27  ;;  %s6576_s7 = sshll.u32 %s7276_s2, 4  ;;  %s6577_s7 = int_to_ptr.vmem [resolvable:$true] %s6576_s7 }
 0x57f   :  { %v2948_v30 = vmul.f32 %v8018_v50, %v2912_v6  ;;  %v2913_v32 = vmax.f32 %v2855_v26, 0.0  ;;  %s7249_s8 = scalar_lea.vmem %s6577_s7, 32  ;;  %p7254_p1 = scmp.lt.s32.totalorder %s6577_s7, %s6577_s7 }
 0x580   :  { %v2911_v31 = vmax.f32 %v2847_v29, 0.0  ;;  %v2946_v33 = vmul.f32 %v8018_v50, %v2910_v8  ;;  %p7250_p0 = scmp.ne.s32.totalorder %s6577_s7, %s7249_s8  ;;  %p7255_p2 = scmp.lt.s32.totalorder %s7249_s8, %s7249_s8 }
 0x581   :  { %v3024_v59 = vsel %vm2680_vm9, %v2948_v30, 0.0  ;;  %v2949_v34 = vmul.f32 %v8018_v50, %v2913_v32 }
 0x582   :  { %v7188_v35 = vpop.f32.mrb[104].mxu1  ;;  %3025 = vadd.xlane.f32.xlu1 %v3024_v59  ;;  %3010 = vadd.xlane.f32.xlu0 %v3009_v5  ;;  %v2947_v38 = vmul.f32 %v8018_v50, %v2911_v31  ;;  %v3018_v46 = vsel %vm2680_vm9, %v2946_v33, 0.0  ;;  %p7256_p3 = por %p7255_p2, %p7254_p1 }
 0x583   :  { %v2868_v48 = vadd.f32 %v7188_v35, %v8011_v36  ;;  %v2859_v40 = vpop.f32.mrb[105].mxu1  ;;  %v3027_v58 = vsel %vm2680_vm9, %v2949_v34, 0.0 }
 0x584   :  { %v7189_v47 = vpop.f32.mrb[106].mxu1  ;;  %v3021_v49 = vsel %vm2680_vm9, %v2947_v38, 0.0  ;;  %v2860_v41 = vadd.f32 %v8011_v36, %v2859_v40  ;;  %p7257_p4 = pnand %p7256_p3, %p7250_p0 }
 0x585   :  { %v2916_v51 = vmax.f32 %v2868_v48, 0.0  ;;  %v2862_v52 = vpop.f32.mrb[107].mxu1  ;;  %v2871_v55 = vadd.f32 %v7189_v47, %v8011_v36 }
 0x586   :  { %v2863_v54 = vadd.f32 %v8011_v36, %v2862_v52  ;;  %3019 = vadd.xlane.f32.xlu1 %v3018_v46  ;;  %3022 = vadd.xlane.f32.xlu0 %v3021_v49  ;;  %v2914_v57 = vmax.f32 %v2860_v41, 0.0 }
 0x587   :  { %v2952_v39 = vmul.f32 %v8018_v50, %v2916_v51  ;;  %v2917_v1 = vmax.f32 %v2871_v55, 0.0 }
 0x588   :  { %v2915_v56 = vmax.f32 %v2863_v54, 0.0  ;;  %v2950_v44 = vmul.f32 %v8018_v50, %v2914_v57 }
 0x589   :  { %v3036_v10 = vsel %vm2680_vm9, %v2952_v39, 0.0  ;;  %v2953_v19 = vmul.f32 %v8018_v50, %v2917_v1 }
 0x58a   :  { %v7192_v60 = vpop.f32.mrb[108].mxu1  ;;  %3028 = vadd.xlane.f32.xlu1 %v3027_v58  ;;  %v2951_v62 = vmul.f32 %v8018_v50, %v2915_v56  ;;  %v3030_v18 = vsel %vm2680_vm9, %v2950_v44, 0.0 }
 0x58b   :  { %v2884_v63 = vadd.f32 %v7192_v60, %v8011_v36  ;;  %v2875_v0 = vpop.f32.mrb[109].mxu1  ;;  %v3039_v22 = vsel %vm2680_vm9, %v2953_v19, 0.0 }
 0x58c   :  { %v2876_v53 = vadd.f32 %v8011_v36, %v2875_v0  ;;  %v7193_v2 = vpop.f32.mrb[110].mxu1 }
 0x58d   :  { %v2920_v3 = vmax.f32 %v2884_v63, 0.0  ;;  %v2887_v4 = vadd.f32 %v7193_v2, %v8011_v36  ;;  %v2878_v7 = vpop.f32.mrb[111].mxu1 }
 0x58e   :  { %v2918_v61 = vmax.f32 %v2876_v53, 0.0  ;;  %v2879_v11 = vadd.f32 %v8011_v36, %v2878_v7  ;;  %3037 = vadd.xlane.f32.xlu1 %v3036_v10  ;;  %v3033_v36 = vsel %vm2680_vm9, %v2951_v62, 0.0 }
 0x58f   :  { %v2921_v43 = vmax.f32 %v2887_v4, 0.0  ;;  %v2956_v15 = vmul.f32 %v8018_v50, %v2920_v3 }
 0x590   :  { %v2919_v16 = vmax.f32 %v2879_v11, 0.0  ;;  %v2954_v17 = vmul.f32 %v8018_v50, %v2918_v61 }
 0x591   :  { %v2957_v20 = vmul.f32 %v8018_v50, %v2921_v43  ;;  %v3048_v45 = vsel %vm2680_vm9, %v2956_v15, 0.0 }
 0x592   :  { %3031 = vadd.xlane.f32.xlu1 %v3030_v18  ;;  %v2955_v21 = vmul.f32 %v8018_v50, %v2919_v16  ;;  %v3042_v42 = vsel %vm2680_vm9, %v2954_v17, 0.0 }
 0x593   :  { %v3051_v50 = vsel %vm2680_vm9, %v2957_v20, 0.0 }
 0x594   :  { %v3045_v24 = vsel %vm2680_vm9, %v2955_v21, 0.0 }
 0x596   :  { %3040 = vadd.xlane.f32.xlu1 %v3039_v22 }
 0x59a   :  { %3034 = vadd.xlane.f32.xlu1 %v3033_v36 }
 0x59c   :  { %3056 = vperm.xlu0 %7202, %v22_v23  }
 0x59e   :  { %3049 = vadd.xlane.f32.xlu1 %v3048_v45 }
 0x5a2   :  { %3043 = vadd.xlane.f32.xlu1 %v3042_v42 }
 0x5a6   :  { %3046 = vadd.xlane.f32.xlu1 %v3045_v24 }
 0x5aa   :  { %3052 = vadd.xlane.f32.xlu1 %v3051_v50 }
 0x5e7   :  { %v2966_v25 = vpop.xlane.xlu0 %2965 }
 0x5ea   :  { %v2963_v6 = vpop.xlane.xlu1 %2962 }
 0x5eb   :  { %v2960_v26 = vpop.xlane.xlu0 %2959 }
 0x5ef   :  { %v2978_v37 = vpop.xlane.xlu1 %2977  ;;  %v2969_v27 = vpop.xlane.xlu0 %2968 }
 0x5f3   :  { %v2972_v28 = vpop.xlane.xlu1 %2971  ;;  %v2981_v8 = vpop.xlane.xlu0 %2980 }
 0x5f7   :  { %v2990_v29 = vpop.xlane.xlu1 %2989  ;;  %v2975_v30 = vpop.xlane.xlu0 %2974 }
 0x5fb   :  { %v2984_v31 = vpop.xlane.xlu1 %2983  ;;  %v2993_v32 = vpop.xlane.xlu0 %2992 }
 0x5ff   :  { %v3002_v59 = vpop.xlane.xlu1 %3001  ;;  %v2987_v5 = vpop.xlane.xlu0 %2986 }
 0x603   :  { %v2996_v33 = vpop.xlane.xlu1 %2995  ;;  %v3005_v35 = vpop.xlane.xlu0 %3004 }
 0x607   :  { %v3014_v38 = vpop.xlane.xlu1 %3013  ;;  %v2999_v48 = vpop.xlane.xlu0 %2998 }
 0x60b   :  { %v3008_v40 = vpop.xlane.xlu1 %3007  ;;  %v3017_v47 = vpop.xlane.xlu0 %3016 }
 0x60f   :  { %v3026_v49 = vpop.xlane.xlu1 %3025  ;;  %v3011_v51 = vpop.xlane.xlu0 %3010 }
 0x613   :  { %v3020_v41 = vpop.xlane.xlu1 %3019  ;;  %v3023_v52 = vpop.xlane.xlu0 %3022 }
 0x617   :  { %v3029_v46 = vpop.xlane.xlu1 %3028 }
 0x61b   :  { %v3038_v34 = vpop.xlane.xlu1 %3037  ;;  %v3057_v54 = vpop.permute.xlu0 %3056 }
 0x61c   :  { %v8118_v55 = vrot.slane %v3057_v54, %v7874_v9 }
 0x61e   :  { %10312 = vst [vmem:[#allocation6_spill] sm:$0xff] %v8118_v55  ;;  %v8121_v57 = vadd.f32 %v8118_v55, %v2960_v26  ;;  %v8124_v58 = vadd.f32 %v8118_v55, %v2963_v6  ;;  %v8127_v39 = vadd.f32 %v8118_v55, %v2966_v25  ;;  %v8130_v60 = vadd.f32 %v8118_v55, %v2969_v27 }
 0x61f   :  { %v3032_v56 = vpop.xlane.xlu1 %3031  ;;  %v8133_v62 = vadd.f32 %v8118_v55, %v2972_v28  ;;  %v8136_v63 = vadd.f32 %v8118_v55, %v2975_v30  ;;  %v8139_v9 = vadd.f32 %v8118_v55, %v2978_v37  ;;  %v8142_v0 = vadd.f32 %v8118_v55, %v2981_v8 }
 0x620   :  { %v3087_v1 = vadd.f32 %v8118_v55, %v3032_v56  ;;  %v8146_v53 = vadd.f32 %v8118_v55, %v2984_v31  ;;  %v8149_v2 = vadd.f32 %v8118_v55, %v2987_v5  ;;  %v8152_v3 = vadd.f32 %v8118_v55, %v2990_v29 }
 0x621   :  { %v8155_v4 = vadd.f32 %v8118_v55, %v2993_v32  ;;  %v8158_v7 = vadd.f32 %v8118_v55, %v2996_v33  ;;  %v8161_v10 = vadd.f32 %v8118_v55, %v2999_v48  ;;  %v8165_v11 = vadd.f32 %v8118_v55, %v3002_v59 }
 0x622   :  { %v4303_v44 = vcombine.high %v3087_v1, %v3087_v1  ;;  %v4310_v61 = vrot.slane %v3087_v1, %v7863_v14  ;;  %v8168_v43 = vadd.f32 %v8118_v55, %v3005_v35  ;;  %v8171_v15 = vadd.f32 %v8118_v55, %v3008_v40 }
 0x623   :  { %v8174_v16 = vadd.f32 %v8118_v55, %v3011_v51  ;;  %v8177_v17 = vadd.f32 %v8118_v55, %v3014_v38  ;;  %v8180_v18 = vadd.f32 %v8118_v55, %v3017_v47  ;;  %v8184_v21 = vadd.f32 %v8118_v55, %v3020_v41 }
 0x624   :  { %v4317_v19 = vrot.slane %v4303_v44, %v7863_v14  ;;  %v4318_v20 = vcombine.high %v4310_v61, %v4310_v61  ;;  %v8187_v22 = vadd.f32 %v8118_v55, %v3023_v52  ;;  %v8190_v36 = vadd.f32 %v8118_v55, %v3026_v49  ;;  %v3041_v44 = vpop.xlane.xlu1 %3040 }
 0x625   :  { %v8193_v23 = vadd.f32 %v8118_v55, %v3029_v46  ;;  %v8196_v45 = vadd.f32 %v8118_v55, %v3038_v34  ;;  %v8202_v50 = vrot.slane %v8121_v57, %v7863_v14  ;;  %v8209_v26 = vrot.slane %v8124_v58, %v7863_v14 }
 0x626   :  { %v4319_v42 = vcombine.high %v4317_v19, %v4317_v19  ;;  %v4340_v25 = vrot.slane %v4318_v20, %v7863_v14  ;;  %v8215_v27 = vrot.slane %v8127_v39, %v7863_v14  ;;  %v8221_v8 = vrot.slane %v8130_v60, %v7863_v14 }
 0x627   :  { %v4326_v30 = vrot.slane %v4310_v61, %v7863_v14  ;;  %v8228_v31 = vrot.slane %v8133_v62, %v7863_v14  ;;  %v8234_v59 = vrot.slane %v8136_v63, %v7863_v14  ;;  %v8243_v35 = vrot.slane %v8139_v9, %v7863_v14 }
 0x628   :  { %10313 = vst [vmem:[#allocation7_spill] sm:$0xff] %v8221_v8  ;;  %v8237_v5 = vrot.slane %v4319_v42, %v7863_v14  ;;  %v8249_v47 = vrot.slane %v8142_v0, %v7863_v14  ;;  %v8254_v51 = vrot.slane %v4317_v19, %v7863_v14  ;;  %v8258_v41 = vrot.slane %v8146_v53, %v7863_v14 }
 0x629   :  { %v5871_v48 = vcombine.low %v4326_v30, %v4340_v25  ;;  %v6797_v40 = vcombine.high %v4326_v30, %v4340_v25  ;;  %v8264_v46 = vrot.slane %v8149_v2, %v7863_v14  ;;  %v8270_v54 = vrot.slane %v8152_v3, %v7863_v14 }
 0x62a   :  { %10314 = vst [vmem:[#allocation8_spill] sm:$0xff] %v8237_v5  ;;  %10315 = vst [vmem:[#allocation9_spill] sm:$0xff] %v8254_v51  ;;  %v8276_v1 = vrot.slane %v8155_v4, %v7863_v14  ;;  %v8284_v20 = vrot.slane %v8158_v7, %v7863_v14  ;;  %v8298_v61 = vrot.slane %v8161_v10, %v7863_v14 }
 0x62b   :  { %v8291_v30 = vrot.slane %v5871_v48, %v7863_v14  ;;  %v8294_v12 = vrot.slane %v6797_v40, %v7863_v14  ;;  %v8304_v56 = vrot.slane %v8165_v11, %v7863_v14  ;;  %v3090_v48 = vadd.f32 %v8118_v55, %v3041_v44 }
 0x62c   :  { %v8311_v40 = vrot.slane %v8168_v43, %v7863_v14  ;;  %v8317_v34 = vrot.slane %v8171_v15, %v7863_v14  ;;  %v8323_v52 = vrot.slane %v8174_v16, %v7863_v14  ;;  %v8330_v42 = vrot.slane %v8177_v17, %v7863_v14 }
 0x62d   :  { %10316 = vst [vmem:[#allocation10_spill] sm:$0xff] %v8291_v30  ;;  %10317 = vst [vmem:[#allocation11_spill] sm:$0xff] %v8294_v12  ;;  %v4450_v25 = vcombine.high %v3090_v48, %v3090_v48  ;;  %v4457_v49 = vrot.slane %v3090_v48, %v7863_v14  ;;  %v8336_v19 = vrot.slane %v8180_v18, %v7863_v14 }
 0x62e   :  { %v8342_v44 = vrot.slane %v8184_v21, %v7863_v14  ;;  %v8349_v38 = vrot.slane %v8187_v22, %v7863_v14  ;;  %v8355_v33 = vrot.slane %v8190_v36, %v7863_v14  ;;  %v8361_v48 = vrot.slane %v8193_v23, %v7863_v14 }
 0x62f   :  { %v4464_v32 = vrot.slane %v4450_v25, %v7863_v14  ;;  %v4465_v29 = vcombine.high %v4457_v49, %v4457_v49  ;;  %v8367_v6 = vrot.slane %v8196_v45, %v7863_v14  ;;  %v10318_v13 = vcombine.high %v8121_v57, %v8121_v57 }
 0x630   :  { %v8380_v12 = vrot.slane %v8202_v50, %v7863_v14  ;;  %v10320_v25 = vcombine.high %v8124_v58, %v8124_v58  ;;  %v10322_v57 = vcombine.high %v8127_v39, %v8127_v39  ;;  %v4473_v51 = vrot.slane %v4457_v49, %v7863_v14 }
 0x631   :  { %v4466_v24 = vcombine.high %v4464_v32, %v4464_v32  ;;  %v4487_v28 = vrot.slane %v4465_v29, %v7863_v14  ;;  %v8374_v30 = vrot.slane %v10318_v13, %v7863_v14  ;;  %v8392_v13 = vrot.slane %v8209_v26, %v7863_v14 }
 0x632   :  { %10319 = vst [vmem:[#allocation12_spill] sm:$0xff] %v8380_v12  ;;  %v8386_v5 = vrot.slane %v10320_v25, %v7863_v14  ;;  %v8398_v37 = vrot.slane %v10322_v57, %v7863_v14  ;;  %v8405_v25 = vrot.slane %v8215_v27, %v7863_v14  ;;  %v10324_v29 = vcombine.high %v8130_v60, %v8130_v60 }
 0x633   :  { %10321 = vst [vmem:[#allocation13_spill] sm:$0xff] %v8392_v13  ;;  %v8414_v12 = vrot.slane %v4466_v24, %v7863_v14  ;;  %v8420_v49 = vrot.slane %v8221_v8, %v7863_v14  ;;  %v10327_v57 = vcombine.high %v8133_v62, %v8133_v62  ;;  %v6803_v60 = vcombine.high %v4473_v51, %v4487_v28 }
 0x634   :  { %10323 = vst [vmem:[#allocation14_spill] sm:$0xff] %v8405_v25  ;;  %v8411_v13 = vrot.slane %v10324_v29, %v7863_v14  ;;  %v6018_v25 = vcombine.low %v4473_v51, %v4487_v28  ;;  %v8432_v24 = vrot.slane %v8228_v31, %v7863_v14  ;;  %v8435_v39 = vrot.slane %v4464_v32, %v7863_v14 }
 0x635   :  { %10325 = vst [vmem:[#allocation15_spill] sm:$0xff] %v8414_v12  ;;  %10326 = vst [vmem:[#allocation16_spill] sm:$0xff] %v8420_v49  ;;  %v8426_v58 = vrot.slane %v10327_v57, %v7863_v14  ;;  %v10330_v49 = vcombine.high %v8136_v63, %v8136_v63  ;;  %v8447_v28 = vrot.slane %v8234_v59, %v7863_v14 }
 0x636   :  { %10328 = vst [vmem:[#allocation17_spill] sm:$0xff] %v8432_v24  ;;  %10329 = vst [vmem:[#allocation18_spill] sm:$0xff] %v8435_v39  ;;  %v10332_v51 = vcombine.high %v8139_v9, %v8139_v9  ;;  %v8459_v63 = vrot.slane %v8243_v35, %v7863_v14  ;;  %v10336_v32 = vcombine.high %v8146_v53, %v8146_v53 }
 0x637   :  { %v8441_v8 = vrot.slane %v10330_v49, %v7863_v14  ;;  %10331 = vst [vmem:[#allocation19_spill] sm:$0xff] %v8447_v28  ;;  %v10334_v49 = vcombine.high %v8142_v0, %v8142_v0  ;;  %v8487_v29 = vrot.slane %v6803_v60, %v7863_v14  ;;  %v10340_v53 = vcombine.high %v8149_v2, %v8149_v2 }
 0x638   :  { %v8453_v57 = vrot.slane %v10332_v51, %v7863_v14  ;;  %10333 = vst [vmem:[#allocation20_spill] sm:$0xff] %v8459_v63  ;;  %v8473_v51 = vrot.slane %v8249_v47, %v7863_v14  ;;  %v8479_v63 = vrot.slane %v10336_v32, %v7863_v14  ;;  %v8505_v60 = vrot.slane %v8264_v46, %v7863_v14 }
 0x639   :  { %v8465_v62 = vrot.slane %v10334_v49, %v7863_v14  ;;  %v8484_v49 = vrot.slane %v6018_v25, %v7863_v14  ;;  %10338 = vst [vmem:[#allocation23_spill] sm:$0xff] %v8487_v29  ;;  %v8499_v32 = vrot.slane %v10340_v53, %v7863_v14  ;;  %v10342_v0 = vcombine.high %v8152_v3, %v8152_v3 }
 0x63a   :  { %10335 = vst [vmem:[#allocation21_spill] sm:$0xff] %v8473_v51  ;;  %v8493_v51 = vrot.slane %v8258_v41, %v7863_v14  ;;  %10341 = vst [vmem:[#allocation25_spill] sm:$0xff] %v8505_v60  ;;  %v8517_v2 = vrot.slane %v8270_v54, %v7863_v14  ;;  %v10344_v53 = vcombine.high %v8155_v4, %v8155_v4 }
 0x63b   :  { %10337 = vst [vmem:[#allocation22_spill] sm:$0xff] %v8484_v49  ;;  %v8511_v9 = vrot.slane %v10342_v0, %v7863_v14  ;;  %v8529_v3 = vrot.slane %v8276_v1, %v7863_v14  ;;  %v10346_v0 = vcombine.high %v8158_v7, %v8158_v7  ;;  %v8541_v4 = vrot.slane %v8284_v20, %v7863_v14 }
 0x63c   :  { %10339 = vst [vmem:[#allocation24_spill] sm:$0xff] %v8493_v51  ;;  %10343 = vst [vmem:[#allocation26_spill] sm:$0xff] %v8517_v2  ;;  %v8523_v25 = vrot.slane %v10344_v53, %v7863_v14  ;;  %v10348_v53 = vcombine.high %v8161_v10, %v8161_v10  ;;  %v8553_v7 = vrot.slane %v8298_v61, %v7863_v14 }
 0x63d   :  { %10345 = vst [vmem:[#allocation27_spill] sm:$0xff] %v8529_v3  ;;  %v8535_v49 = vrot.slane %v10346_v0, %v7863_v14  ;;  %10347 = vst [vmem:[#allocation28_spill] sm:$0xff] %v8541_v4  ;;  %v10350_v0 = vcombine.high %v8165_v11, %v8165_v11  ;;  %v8565_v10 = vrot.slane %v8304_v56, %v7863_v14 }
 0x63e   :  { %v8547_v29 = vrot.slane %v10348_v53, %v7863_v14  ;;  %10349 = vst [vmem:[#allocation29_spill] sm:$0xff] %v8553_v7  ;;  %v10352_v53 = vcombine.high %v8168_v43, %v8168_v43  ;;  %v3035_v7 = vpop.xlane.xlu1 %3034  ;;  %v8577_v11 = vrot.slane %v8311_v40, %v7863_v14  ;;  %v8589_v43 = vrot.slane %v8317_v34, %v7863_v14 }
 0x63f   :  { %v8559_v12 = vrot.slane %v10350_v0, %v7863_v14  ;;  %10351 = vst [vmem:[#allocation30_spill] sm:$0xff] %v8565_v10  ;;  %v10354_v0 = vcombine.high %v8171_v15, %v8171_v15  ;;  %v8601_v15 = vrot.slane %v8323_v52, %v7863_v14 }
 0x640   :  { %v8571_v39 = vrot.slane %v10352_v53, %v7863_v14  ;;  %10353 = vst [vmem:[#allocation31_spill] sm:$0xff] %v8577_v11  ;;  %10355 = vst [vmem:[#allocation32_spill] sm:$0xff] %v8589_v43  ;;  %v10356_v53 = vcombine.high %v8174_v16, %v8174_v16  ;;  %v8613_v16 = vrot.slane %v8330_v42, %v7863_v14 }
 0x641   :  { %v8583_v4 = vrot.slane %v10354_v0, %v7863_v14  ;;  %10357 = vst [vmem:[#allocation33_spill] sm:$0xff] %v8601_v15  ;;  %v10358_v0 = vcombine.high %v8177_v17, %v8177_v17  ;;  %v10360_v11 = vcombine.high %v8180_v18, %v8180_v18  ;;  %v10362_v43 = vcombine.high %v8184_v21, %v8184_v21 }
 0x642   :  { %v8595_v3 = vrot.slane %v10356_v53, %v7863_v14  ;;  %10359 = vst [vmem:[#allocation34_spill] sm:$0xff] %v8613_v16  ;;  %v3088_v53 = vadd.f32 %v8118_v55, %v3035_v7  ;;  %v8638_v18 = vrot.slane %v8342_v44, %v7863_v14  ;;  %v10366_v7 = vcombine.high %v8190_v36, %v8190_v36 }
 0x643   :  { %v8607_v10 = vrot.slane %v10358_v0, %v7863_v14  ;;  %v8620_v15 = vrot.slane %v10360_v11, %v7863_v14  ;;  %v8626_v0 = vrot.slane %v8336_v19, %v7863_v14  ;;  %v8632_v16 = vrot.slane %v10362_v43, %v7863_v14 }
 0x644   :  { %10363 = vst [vmem:[#allocation36_spill] sm:$0xff] %v8638_v18  ;;  %v4352_v11 = vcombine.high %v3088_v53, %v3088_v53  ;;  %v4359_v17 = vrot.slane %v3088_v53, %v7863_v14  ;;  %v8651_v43 = vrot.slane %v8349_v38, %v7863_v14  ;;  %v8657_v18 = vrot.slane %v10366_v7, %v7863_v14 }
 0x645   :  { %10361 = vst [vmem:[#allocation35_spill] sm:$0xff] %v8626_v0  ;;  %v10364_v0 = vcombine.high %v8187_v22, %v8187_v22  ;;  %v8663_v22 = vrot.slane %v8355_v33, %v7863_v14  ;;  %v8676_v7 = vrot.slane %v8361_v48, %v7863_v14  ;;  %v10370_v53 = vcombine.high %v8196_v45, %v8196_v45 }
 0x646   :  { %10365 = vst [vmem:[#allocation37_spill] sm:$0xff] %v8651_v43  ;;  %v4367_v21 = vcombine.high %v4359_v17, %v4359_v17  ;;  %v10368_v43 = vcombine.high %v8193_v23, %v8193_v23  ;;  %v8688_v23 = vrot.slane %v8367_v6, %v7863_v14  ;;  %v10373_v45 = vcombine.high %v8202_v50, %v8202_v50 }
 0x647   :  { %v8645_v2 = vrot.slane %v10364_v0, %v7863_v14  ;;  %10367 = vst [vmem:[#allocation38_spill] sm:$0xff] %v8663_v22  ;;  %v4366_v0 = vrot.slane %v4352_v11, %v7863_v14  ;;  %10369 = vst [vmem:[#allocation39_spill] sm:$0xff] %v8676_v7  ;;  %v8682_v22 = vrot.slane %v10370_v53, %v7863_v14 }
 0x648   :  { %v8670_v60 = vrot.slane %v10368_v43, %v7863_v14  ;;  %10371 = vst [vmem:[#allocation40_spill] sm:$0xff] %v8688_v23  ;;  %v4389_v51 = vrot.slane %v4367_v21, %v7863_v14  ;;  %v8695_v7 = vrot.slane %v8374_v30, %v7863_v14  ;;  %v8701_v53 = vrot.slane %v10373_v45, %v7863_v14 }
 0x649   :  { %v4368_v43 = vcombine.high %v4366_v0, %v4366_v0  ;;  %v8707_v23 = vrot.slane %v8386_v5, %v7863_v14  ;;  %v10375_v21 = vcombine.high %v8209_v26, %v8209_v26  ;;  %v8719_v50 = vrot.slane %v8398_v37, %v7863_v14 }
 0x64a   :  { %10372 = vst [vmem:[#allocation41_spill] sm:$0xff] %v8695_v7  ;;  %v4375_v45 = vrot.slane %v4359_v17, %v7863_v14  ;;  %v10377_v11 = vcombine.high %v8215_v27, %v8215_v27  ;;  %v8762_v27 = vrot.slane %v8441_v8, %v7863_v14 }
 0x64b   :  { %10374 = vst [vmem:[#allocation42_spill] sm:$0xff] %v8707_v23  ;;  %v8713_v36 = vrot.slane %v10375_v21, %v7863_v14  ;;  %10376 = vst [vmem:[#allocation43_spill] sm:$0xff] %v8719_v50  ;;  %v8732_v21 = vrot.slane %v8411_v13, %v7863_v14  ;;  %v8735_v7 = vrot.slane %v4368_v43, %v7863_v14  ;;  %v10380_v50 = vld [vmem:[#allocation7_spill] sm:$0xff] }
 0x64c   :  { %v8726_v23 = vrot.slane %v10377_v11, %v7863_v14  ;;  %v10381_v17 = vcombine.high %v10380_v50, %v10380_v50  ;;  %v8747_v11 = vrot.slane %v8426_v58, %v7863_v14  ;;  %v5920_v26 = vcombine.low %v4375_v45, %v4389_v51  ;;  %10385 = vst [vmem:[#allocation47_spill] sm:$0xff] %v8762_v27 }
 0x64d   :  { %10378 = vst [vmem:[#allocation44_spill] sm:$0xff] %v8732_v21  ;;  %10379 = vst [vmem:[#allocation45_spill] sm:$0xff] %v8735_v7  ;;  %v6799_v24 = vcombine.high %v4375_v45, %v4389_v51  ;;  %v10383_v43 = vcombine.high %v8228_v31, %v8228_v31  ;;  %v10386_v51 = vcombine.high %v8234_v59, %v8234_v59 }
 0x64e   :  { %v8741_v28 = vrot.slane %v10381_v17, %v7863_v14  ;;  %10382 = vst [vmem:[#allocation7_spill] sm:$0xff] %v8747_v11  ;;  %v8758_v17 = vrot.slane %v4366_v0, %v7863_v14  ;;  %v10388_v0 = vcombine.high %v8243_v35, %v8243_v35  ;;  %v8786_v59 = vrot.slane %v8465_v62, %v7863_v14 }
 0x64f   :  { %v8753_v21 = vrot.slane %v10383_v43, %v7863_v14  ;;  %v8768_v45 = vrot.slane %v10386_v51, %v7863_v14  ;;  %v8774_v43 = vrot.slane %v8453_v57, %v7863_v14  ;;  %v10390_v31 = vcombine.high %v8249_v47, %v8249_v47 }
 0x650   :  { %10384 = vst [vmem:[#allocation46_spill] sm:$0xff] %v8758_v17  ;;  %v8780_v50 = vrot.slane %v10388_v0, %v7863_v14  ;;  %10389 = vst [vmem:[#allocation49_spill] sm:$0xff] %v8786_v59  ;;  %v8800_v0 = vrot.slane %v8479_v63, %v7863_v14  ;;  %v8805_v59 = vrot.slane %v5920_v26, %v7863_v14 }
 0x651   :  { %10387 = vst [vmem:[#allocation48_spill] sm:$0xff] %v8774_v43  ;;  %v8794_v43 = vrot.slane %v10390_v31, %v7863_v14  ;;  %v8808_v51 = vrot.slane %v6799_v24, %v7863_v14  ;;  %v10394_v47 = vcombine.high %v8258_v41, %v8258_v41  ;;  %v10396_v26 = vcombine.high %v8264_v46, %v8264_v46 }
 0x652   :  { %10391 = vst [vmem:[#allocation50_spill] sm:$0xff] %v8800_v0  ;;  %10392 = vst [vmem:[#allocation51_spill] sm:$0xff] %v8805_v59  ;;  %v8820_v0 = vrot.slane %v8499_v32, %v7863_v14  ;;  %v8832_v41 = vrot.slane %v8511_v9, %v7863_v14  ;;  %v3682_v59 = vcombine.high %v8523_v25, %v8523_v25 }
 0x653   :  { %10393 = vst [vmem:[#allocation52_spill] sm:$0xff] %v8808_v51  ;;  %v8814_v31 = vrot.slane %v10394_v47, %v7863_v14  ;;  %v8826_v27 = vrot.slane %v10396_v26, %v7863_v14  ;;  %v10398_v47 = vcombine.high %v8270_v54, %v8270_v54  ;;  %v8844_v46 = vrot.slane %v8523_v25, %v7863_v14 }
 0x654   :  { %10395 = vst [vmem:[#allocation53_spill] sm:$0xff] %v8820_v0  ;;  %10397 = vst [vmem:[#allocation54_spill] sm:$0xff] %v8832_v41  ;;  %v10400_v26 = vcombine.high %v8276_v1, %v8276_v1  ;;  %v3731_v51 = vcombine.high %v8535_v49, %v8535_v49  ;;  %v8856_v54 = vrot.slane %v8535_v49, %v7863_v14 }
 0x655   :  { %v8838_v35 = vrot.slane %v10398_v47, %v7863_v14  ;;  %10399 = vst [vmem:[#allocation55_spill] sm:$0xff] %v8844_v46  ;;  %v10402_v47 = vcombine.high %v8284_v20, %v8284_v20  ;;  %v3780_v25 = vcombine.high %v8547_v29, %v8547_v29  ;;  %v8868_v1 = vrot.slane %v8547_v29, %v7863_v14 }
 0x656   :  { %v8850_v24 = vrot.slane %v10400_v26, %v7863_v14  ;;  %10401 = vst [vmem:[#allocation56_spill] sm:$0xff] %v8856_v54  ;;  %v10405_v26 = vcombine.high %v8298_v61, %v8298_v61  ;;  %v3829_v49 = vcombine.high %v8559_v12, %v8559_v12  ;;  %v8880_v20 = vrot.slane %v8559_v12, %v7863_v14 }
 0x657   :  { %v8862_v7 = vrot.slane %v10402_v47, %v7863_v14  ;;  %10404 = vst [vmem:[#allocation58_spill] sm:$0xff] %v8868_v1  ;;  %v10408_v47 = vcombine.high %v8304_v56, %v8304_v56  ;;  %v3878_v29 = vcombine.high %v8571_v39, %v8571_v39  ;;  %v8892_v61 = vrot.slane %v8571_v39, %v7863_v14 }
 0x658   :  { %v8874_v17 = vrot.slane %v10405_v26, %v7863_v14  ;;  %10407 = vst [vmem:[#allocation60_spill] sm:$0xff] %v8880_v20  ;;  %v3050_v26 = vpop.xlane.xlu1 %3049  ;;  %v10411_v1 = vcombine.high %v8311_v40, %v8311_v40  ;;  %v3927_v20 = vcombine.high %v8583_v4, %v8583_v4  ;;  %v8904_v56 = vrot.slane %v8583_v4, %v7863_v14 }
 0x659   :  { %10403 = vst [vmem:[#allocation57_spill] sm:$0xff] %v8862_v7  ;;  %v8886_v54 = vrot.slane %v10408_v47, %v7863_v14  ;;  %10410 = vst [vmem:[#allocation62_spill] sm:$0xff] %v8892_v61  ;;  %v10414_v47 = vcombine.high %v8317_v34, %v8317_v34  ;;  %v3976_v61 = vcombine.high %v8595_v3, %v8595_v3  ;;  %v10494_v7 = vld [vmem:[#allocation38_spill] sm:$0xff] }
 0x65a   :  { %10406 = vst [vmem:[#allocation59_spill] sm:$0xff] %v8874_v17  ;;  %v8898_v12 = vrot.slane %v10411_v1, %v7863_v14  ;;  %10413 = vst [vmem:[#allocation64_spill] sm:$0xff] %v8904_v56  ;;  %v8916_v40 = vrot.slane %v8595_v3, %v7863_v14  ;;  %v10417_v1 = vcombine.high %v8323_v52, %v8323_v52  ;;  %v10489_v17 = vld [vmem:[#allocation33_spill] sm:$0xff] }
 0x65b   :  { %10409 = vst [vmem:[#allocation61_spill] sm:$0xff] %v8886_v54  ;;  %v8910_v39 = vrot.slane %v10414_v47, %v7863_v14  ;;  %v4025_v4 = vcombine.high %v8607_v10, %v8607_v10  ;;  %v8928_v34 = vrot.slane %v8607_v10, %v7863_v14  ;;  %v10420_v47 = vcombine.high %v8330_v42, %v8330_v42  ;;  %v10490_v54 = vld [vmem:[#allocation34_spill] sm:$0xff] }
 0x65c   :  { %10412 = vst [vmem:[#allocation63_spill] sm:$0xff] %v8898_v12  ;;  %10416 = vst [vmem:[#allocation66_spill] sm:$0xff] %v8916_v40  ;;  %v8922_v46 = vrot.slane %v10417_v1, %v7863_v14  ;;  %v4074_v3 = vcombine.high %v8620_v15, %v8620_v15  ;;  %v3093_v52 = vadd.f32 %v8118_v55, %v3050_v26 }
 0x65d   :  { %10415 = vst [vmem:[#allocation65_spill] sm:$0xff] %v8910_v39  ;;  %10419 = vst [vmem:[#allocation68_spill] sm:$0xff] %v8928_v34  ;;  %v8934_v56 = vrot.slane %v10420_v47, %v7863_v14  ;;  %v8941_v1 = vrot.slane %v8620_v15, %v7863_v14  ;;  %v10423_v10 = vcombine.high %v8336_v19, %v8336_v19 }
 0x65e   :  { %10418 = vst [vmem:[#allocation67_spill] sm:$0xff] %v8922_v46  ;;  %v4123_v42 = vcombine.high %v8632_v16, %v8632_v16  ;;  %v8953_v47 = vrot.slane %v8632_v16, %v7863_v14  ;;  %v10426_v26 = vcombine.high %v8342_v44, %v8342_v44  ;;  %v4172_v15 = vcombine.high %v8645_v2, %v8645_v2 }
 0x65f   :  { %10421 = vst [vmem:[#allocation69_spill] sm:$0xff] %v8934_v56  ;;  %10422 = vst [vmem:[#allocation70_spill] sm:$0xff] %v8941_v1  ;;  %v8947_v34 = vrot.slane %v10423_v10, %v7863_v14  ;;  %v4597_v1 = vcombine.high %v3093_v52, %v3093_v52  ;;  %v4604_v19 = vrot.slane %v3093_v52, %v7863_v14  ;;  %v10497_v56 = vld [vmem:[#allocation41_spill] sm:$0xff] }
 0x660   :  { %10425 = vst [vmem:[#allocation72_spill] sm:$0xff] %v8953_v47  ;;  %v8959_v40 = vrot.slane %v10426_v26, %v7863_v14  ;;  %v8966_v10 = vrot.slane %v8645_v2, %v7863_v14  ;;  %v10429_v16 = vcombine.high %v8349_v38, %v8349_v38  ;;  %v4221_v44 = vcombine.high %v8657_v18, %v8657_v18 }
 0x661   :  { %10424 = vst [vmem:[#allocation71_spill] sm:$0xff] %v8947_v34  ;;  %v8978_v26 = vrot.slane %v8657_v18, %v7863_v14  ;;  %v10432_v52 = vcombine.high %v8355_v33, %v8355_v33  ;;  %v4270_v2 = vcombine.high %v8670_v60, %v8670_v60  ;;  %v4611_v38 = vrot.slane %v4597_v1, %v7863_v14 }
 0x662   :  { %10427 = vst [vmem:[#allocation73_spill] sm:$0xff] %v8959_v40  ;;  %10428 = vst [vmem:[#allocation74_spill] sm:$0xff] %v8966_v10  ;;  %v8972_v47 = vrot.slane %v10429_v16, %v7863_v14  ;;  %v4612_v16 = vcombine.high %v4604_v19, %v4604_v19  ;;  %v8991_v10 = vrot.slane %v8670_v60, %v7863_v14 }
 0x663   :  { %10431 = vst [vmem:[#allocation76_spill] sm:$0xff] %v8978_v26  ;;  %v8984_v41 = vrot.slane %v10432_v52, %v7863_v14  ;;  %v10434_v18 = vcombine.high %v8361_v48, %v8361_v48  ;;  %v4417_v33 = vcombine.high %v8682_v22, %v8682_v22  ;;  %v9003_v52 = vrot.slane %v8682_v22, %v7863_v14 }
 0x664   :  { %10430 = vst [vmem:[#allocation75_spill] sm:$0xff] %v8972_v47  ;;  %10433 = vst [vmem:[#allocation77_spill] sm:$0xff] %v8991_v10  ;;  %v10437_v1 = vcombine.high %v8367_v6, %v8367_v6  ;;  %v4613_v60 = vcombine.high %v4611_v38, %v4611_v38  ;;  %v10439_v48 = vcombine.high %v8374_v30, %v8374_v30 }
 0x665   :  { %v8997_v26 = vrot.slane %v10434_v18, %v7863_v14  ;;  %10436 = vst [vmem:[#allocation79_spill] sm:$0xff] %v9003_v52  ;;  %v10440_v10 = vcombine.high %v8386_v5, %v8386_v5  ;;  %v4634_v22 = vrot.slane %v4612_v16, %v7863_v14  ;;  %v10441_v6 = vcombine.high %v8398_v37, %v8398_v37 }
 0x666   :  { %v9009_v0 = vrot.slane %v10437_v1, %v7863_v14  ;;  %v9015_v18 = vrot.slane %v10439_v48, %v7863_v14  ;;  %v10442_v30 = vcombine.high %v8411_v13, %v8411_v13  ;;  %v10444_v5 = vcombine.high %v8426_v58, %v8426_v58 }
 0x667   :  { %10435 = vst [vmem:[#allocation78_spill] sm:$0xff] %v8997_v26  ;;  %v9021_v11 = vrot.slane %v10440_v10, %v7863_v14  ;;  %v9028_v1 = vrot.slane %v10441_v6, %v7863_v14  ;;  %v10445_v16 = vcombine.high %v8441_v8, %v8441_v8  ;;  %v10446_v37 = vcombine.high %v8453_v57, %v8453_v57 }
 0x668   :  { %10438 = vst [vmem:[#allocation80_spill] sm:$0xff] %v9009_v0  ;;  %v9034_v48 = vrot.slane %v10442_v30, %v7863_v14  ;;  %v9040_v10 = vrot.slane %v10444_v5, %v7863_v14  ;;  %v10447_v13 = vcombine.high %v8465_v62, %v8465_v62  ;;  %v10448_v58 = vcombine.high %v8479_v63, %v8479_v63 }
 0x669   :  { %v9046_v52 = vrot.slane %v10445_v16, %v7863_v14  ;;  %v9052_v6 = vrot.slane %v10446_v37, %v7863_v14  ;;  %v4620_v8 = vrot.slane %v4604_v19, %v7863_v14  ;;  %v10450_v57 = vcombine.high %v8499_v32, %v8499_v32 }
 0x66a   :  { %10443 = vst [vmem:[#allocation81_spill] sm:$0xff] %v9034_v48  ;;  %v9058_v30 = vrot.slane %v10447_v13, %v7863_v14  ;;  %v9064_v5 = vrot.slane %v10448_v58, %v7863_v14  ;;  %v10452_v62 = vcombine.high %v8511_v9, %v8511_v9  ;;  %v9080_v13 = vrot.slane %v3682_v59, %v7863_v14 }
 0x66b   :  { %v9071_v16 = vrot.slane %v10450_v57, %v7863_v14  ;;  %v9083_v63 = vrot.slane %v4613_v60, %v7863_v14  ;;  %v9086_v19 = vrot.slane %v3731_v51, %v7863_v14  ;;  %v9089_v58 = vrot.slane %v3780_v25, %v7863_v14 }
 0x66c   :  { %10449 = vst [vmem:[#allocation82_spill] sm:$0xff] %v9064_v5  ;;  %v9077_v37 = vrot.slane %v10452_v62, %v7863_v14  ;;  %10454 = vst [vmem:[#allocation85_spill] sm:$0xff] %v9080_v13  ;;  %v9092_v32 = vrot.slane %v3829_v49, %v7863_v14  ;;  %v6165_v57 = vcombine.low %v4620_v8, %v4634_v22  ;;  %v10473_v62 = vld [vmem:[#allocation13_spill] sm:$0xff]  ;;  %v10590_v13 = vld [vmem:[#allocation35_spill] sm:$0xff] }
 0x66d   :  { %10451 = vst [vmem:[#allocation83_spill] sm:$0xff] %v9071_v16  ;;  %10455 = vst [vmem:[#allocation86_spill] sm:$0xff] %v9083_v63  ;;  %v6809_v16 = vcombine.high %v4620_v8, %v4634_v22  ;;  %v9095_v9 = vrot.slane %v3878_v29, %v7863_v14  ;;  %v9098_v59 = vrot.slane %v3927_v20, %v7863_v14  ;;  %v10482_v63 = vld [vmem:[#allocation26_spill] sm:$0xff] }
 0x66e   :  { %10453 = vst [vmem:[#allocation84_spill] sm:$0xff] %v9077_v37  ;;  %10456 = vst [vmem:[#allocation87_spill] sm:$0xff] %v9086_v19  ;;  %v9101_v60 = vrot.slane %v4611_v38, %v7863_v14  ;;  %v9104_v51 = vrot.slane %v3976_v61, %v7863_v14  ;;  %v9107_v25 = vrot.slane %v4025_v4, %v7863_v14 }
 0x66f   :  { %10457 = vst [vmem:[#allocation88_spill] sm:$0xff] %v9089_v58  ;;  %10458 = vst [vmem:[#allocation89_spill] sm:$0xff] %v9092_v32  ;;  %v9110_v49 = vrot.slane %v4074_v3, %v7863_v14  ;;  %v9113_v22 = vrot.slane %v4123_v42, %v7863_v14  ;;  %v9116_v29 = vrot.slane %v4172_v15, %v7863_v14  ;;  %v10470_v3 = vld [vmem:[#allocation12_spill] sm:$0xff] }
 0x670   :  { %10459 = vst [vmem:[#allocation90_spill] sm:$0xff] %v9095_v9  ;;  %10460 = vst [vmem:[#allocation91_spill] sm:$0xff] %v9098_v59  ;;  %v9119_v20 = vrot.slane %v4221_v44, %v7863_v14  ;;  %v9122_v38 = vrot.slane %v4270_v2, %v7863_v14  ;;  %v9127_v4 = vrot.slane %v4417_v33, %v7863_v14  ;;  %v10475_v15 = vld [vmem:[#allocation16_spill] sm:$0xff]  ;;  %v10499_v59 = vld [vmem:[#allocation42_spill] sm:$0xff] }
 0x671   :  { %10461 = vst [vmem:[#allocation92_spill] sm:$0xff] %v9101_v60  ;;  %10462 = vst [vmem:[#allocation93_spill] sm:$0xff] %v9104_v51  ;;  %v4695_v8 = vcombine.low %v10470_v3, %v8701_v53  ;;  %v9136_v44 = vrot.slane %v6165_v57, %v7863_v14  ;;  %v9139_v2 = vrot.slane %v6809_v16, %v7863_v14  ;;  %v10476_v16 = vld [vmem:[#allocation17_spill] sm:$0xff]  ;;  %v10478_v42 = vld [vmem:[#allocation20_spill] sm:$0xff]  ;;  %v3044_v51 = vpop.xlane.xlu1 %3043 }
 0x672   :  { %10463 = vst [vmem:[#allocation94_spill] sm:$0xff] %v9107_v25  ;;  %10464 = vst [vmem:[#allocation95_spill] sm:$0xff] %v9110_v49  ;;  %v4744_v61 = vcombine.low %v10473_v62, %v8713_v36  ;;  %v6751_v33 = vcombine.high %v10473_v62, %v8713_v36  ;;  %v10477_v36 = vld [vmem:[#allocation19_spill] sm:$0xff]  ;;  %v10479_v57 = vld [vmem:[#allocation21_spill] sm:$0xff]  ;;  %v3091_v49 = vadd.f32 %v8118_v55, %v3044_v51 }
 0x673   :  { %10465 = vst [vmem:[#allocation96_spill] sm:$0xff] %v9113_v22  ;;  %10466 = vst [vmem:[#allocation97_spill] sm:$0xff] %v9116_v29  ;;  %v10484_v62 = vld [vmem:[#allocation28_spill] sm:$0xff]  ;;  %v10485_v60 = vld [vmem:[#allocation29_spill] sm:$0xff]  ;;  %v9245_v9 = vrot.slane %v4695_v8, %v7863_v14  ;;  %v10498_v25 = vcombine.high %v10470_v3, %v8701_v53 }
 0x674   :  { %10467 = vst [vmem:[#allocation98_spill] sm:$0xff] %v9119_v20  ;;  %10468 = vst [vmem:[#allocation99_spill] sm:$0xff] %v9122_v38  ;;  %v10481_v38 = vld [vmem:[#allocation25_spill] sm:$0xff]  ;;  %v10486_v20 = vld [vmem:[#allocation30_spill] sm:$0xff]  ;;  %v4499_v39 = vcombine.high %v3091_v49, %v3091_v49  ;;  %v4506_v51 = vrot.slane %v3091_v49, %v7863_v14  ;;  %v9259_v46 = vrot.slane %v4744_v61, %v7863_v14 }
 0x675   :  { %10469 = vst [vmem:[#allocation100_spill] sm:$0xff] %v9127_v4  ;;  %10471 = vst [vmem:[#allocation12_spill] sm:$0xff] %v9136_v44  ;;  %v10474_v4 = vld [vmem:[#allocation14_spill] sm:$0xff]  ;;  %v10483_v44 = vld [vmem:[#allocation27_spill] sm:$0xff]  ;;  %v9252_v40 = vrot.slane %v10498_v25, %v7863_v14  ;;  %v9262_v8 = vrot.slane %v6751_v33, %v7863_v14 }
 0x676   :  { %10472 = vst [vmem:[#allocation101_spill] sm:$0xff] %v9139_v2  ;;  %v10480_v2 = vld [vmem:[#allocation24_spill] sm:$0xff]  ;;  %v10487_v29 = vld [vmem:[#allocation31_spill] sm:$0xff]  ;;  %v4513_v49 = vrot.slane %v4499_v39, %v7863_v14  ;;  %v4514_v34 = vcombine.high %v4506_v51, %v4506_v51  ;;  %v4522_v25 = vrot.slane %v4506_v51, %v7863_v14  ;;  %v10501_v3 = vcombine.low %v10474_v4, %v8726_v23 }
 0x677   :  { %v10488_v22 = vld [vmem:[#allocation32_spill] sm:$0xff]  ;;  %v10502_v61 = vcombine.high %v10474_v4, %v8726_v23  ;;  %v10507_v23 = vcombine.high %v10475_v15, %v8741_v28 }
 0x678   :  { %v10492_v32 = vld [vmem:[#allocation36_spill] sm:$0xff]  ;;  %v4515_v47 = vcombine.high %v4513_v49, %v4513_v49  ;;  %v4536_v12 = vrot.slane %v4514_v34, %v7863_v14  ;;  %v10500_v34 = vld [vmem:[#allocation43_spill] sm:$0xff]  ;;  %v9273_v0 = vrot.slane %v10501_v3, %v7863_v14  ;;  %v10505_v3 = vcombine.low %v10475_v15, %v8741_v28 }
 0x679   :  { %v9279_v33 = vrot.slane %v10502_v61, %v7863_v14  ;;  %v10503_v58 = vld [vmem:[#allocation44_spill] sm:$0xff]  ;;  %v9298_v4 = vrot.slane %v10507_v23, %v7863_v14  ;;  %v9305_v48 = vrot.slane %v4513_v49, %v7863_v14  ;;  %v10511_v28 = vcombine.high %v10476_v16, %v8753_v21  ;;  %v10512_v15 = vld [vmem:[#allocation47_spill] sm:$0xff] }
 0x67a   :  { %v9284_v26 = vrot.slane %v4515_v47, %v7863_v14  ;;  %v9292_v53 = vrot.slane %v10505_v3, %v7863_v14  ;;  %v6067_v61 = vcombine.low %v4522_v25, %v4536_v12  ;;  %v6805_v39 = vcombine.high %v4522_v25, %v4536_v12  ;;  %v10508_v47 = vld [vmem:[#allocation7_spill] sm:$0xff] }
 0x67b   :  { %10509 = vst [vmem:[#allocation16_spill] sm:$0xff] %v9305_v48  ;;  %v10510_v3 = vcombine.low %v10476_v16, %v8753_v21  ;;  %v9317_v12 = vrot.slane %v10511_v28, %v7863_v14  ;;  %v10513_v49 = vcombine.low %v10477_v36, %v8768_v45  ;;  %v10517_v21 = vld [vmem:[#allocation48_spill] sm:$0xff]  ;;  %v10522_v16 = vld [vmem:[#allocation49_spill] sm:$0xff] }
 0x67c   :  { %10504 = vst [vmem:[#allocation13_spill] sm:$0xff] %v9284_v26  ;;  %10506 = vst [vmem:[#allocation14_spill] sm:$0xff] %v9292_v53  ;;  %v9356_v28 = vrot.slane %v6067_v61, %v7863_v14  ;;  %v9359_v23 = vrot.slane %v6805_v39, %v7863_v14  ;;  %v10524_v61 = vcombine.high %v10479_v57, %v8794_v43 }
 0x67d   :  { %v9311_v53 = vrot.slane %v10510_v3, %v7863_v14  ;;  %v9327_v51 = vrot.slane %v10513_v49, %v7863_v14  ;;  %v10515_v3 = vcombine.high %v10477_v36, %v8768_v45  ;;  %v10518_v49 = vcombine.low %v10478_v42, %v8780_v50 }
 0x67e   :  { %v10519_v45 = vcombine.high %v10478_v42, %v8780_v50  ;;  %10520 = vst [vmem:[#allocation20_spill] sm:$0xff] %v9356_v28  ;;  %10521 = vst [vmem:[#allocation21_spill] sm:$0xff] %v9359_v23  ;;  %v10523_v50 = vcombine.low %v10479_v57, %v8794_v43  ;;  %v10597_v39 = vcombine.high %v10500_v34, %v9028_v1 }
 0x67f   :  { %10514 = vst [vmem:[#allocation17_spill] sm:$0xff] %v9327_v51  ;;  %v9333_v55 = vrot.slane %v10515_v3, %v7863_v14  ;;  %v9345_v25 = vrot.slane %v10518_v49, %v7863_v14  ;;  %v10526_v49 = vcombine.low %v10480_v2, %v8814_v31  ;;  %v10532_v51 = vcombine.low %v10481_v38, %v8826_v27 }
 0x680   :  { %v9351_v36 = vrot.slane %v10519_v45, %v7863_v14  ;;  %v9369_v42 = vrot.slane %v10523_v50, %v7863_v14  ;;  %v9375_v45 = vrot.slane %v10524_v61, %v7863_v14  ;;  %v10528_v50 = vcombine.high %v10480_v2, %v8814_v31 }
 0x681   :  { %10516 = vst [vmem:[#allocation19_spill] sm:$0xff] %v9333_v55  ;;  %v9385_v28 = vrot.slane %v10526_v49, %v7863_v14  ;;  %v9401_v26 = vrot.slane %v10532_v51, %v7863_v14  ;;  %v10534_v49 = vcombine.high %v10481_v38, %v8826_v27  ;;  %v10537_v3 = vcombine.low %v10482_v63, %v8838_v35 }
 0x682   :  { %v9391_v23 = vrot.slane %v10528_v50, %v7863_v14  ;;  %v10539_v51 = vcombine.high %v10482_v63, %v8838_v35  ;;  %v10542_v50 = vcombine.low %v10483_v44, %v8850_v24  ;;  %v10561_v63 = vld [vmem:[#allocation61_spill] sm:$0xff] }
 0x683   :  { %10527 = vst [vmem:[#allocation24_spill] sm:$0xff] %v9385_v28  ;;  %10533 = vst [vmem:[#allocation26_spill] sm:$0xff] %v9401_v26  ;;  %v9407_v48 = vrot.slane %v10534_v49, %v7863_v14  ;;  %v9417_v61 = vrot.slane %v10537_v3, %v7863_v14  ;;  %v10544_v3 = vcombine.high %v10483_v44, %v8850_v24  ;;  %v10547_v49 = vld [vmem:[#allocation57_spill] sm:$0xff]  ;;  %v10588_v28 = vld [vmem:[#allocation95_spill] sm:$0xff] }
 0x684   :  { %10529 = vst [vmem:[#allocation25_spill] sm:$0xff] %v9391_v23  ;;  %v9423_v26 = vrot.slane %v10539_v51, %v7863_v14  ;;  %v9433_v2 = vrot.slane %v10542_v50, %v7863_v14  ;;  %v10548_v38 = vcombine.low %v10484_v62, %v10547_v49  ;;  %v10550_v50 = vcombine.high %v10484_v62, %v10547_v49  ;;  %v10554_v51 = vld [vmem:[#allocation59_spill] sm:$0xff] }
 0x685   :  { %10535 = vst [vmem:[#allocation27_spill] sm:$0xff] %v9407_v48  ;;  %10538 = vst [vmem:[#allocation28_spill] sm:$0xff] %v9417_v61  ;;  %v9439_v48 = vrot.slane %v10544_v3, %v7863_v14  ;;  %v10555_v19 = vcombine.low %v10485_v60, %v10554_v51  ;;  %v10568_v3 = vld [vmem:[#allocation63_spill] sm:$0xff]  ;;  %v4825_v61 = vcombine.low %v9273_v0, %v9279_v33 }
 0x686   :  { %10540 = vst [vmem:[#allocation29_spill] sm:$0xff] %v9423_v26  ;;  %10543 = vst [vmem:[#allocation30_spill] sm:$0xff] %v9433_v2  ;;  %v9449_v43 = vrot.slane %v10548_v38, %v7863_v14  ;;  %v9455_v57 = vrot.slane %v10550_v50, %v7863_v14  ;;  %v10557_v38 = vcombine.high %v10485_v60, %v10554_v51  ;;  %v10575_v50 = vld [vmem:[#allocation65_spill] sm:$0xff]  ;;  %v10600_v26 = vld [vmem:[#allocation6_spill] sm:$0xff] }
 0x687   :  { %10545 = vst [vmem:[#allocation31_spill] sm:$0xff] %v9439_v48  ;;  %v9465_v35 = vrot.slane %v10555_v19, %v7863_v14  ;;  %v10564_v19 = vcombine.high %v10486_v20, %v10561_v63  ;;  %v10576_v60 = vcombine.low %v10488_v22, %v10575_v50  ;;  %v4833_v31 = vrot.slane %v4825_v61, %v7863_v14 }
 0x688   :  { %10549 = vst [vmem:[#allocation32_spill] sm:$0xff] %v9449_v43  ;;  %10551 = vst [vmem:[#allocation33_spill] sm:$0xff] %v9455_v57  ;;  %v9471_v43 = vrot.slane %v10557_v38, %v7863_v14  ;;  %v10562_v57 = vcombine.low %v10486_v20, %v10561_v63  ;;  %v10573_v20 = vld [vmem:[#allocation91_spill] sm:$0xff]  ;;  %v10574_v63 = vld [vmem:[#allocation64_spill] sm:$0xff]  ;;  %v10607_v61 = vcombine.high %v10497_v56, %v9015_v18 }
 0x689   :  { %10556 = vst [vmem:[#allocation34_spill] sm:$0xff] %v9465_v35  ;;  %v9487_v35 = vrot.slane %v10564_v19, %v7863_v14  ;;  %v5481_v19 = vcombine.low %v10574_v63, %v10573_v20  ;;  %v6782_v38 = vcombine.high %v10574_v63, %v10573_v20  ;;  %v9513_v51 = vrot.slane %v10576_v60, %v7863_v14  ;;  %v10580_v20 = vld [vmem:[#allocation67_spill] sm:$0xff] }
 0x68a   :  { %10558 = vst [vmem:[#allocation36_spill] sm:$0xff] %v9471_v43  ;;  %v9481_v24 = vrot.slane %v10562_v57, %v7863_v14  ;;  %v10569_v43 = vcombine.low %v10487_v29, %v10568_v3  ;;  %v10571_v57 = vcombine.high %v10487_v29, %v10568_v3  ;;  %v10578_v29 = vld [vmem:[#allocation93_spill] sm:$0xff]  ;;  %v10579_v3 = vld [vmem:[#allocation66_spill] sm:$0xff]  ;;  %v10581_v63 = vcombine.low %v10489_v17, %v10580_v20 }
 0x68b   :  { %10565 = vst [vmem:[#allocation41_spill] sm:$0xff] %v9487_v35  ;;  %v10582_v60 = vcombine.high %v10489_v17, %v10580_v20  ;;  %v10589_v17 = vld [vmem:[#allocation70_spill] sm:$0xff]  ;;  %v10596_v20 = vcombine.low %v10500_v34, %v9028_v1  ;;  %v10601_v34 = vld [vmem:[#allocation73_spill] sm:$0xff] }
 0x68c   :  { %10563 = vst [vmem:[#allocation38_spill] sm:$0xff] %v9481_v24  ;;  %v9497_v44 = vrot.slane %v10569_v43, %v7863_v14  ;;  %v9503_v24 = vrot.slane %v10571_v57, %v7863_v14  ;;  %v10577_v43 = vcombine.high %v10488_v22, %v10575_v50  ;;  %v9529_v35 = vrot.slane %v10581_v63, %v7863_v14  ;;  %v10583_v22 = vld [vmem:[#allocation94_spill] sm:$0xff]  ;;  %v10584_v50 = vld [vmem:[#allocation68_spill] sm:$0xff] }
 0x68d   :  { %v9535_v62 = vrot.slane %v10582_v60, %v7863_v14  ;;  %v6786_v57 = vcombine.high %v10584_v50, %v10583_v22  ;;  %v3047_v60 = vpop.xlane.xlu1 %3046  ;;  %v4817_v23 = vrot.slane %v10596_v20, %v7863_v14  ;;  %v4776_v20 = vcombine.low %v9259_v46, %v9262_v8  ;;  %v10604_v8 = vld [vmem:[#allocation97_spill] sm:$0xff] }
 0x68e   :  { %10570 = vst [vmem:[#allocation42_spill] sm:$0xff] %v9497_v44  ;;  %10572 = vst [vmem:[#allocation43_spill] sm:$0xff] %v9503_v24  ;;  %v9519_v44 = vrot.slane %v10577_v43, %v7863_v14  ;;  %v5579_v43 = vcombine.low %v10584_v50, %v10583_v22  ;;  %v10585_v24 = vld [vmem:[#allocation69_spill] sm:$0xff]  ;;  %v10591_v22 = vld [vmem:[#allocation71_spill] sm:$0xff]  ;;  %v3092_v37 = vadd.f32 %v10600_v26, %v3047_v60 }
 0x68f   :  { %v10586_v49 = vcombine.low %v10490_v54, %v10585_v24  ;;  %v10587_v63 = vcombine.high %v10490_v54, %v10585_v24  ;;  %v10592_v50 = vcombine.low %v10590_v13, %v10591_v22  ;;  %v10594_v54 = vld [vmem:[#allocation96_spill] sm:$0xff]  ;;  %v10602_v33 = vcombine.low %v10492_v32, %v10601_v34 }
 0x690   :  { %v10595_v24 = vld [vmem:[#allocation72_spill] sm:$0xff]  ;;  %v5601_v1 = vrot.slane %v5579_v43, %v7863_v14  ;;  %v10603_v46 = vcombine.high %v10492_v32, %v10601_v34  ;;  %v10605_v43 = vld [vmem:[#allocation74_spill] sm:$0xff]  ;;  %v4784_v32 = vrot.slane %v4776_v20, %v7863_v14 }
 0x691   :  { %v5587_v2 = vrot.slane %v10586_v49, %v7863_v14  ;;  %v5594_v48 = vrot.slane %v10587_v63, %v7863_v14  ;;  %v9557_v27 = vrot.slane %v10592_v50, %v7863_v14  ;;  %v10593_v49 = vcombine.high %v10590_v13, %v10591_v22 }
 0x692   :  { %v4824_v50 = vrot.slane %v10597_v39, %v7863_v14  ;;  %v10598_v13 = vcombine.low %v10499_v59, %v9021_v11  ;;  %v9595_v39 = vrot.slane %v10602_v33, %v7863_v14 }
 0x693   :  { %v9563_v5 = vrot.slane %v10593_v49, %v7863_v14  ;;  %v10599_v49 = vcombine.high %v10499_v59, %v9021_v11  ;;  %v5608_v11 = vrot.slane %v6786_v57, %v7863_v14  ;;  %v9602_v59 = vrot.slane %v10603_v46, %v7863_v14 }
 0x694   :  { %v4768_v22 = vrot.slane %v10598_v13, %v7863_v14  ;;  %v4826_v13 = vcombine.low %v4817_v23, %v4824_v50  ;;  %v10606_v57 = vcombine.low %v10497_v56, %v9015_v18  ;;  %v4548_v46 = vcombine.high %v3092_v37, %v3092_v37  ;;  %v10613_v56 = vld [vmem:[#allocation98_spill] sm:$0xff]  ;;  %v10614_v18 = vld [vmem:[#allocation76_spill] sm:$0xff] }
 0x695   :  { %v4775_v63 = vrot.slane %v10599_v49, %v7863_v14  ;;  %v5610_v23 = vcombine.low %v5601_v1, %v5608_v11  ;;  %v5609_v60 = vcombine.low %v5587_v2, %v5594_v48  ;;  %v4555_v49 = vrot.slane %v3092_v37, %v7863_v14  ;;  %v10608_v1 = vld [vmem:[#allocation37_spill] sm:$0xff] }
 0x696   :  { %v4840_v33 = vrot.slane %v4826_v13, %v7863_v14  ;;  %v4719_v50 = vrot.slane %v10606_v57, %v7863_v14  ;;  %v10609_v13 = vld [vmem:[#allocation75_spill] sm:$0xff] }
 0x697   :  { %v4777_v0 = vcombine.low %v4768_v22, %v4775_v63  ;;  %v4726_v63 = vrot.slane %v10607_v61, %v7863_v14  ;;  %v4727_v22 = vcombine.low %v9245_v9, %v9252_v40  ;;  %v10610_v11 = vcombine.low %v10608_v1, %v10609_v13  ;;  %v10629_v40 = vld [vmem:[#allocation80_spill] sm:$0xff] }
 0x698   :  { %v4841_v55 = vcombine.low %v4833_v31, %v4840_v33  ;;  %v10612_v48 = vcombine.high %v10608_v1, %v10609_v13  ;;  %v5624_v2 = vrot.slane %v5610_v23, %v7863_v14  ;;  %v10615_v9 = vcombine.low %v10494_v7, %v8984_v41 }
 0x699   :  { %v4791_v34 = vrot.slane %v4777_v0, %v7863_v14  ;;  %v9627_v20 = vrot.slane %v10610_v11, %v7863_v14  ;;  %v4728_v57 = vcombine.low %v4719_v50, %v4726_v63  ;;  %v4562_v23 = vrot.slane %v4548_v46, %v7863_v14  ;;  %v10617_v50 = vld [vmem:[#allocation99_spill] sm:$0xff]  ;;  %v10618_v63 = vld [vmem:[#allocation77_spill] sm:$0xff]  ;;  %v10620_v46 = vld [vmem:[#allocation78_spill] sm:$0xff] }
 0x69a   :  { %v9633_v31 = vrot.slane %v10612_v48, %v7863_v14  ;;  %v9644_v33 = vrot.slane %v10615_v9, %v7863_v14  ;;  %6270 = vperm.xlu1 %7203, %v4841_v55   ;;  %v5617_v61 = vrot.slane %v5609_v60, %v7863_v14  ;;  %v5503_v1 = vrot.slane %v5481_v19, %v7863_v14 }
 0x69b   :  { %10611 = vst [vmem:[#allocation44_spill] sm:$0xff] %v9627_v20  ;;  %v4792_v37 = vcombine.low %v4784_v32, %v4791_v34  ;;  %v10616_v32 = vcombine.high %v10494_v7, %v8984_v41  ;;  %v4563_v13 = vcombine.high %v4555_v49, %v4555_v49  ;;  %v4735_v11 = vrot.slane %v4727_v22, %v7863_v14  ;;  %v10619_v41 = vld [vmem:[#allocation39_spill] sm:$0xff] }
 0x69c   :  { %v4742_v48 = vrot.slane %v4728_v57, %v7863_v14  ;;  %v5510_v55 = vrot.slane %v6782_v38, %v7863_v14  ;;  %v5625_v19 = vcombine.low %v5617_v61, %v5624_v2  ;;  %v10622_v22 = vcombine.high %v10619_v41, %v10620_v46  ;;  %v10623_v38 = vld [vmem:[#allocation100_spill] sm:$0xff]  ;;  %v10625_v2 = vld [vmem:[#allocation81_spill] sm:$0xff] }
 0x69d   :  { %v9650_v34 = vrot.slane %v10616_v32, %v7863_v14  ;;  %6267 = vperm.xlu0 %7202, %v4792_v37   ;;  %v10621_v37 = vcombine.low %v10619_v41, %v10620_v46  ;;  %v10624_v32 = vld [vmem:[#allocation79_spill] sm:$0xff]  ;;  %v5511_v0 = vcombine.low %v9513_v51, %v9519_v44  ;;  %v10626_v61 = vcombine.low %v10503_v58, %v10625_v2  ;;  %v10631_v51 = vld [vmem:[#allocation14_spill] sm:$0xff] }
 0x69e   :  { %v9672_v57 = vrot.slane %v10622_v22, %v7863_v14  ;;  %v4743_v7 = vcombine.low %v4735_v11, %v4742_v48  ;;  %v10627_v41 = vcombine.high %v10503_v58, %v10625_v2  ;;  %v10628_v22 = vld [vmem:[#allocation40_spill] sm:$0xff]  ;;  %v4564_v48 = vcombine.high %v4562_v23, %v4562_v23 }
 0x69f   :  { %v9666_v60 = vrot.slane %v10621_v37, %v7863_v14  ;;  %v5512_v37 = vcombine.low %v5503_v1, %v5510_v55  ;;  %v4866_v20 = vrot.slane %v10626_v61, %v7863_v14  ;;  %v10630_v9 = vcombine.low %v10628_v22, %v10629_v40  ;;  %v3053_v55 = vpop.xlane.xlu1 %3052 }
 0x6a0   :  { %v4873_v46 = vrot.slane %v10627_v41, %v7863_v14  ;;  %v9695_v44 = vrot.slane %v4563_v13, %v7863_v14  ;;  %6264 = vperm.xlu1 %7203, %v4743_v7   ;;  %v4874_v1 = vcombine.low %v10631_v51, %v9298_v4  ;;  %v10632_v61 = vcombine.low %v10589_v17, %v10588_v28 }
 0x6a1   :  { %6318 = vperm.xlu0 %7202, %v5625_v19   ;;  %v9692_v11 = vrot.slane %v10630_v9, %v7863_v14  ;;  %v5519_v19 = vrot.slane %v5511_v0, %v7863_v14  ;;  %v5526_v58 = vrot.slane %v5512_v37, %v7863_v14  ;;  %v10633_v13 = vcombine.high %v10628_v22, %v10629_v40 }
 0x6a2   :  { %v4875_v2 = vcombine.low %v4866_v20, %v4873_v46  ;;  %v5650_v9 = vrot.slane %v10632_v61, %v7863_v14  ;;  %v9712_v7 = vrot.slane %v4555_v49, %v7863_v14  ;;  %v9715_v4 = vrot.slane %v4562_v23, %v7863_v14 }
 0x6a3   :  { %v9709_v41 = vrot.slane %v10633_v13, %v7863_v14  ;;  %v4882_v0 = vrot.slane %v4874_v1, %v7863_v14  ;;  %v5527_v20 = vcombine.low %v5519_v19, %v5526_v58  ;;  %v10634_v46 = vcombine.high %v10589_v17, %v10588_v28 }
 0x6a4   :  { %v4889_v37 = vrot.slane %v4875_v2, %v7863_v14  ;;  %v5658_v40 = vcombine.low %v9557_v27, %v9563_v5  ;;  %v9726_v22 = vrot.slane %v4564_v48, %v7863_v14  ;;  %v6116_v49 = vcombine.low %v9712_v7, %v9695_v44 }
 0x6a5   :  { %v5657_v51 = vrot.slane %v10634_v46, %v7863_v14  ;;  %v6807_v23 = vcombine.high %v9712_v7, %v9695_v44  ;;  %v9733_v1 = vadd.f32 %v10600_v26, %v3053_v55  ;;  %6312 = vperm.xlu0 %7202, %v5527_v20   ;;  %v10635_v5 = vcombine.low %v10517_v21, %v9052_v6 }
 0x6a6   :  { %v4890_v19 = vcombine.low %v4882_v0, %v4889_v37  ;;  %v5666_v28 = vrot.slane %v5658_v40, %v7863_v14  ;;  %v10636_v17 = vcombine.high %v10517_v21, %v9052_v6  ;;  %v5021_v2 = vcombine.low %v9345_v25, %v9351_v36 }
 0x6a7   :  { %v5659_v58 = vcombine.low %v5650_v9, %v5657_v51  ;;  %v5013_v27 = vrot.slane %v10635_v5, %v7863_v14  ;;  %v10637_v26 = vcombine.low %v10579_v3, %v10578_v29  ;;  %v10638_v61 = vcombine.high %v10579_v3, %v10578_v29 }
 0x6a8   :  { %v5020_v48 = vrot.slane %v10636_v17, %v7863_v14  ;;  %6273 = vperm.xlu1 %7203, %v4890_v19   ;;  %v5560_v6 = vcombine.low %v9529_v35, %v9535_v62  ;;  %v10639_v25 = vcombine.low %v10508_v47, %v9040_v10  ;;  %v10640_v36 = vcombine.high %v10508_v47, %v9040_v10 }
 0x6a9   :  { %v5552_v55 = vrot.slane %v10637_v26, %v7863_v14  ;;  %v5559_v9 = vrot.slane %v10638_v61, %v7863_v14  ;;  %v5673_v13 = vrot.slane %v5659_v58, %v7863_v14  ;;  %v4646_v29 = vcombine.high %v9733_v1, %v9733_v1 }
 0x6aa   :  { %v4915_v21 = vrot.slane %v10639_v25, %v7863_v14  ;;  %v4922_v0 = vrot.slane %v10640_v36, %v7863_v14  ;;  %v5022_v3 = vcombine.low %v5013_v27, %v5020_v48  ;;  %v5029_v20 = vrot.slane %v5021_v2, %v7863_v14 }
 0x6ab   :  { %v5561_v37 = vcombine.low %v5552_v55, %v5559_v9  ;;  %v5674_v46 = vcombine.low %v5666_v28, %v5673_v13  ;;  %v4923_v35 = vcombine.low %v9311_v53, %v9317_v12  ;;  %v10641_v51 = vcombine.low %v10614_v18, %v10613_v56 }
 0x6ac   :  { %v4924_v62 = vcombine.low %v4915_v21, %v4922_v0  ;;  %v5036_v10 = vrot.slane %v5022_v3, %v7863_v14  ;;  %v5568_v47 = vrot.slane %v5560_v6, %v7863_v14  ;;  %v10642_v58 = vcombine.high %v10614_v18, %v10613_v56 }
 0x6ad   :  { %v5797_v40 = vrot.slane %v10641_v51, %v7863_v14  ;;  %v5575_v19 = vrot.slane %v5561_v37, %v7863_v14  ;;  %6321 = vperm.xlu0 %7202, %v5674_v46   ;;  %v5805_v12 = vcombine.low %v9644_v33, %v9650_v34  ;;  %v10643_v5 = vcombine.low %v10522_v16, %v9058_v30  ;;  %v10650_v46 = vld [vmem:[#allocation19_spill] sm:$0xff] }
 0x6ae   :  { %v5804_v28 = vrot.slane %v10642_v58, %v7863_v14  ;;  %v4938_v53 = vrot.slane %v4924_v62, %v7863_v14  ;;  %v10644_v17 = vcombine.high %v10522_v16, %v9058_v30  ;;  %v9794_v56 = vrot.slane %v9733_v1, %v7863_v14 }
 0x6af   :  { %v5062_v27 = vrot.slane %v10643_v5, %v7863_v14  ;;  %v5037_v18 = vcombine.low %v5029_v20, %v5036_v10  ;;  %v5070_v26 = vcombine.low %v9369_v42, %v9375_v45  ;;  %v5576_v33 = vcombine.low %v5568_v47, %v5575_v19  ;;  %v10653_v47 = vld [vmem:[#allocation54_spill] sm:$0xff]  ;;  %v10654_v19 = vld [vmem:[#allocation84_spill] sm:$0xff] }
 0x6b0   :  { %v5069_v48 = vrot.slane %v10644_v17, %v7863_v14  ;;  %v5806_v2 = vcombine.low %v5797_v40, %v5804_v28  ;;  %v4931_v34 = vrot.slane %v4923_v35, %v7863_v14  ;;  %v10645_v61 = vcombine.low %v10595_v24, %v10594_v54  ;;  %v10651_v35 = vld [vmem:[#allocation17_spill] sm:$0xff] }
 0x6b1   :  { %v6118_v30 = vcombine.low %v9715_v4, %v9726_v22  ;;  %6282 = vperm.xlu1 %7203, %v5037_v18   ;;  %v10646_v13 = vcombine.high %v10595_v24, %v10594_v54  ;;  %v5707_v45 = vcombine.low %v9595_v39, %v9602_v59  ;;  %6315 = vperm.xlu0 %7202, %v5576_v33  }
 0x6b2   :  { %v5071_v55 = vcombine.low %v5062_v27, %v5069_v48  ;;  %v5699_v9 = vrot.slane %v10645_v61, %v7863_v14  ;;  %v5820_v16 = vrot.slane %v5806_v2, %v7863_v14  ;;  %v4939_v6 = vcombine.low %v4931_v34, %v4938_v53  ;;  %v10660_v61 = vld [vmem:[#allocation28_spill] sm:$0xff] }
 0x6b3   :  { %v5706_v42 = vrot.slane %v10646_v13, %v7863_v14  ;;  %v5813_v25 = vrot.slane %v5805_v12, %v7863_v14  ;;  %v10647_v21 = vcombine.low %v10512_v15, %v9046_v52  ;;  %v10648_v0 = vcombine.high %v10512_v15, %v9046_v52 }
 0x6b4   :  { %v5078_v54 = vrot.slane %v5070_v26, %v7863_v14  ;;  %v5085_v24 = vrot.slane %v5071_v55, %v7863_v14  ;;  %v10649_v39 = vcombine.low %v10618_v63, %v10617_v50  ;;  %v4972_v62 = vcombine.low %v10651_v35, %v10650_v46  ;;  %v10668_v46 = vld [vmem:[#allocation55_spill] sm:$0xff]  ;;  %v10669_v35 = vld [vmem:[#allocation85_spill] sm:$0xff] }
 0x6b5   :  { %v4964_v36 = vrot.slane %v10647_v21, %v7863_v14  ;;  %v4971_v3 = vrot.slane %v10648_v0, %v7863_v14  ;;  %v5708_v20 = vcombine.low %v5699_v9, %v5706_v42  ;;  %v5821_v37 = vcombine.low %v5813_v25, %v5820_v16  ;;  %6276 = vperm.xlu1 %7203, %v4939_v6   ;;  %v10661_v16 = vld [vmem:[#allocation44_spill] sm:$0xff]  ;;  %v10663_v6 = vld [vmem:[#allocation82_spill] sm:$0xff] }
 0x6b6   :  { %v5846_v59 = vrot.slane %v10649_v39, %v7863_v14  ;;  %v10652_v52 = vcombine.high %v10618_v63, %v10617_v50  ;;  %v5715_v40 = vrot.slane %v5707_v45, %v7863_v14  ;;  %v10655_v58 = vcombine.low %v10653_v47, %v10654_v19  ;;  %v10662_v45 = vld [vmem:[#allocation50_spill] sm:$0xff] }
 0x6b7   :  { %v4973_v51 = vcombine.low %v4964_v36, %v4971_v3  ;;  %v5722_v10 = vrot.slane %v5708_v20, %v7863_v14  ;;  %v10656_v53 = vcombine.high %v10653_v47, %v10654_v19  ;;  %6330 = vperm.xlu0 %7202, %v5821_v37   ;;  %v5854_v50 = vcombine.low %v9666_v60, %v9672_v57  ;;  %v10659_v57 = vld [vmem:[#allocation29_spill] sm:$0xff]  ;;  %v10673_v47 = vld [vmem:[#allocation24_spill] sm:$0xff] }
 0x6b8   :  { %v5853_v15 = vrot.slane %v10652_v52, %v7863_v14  ;;  %v5209_v28 = vrot.slane %v10655_v58, %v7863_v14  ;;  %v10657_v27 = vcombine.low %v10605_v43, %v10604_v8  ;;  %v6808_v48 = vcombine.high %v9715_v4, %v9726_v22 }
 0x6b9   :  { %v5216_v12 = vrot.slane %v10656_v53, %v7863_v14  ;;  %v4987_v5 = vrot.slane %v4973_v51, %v7863_v14  ;;  %v5086_v18 = vcombine.low %v5078_v54, %v5085_v24  ;;  %v10658_v26 = vcombine.high %v10605_v43, %v10604_v8  ;;  %v10674_v53 = vld [vmem:[#allocation9_spill] sm:$0xff] }
 0x6ba   :  { %v5855_v63 = vcombine.low %v5846_v59, %v5853_v15  ;;  %v5748_v17 = vrot.slane %v10657_v27, %v7863_v14  ;;  %v5723_v34 = vcombine.low %v5715_v40, %v5722_v10  ;;  %v4980_v55 = vrot.slane %v4972_v62, %v7863_v14  ;;  %v10672_v10 = vld [vmem:[#allocation25_spill] sm:$0xff] }
 0x6bb   :  { %v5218_v2 = vcombine.low %v5209_v28, %v5216_v12  ;;  %v5755_v33 = vrot.slane %v10658_v26, %v7863_v14  ;;  %v5217_v9 = vcombine.low %v10660_v61, %v10659_v57  ;;  %6285 = vperm.xlu1 %7203, %v5086_v18   ;;  %v5756_v13 = vcombine.low %v10661_v16, %v9633_v31  ;;  %v10675_v12 = vld [vmem:[#allocation8_spill] sm:$0xff] }
 0x6bc   :  { %v5869_v60 = vrot.slane %v5855_v63, %v7863_v14  ;;  %v10664_v25 = vcombine.low %v10662_v45, %v10663_v6  ;;  %v10665_v8 = vcombine.high %v10662_v45, %v10663_v6  ;;  %v9874_v36 = vrot.slane %v4646_v29, %v7863_v14  ;;  %6324 = vperm.xlu0 %7202, %v5723_v34   ;;  %v10684_v6 = vld [vmem:[#allocation18_spill] sm:$0xff] }
 0x6bd   :  { %v5757_v42 = vcombine.low %v5748_v17, %v5755_v33  ;;  %v4988_v0 = vcombine.low %v4980_v55, %v4987_v5  ;;  %v5862_v31 = vrot.slane %v5854_v50, %v7863_v14  ;;  %v10666_v3 = vcombine.low %v10624_v32, %v10623_v38  ;;  %v10680_v55 = vld [vmem:[#allocation53_spill] sm:$0xff] }
 0x6be   :  { %v5111_v21 = vrot.slane %v10664_v25, %v7863_v14  ;;  %v5118_v43 = vrot.slane %v10665_v8, %v7863_v14  ;;  %v5232_v24 = vrot.slane %v5218_v2, %v7863_v14  ;;  %v10667_v1 = vcombine.high %v10624_v32, %v10623_v38  ;;  %v10679_v2 = vld [vmem:[#allocation30_spill] sm:$0xff]  ;;  %v10685_v25 = vld [vmem:[#allocation15_spill] sm:$0xff] }
 0x6bf   :  { %v5993_v54 = vrot.slane %v10666_v3, %v7863_v14  ;;  %v5771_v20 = vrot.slane %v5757_v42, %v7863_v14  ;;  %v5870_v59 = vcombine.low %v5862_v31, %v5869_v60  ;;  %v5225_v37 = vrot.slane %v5217_v9, %v7863_v14  ;;  %6279 = vperm.xlu1 %7203, %v4988_v0   ;;  %v10681_v60 = vld [vmem:[#allocation83_spill] sm:$0xff]  ;;  %v10688_v31 = vld [vmem:[#allocation10_spill] sm:$0xff] }
 0x6c0   :  { %v5120_v39 = vcombine.low %v5111_v21, %v5118_v43  ;;  %v6000_v29 = vrot.slane %v10667_v1, %v7863_v14  ;;  %v10670_v62 = vcombine.low %v10668_v46, %v10669_v35  ;;  %v10671_v52 = vcombine.high %v10668_v46, %v10669_v35  ;;  %v10687_v0 = vld [vmem:[#allocation11_spill] sm:$0xff]  ;;  %v10693_v46 = vld [vmem:[#allocation89_spill] sm:$0xff] }
 0x6c1   :  { %v5764_v40 = vrot.slane %v5756_v13, %v7863_v14  ;;  %v5119_v38 = vcombine.low %v10673_v47, %v10672_v10  ;;  %v6001_v32 = vcombine.low %v9692_v11, %v9709_v41  ;;  %v4661_v58 = vcombine.high %v9794_v56, %v9794_v56  ;;  %6333 = vperm.xlu0 %7202, %v5870_v59   ;;  %v10678_v41 = vld [vmem:[#allocation31_spill] sm:$0xff] }
 0x6c2   :  { %v5258_v51 = vrot.slane %v10670_v62, %v7863_v14  ;;  %v5265_v15 = vrot.slane %v10671_v52, %v7863_v14  ;;  %v6002_v19 = vcombine.low %v5993_v54, %v6000_v29  ;;  %v10676_v5 = vcombine.low %v10674_v53, %v10675_v12  ;;  %v10690_v1 = vld [vmem:[#allocation27_spill] sm:$0xff]  ;;  %v10691_v29 = vld [vmem:[#allocation26_spill] sm:$0xff] }
 0x6c3   :  { %v10677_v63 = vcombine.high %v10674_v53, %v10675_v12  ;;  %v5233_v17 = vcombine.low %v5225_v37, %v5232_v24  ;;  %v5772_v18 = vcombine.low %v5764_v40, %v5771_v20  ;;  %v5134_v11 = vrot.slane %v5120_v39, %v7863_v14  ;;  %v10692_v37 = vld [vmem:[#allocation60_spill] sm:$0xff]  ;;  %v10698_v53 = vld [vmem:[#allocation46_spill] sm:$0xff]  ;;  %v10699_v12 = vld [vmem:[#allocation45_spill] sm:$0xff] }
 0x6c4   :  { %v5267_v28 = vcombine.low %v5258_v51, %v5265_v15  ;;  %v5895_v50 = vrot.slane %v10676_v5, %v7863_v14  ;;  %v5266_v26 = vcombine.low %v10679_v2, %v10678_v41  ;;  %v6016_v33 = vrot.slane %v6002_v19, %v7863_v14  ;;  %v10697_v19 = vld [vmem:[#allocation22_spill] sm:$0xff] }
 0x6c5   :  { %v5902_v27 = vrot.slane %v10677_v63, %v7863_v14  ;;  %v10682_v57 = vcombine.low %v10680_v55, %v10681_v60  ;;  %v10683_v9 = vcombine.high %v10680_v55, %v10681_v60  ;;  %v9925_v13 = vrot.slane %v9794_v56, %v7863_v14  ;;  %6294 = vperm.xlu1 %7203, %v5233_v17   ;;  %v10704_v55 = vld [vmem:[#allocation56_spill] sm:$0xff]  ;;  %v10705_v60 = vld [vmem:[#allocation87_spill] sm:$0xff]  ;;  %v10726_v56 = vld [vmem:[#allocation62_spill] sm:$0xff] }
 0x6c6   :  { %v5127_v42 = vrot.slane %v5119_v38, %v7863_v14  ;;  %v6009_v45 = vrot.slane %v6001_v32, %v7863_v14  ;;  %v10686_v21 = vcombine.low %v10684_v6, %v10685_v25  ;;  %6327 = vperm.xlu0 %7202, %v5772_v18   ;;  %v5281_v43 = vrot.slane %v5267_v28, %v7863_v14  ;;  %v10696_v32 = vld [vmem:[#allocation23_spill] sm:$0xff] }
 0x6c7   :  { %v5904_v34 = vcombine.low %v5895_v50, %v5902_v27  ;;  %v5160_v61 = vrot.slane %v10682_v57, %v7863_v14  ;;  %v5167_v16 = vrot.slane %v10683_v9, %v7863_v14  ;;  %v5903_v3 = vcombine.low %v10688_v31, %v10687_v0 }
 0x6c8   :  { %v6042_v8 = vrot.slane %v10686_v21, %v7863_v14  ;;  %v10689_v24 = vcombine.high %v10684_v6, %v10685_v25  ;;  %v5135_v39 = vcombine.low %v5127_v42, %v5134_v11  ;;  %v5168_v59 = vcombine.low %v10691_v29, %v10690_v1  ;;  %v10708_v25 = vld [vmem:[#allocation92_spill] sm:$0xff]  ;;  %v10709_v21 = vld [vmem:[#allocation86_spill] sm:$0xff]  ;;  %v10713_v29 = vld [vmem:[#allocation51_spill] sm:$0xff] }
 0x6c9   :  { %v5169_v54 = vcombine.low %v5160_v61, %v5167_v16  ;;  %v10694_v35 = vcombine.low %v10692_v37, %v10693_v46  ;;  %v10695_v51 = vcombine.high %v10692_v37, %v10693_v46  ;;  %v6017_v15 = vcombine.low %v6009_v45, %v6016_v33  ;;  %v10703_v33 = vld [vmem:[#allocation38_spill] sm:$0xff]  ;;  %v10712_v1 = vld [vmem:[#allocation52_spill] sm:$0xff] }
 0x6ca   :  { %v6049_v20 = vrot.slane %v10689_v24, %v7863_v14  ;;  %v5274_v40 = vrot.slane %v5266_v26, %v7863_v14  ;;  %v5918_v10 = vrot.slane %v5904_v34, %v7863_v14  ;;  %v4662_v38 = vcombine.high %v9874_v36, %v9874_v36  ;;  %6288 = vperm.xlu1 %7203, %v5135_v39   ;;  %v10702_v26 = vld [vmem:[#allocation41_spill] sm:$0xff] }
 0x6cb   :  { %v5405_v62 = vrot.slane %v10694_v35, %v7863_v14  ;;  %v5412_v52 = vrot.slane %v10695_v51, %v7863_v14  ;;  %v6050_v28 = vcombine.low %v10697_v19, %v10696_v32  ;;  %v10700_v5 = vcombine.low %v10698_v53, %v10699_v12  ;;  %6342 = vperm.xlu0 %7202, %v6017_v15   ;;  %v10714_v35 = vld [vmem:[#allocation58_spill] sm:$0xff]  ;;  %v10719_v32 = vld [vmem:[#allocation13_spill] sm:$0xff] }
 0x6cc   :  { %v6051_v47 = vcombine.low %v6042_v8, %v6049_v20  ;;  %v10701_v63 = vcombine.high %v10698_v53, %v10699_v12  ;;  %v5282_v17 = vcombine.low %v5274_v40, %v5281_v43  ;;  %v5911_v18 = vrot.slane %v5903_v3, %v7863_v14 }
 0x6cd   :  { %v5944_v50 = vrot.slane %v10700_v5, %v7863_v14  ;;  %v5183_v11 = vrot.slane %v5169_v54, %v7863_v14  ;;  %v5414_v41 = vcombine.low %v5405_v62, %v5412_v52  ;;  %v5176_v2 = vrot.slane %v5168_v59, %v7863_v14  ;;  %v10715_v62 = vld [vmem:[#allocation88_spill] sm:$0xff] }
 0x6ce   :  { %v5951_v27 = vrot.slane %v10701_v63, %v7863_v14  ;;  %v5413_v34 = vcombine.low %v10703_v33, %v10702_v26  ;;  %v10706_v57 = vcombine.low %v10704_v55, %v10705_v60  ;;  %v10707_v9 = vcombine.high %v10704_v55, %v10705_v60  ;;  %6297 = vperm.xlu1 %7203, %v5282_v17   ;;  %v10722_v63 = vld [vmem:[#allocation33_spill] sm:$0xff] }
 0x6cf   :  { %v5919_v42 = vcombine.low %v5911_v18, %v5918_v10  ;;  %v6065_v45 = vrot.slane %v6051_v47, %v7863_v14  ;;  %v10710_v8 = vcombine.low %v10708_v25, %v10709_v21  ;;  %v4676_v0 = vrot.slane %v9874_v36, %v7863_v14  ;;  %v10724_v18 = vld [vmem:[#allocation101_spill] sm:$0xff] }
 0x6d0   :  { %v5307_v61 = vrot.slane %v10706_v57, %v7863_v14  ;;  %v5314_v16 = vrot.slane %v10707_v9, %v7863_v14  ;;  %v5953_v6 = vcombine.low %v5944_v50, %v5951_v27  ;;  %v4690_v31 = vrot.slane %v4662_v38, %v7863_v14  ;;  %v10718_v38 = vld [vmem:[#allocation16_spill] sm:$0xff] }
 0x6d1   :  { %v6189_v43 = vrot.slane %v10710_v8, %v7863_v14  ;;  %v6058_v3 = vrot.slane %v6050_v28, %v7863_v14  ;;  %v10711_v54 = vcombine.high %v10708_v25, %v10709_v21  ;;  %6336 = vperm.xlu0 %7202, %v5919_v42   ;;  %v5184_v20 = vcombine.low %v5176_v2, %v5183_v11  ;;  %v10723_v27 = vld [vmem:[#allocation32_spill] sm:$0xff] }
 0x6d2   :  { %v5428_v39 = vrot.slane %v5414_v41, %v7863_v14  ;;  %v5952_v59 = vcombine.low %v10713_v29, %v10712_v1  ;;  %v5316_v37 = vcombine.low %v5307_v61, %v5314_v16  ;;  %v5421_v36 = vrot.slane %v5413_v34, %v7863_v14  ;;  %v10725_v11 = vld [vmem:[#allocation12_spill] sm:$0xff] }
 0x6d3   :  { %v6196_v24 = vrot.slane %v10711_v54, %v7863_v14  ;;  %v10716_v51 = vcombine.low %v10714_v35, %v10715_v62  ;;  %v10717_v15 = vcombine.high %v10714_v35, %v10715_v62  ;;  %v6066_v10 = vcombine.low %v6058_v3, %v6065_v45  ;;  %6291 = vperm.xlu1 %7203, %v5184_v20  }
 0x6d4   :  { %v5967_v47 = vrot.slane %v5953_v6, %v7863_v14  ;;  %v10720_v19 = vcombine.low %v10718_v38, %v10719_v32  ;;  %v10721_v53 = vcombine.high %v10718_v38, %v10719_v32  ;;  %v4683_v5 = vrot.slane %v4661_v58, %v7863_v14  ;;  %v10727_v58 = vld [vmem:[#allocation90_spill] sm:$0xff] }
 0x6d5   :  { %v6198_v46 = vcombine.low %v6189_v43, %v6196_v24  ;;  %v5356_v52 = vrot.slane %v10716_v51, %v7863_v14  ;;  %v5363_v40 = vrot.slane %v10717_v15, %v7863_v14  ;;  %v6216_v50 = vcombine.low %v4676_v0, %v4690_v31  ;;  %6345 = vperm.xlu0 %7202, %v6066_v10  }
 0x6d6   :  { %v6091_v28 = vrot.slane %v10720_v19, %v7863_v14  ;;  %v6098_v12 = vrot.slane %v10721_v53, %v7863_v14  ;;  %v5315_v17 = vcombine.low %v10723_v27, %v10722_v63  ;;  %v6197_v41 = vcombine.low %v10725_v11, %v10724_v18 }
 0x6d7   :  { %v6812_v2 = vcombine.high %v4676_v0, %v4690_v31  ;;  %v5429_v26 = vcombine.low %v5421_v36, %v5428_v39  ;;  %v5960_v33 = vrot.slane %v5952_v59, %v7863_v14  ;;  %v5330_v34 = vrot.slane %v5316_v37, %v7863_v14  ;;  %v10730_v0 = vld [vmem:[#allocation36_spill] sm:$0xff]  ;;  %v10731_v31 = vld [vmem:[#allocation34_spill] sm:$0xff] }
 0x6d8   :  { %v6212_v55 = vrot.slane %v6198_v46, %v7863_v14  ;;  %v5365_v60 = vcombine.low %v5356_v52, %v5363_v40  ;;  %v10728_v57 = vcombine.low %v10726_v56, %v10727_v58  ;;  %v10729_v9 = vcombine.high %v10726_v56, %v10727_v58 }
 0x6d9   :  { %v5968_v42 = vcombine.low %v5960_v33, %v5967_v47  ;;  %v6100_v45 = vcombine.low %v6091_v28, %v6098_v12  ;;  %v6140_v6 = vrot.slane %v6118_v30, %v7863_v14  ;;  %v6147_v25 = vrot.slane %v6808_v48, %v7863_v14  ;;  %6306 = vperm.xlu1 %7203, %v5429_v26   ;;  %v10732_v48 = vld [vmem:[#allocation21_spill] sm:$0xff] }
 0x6da   :  { %v5454_v61 = vrot.slane %v10728_v57, %v7863_v14  ;;  %v5461_v16 = vrot.slane %v10729_v9, %v7863_v14  ;;  %v6126_v21 = vrot.slane %v6116_v49, %v7863_v14  ;;  %v5323_v8 = vrot.slane %v5315_v17, %v7863_v14  ;;  %v10733_v49 = vld [vmem:[#allocation20_spill] sm:$0xff] }
 0x6db   :  { %v6205_v43 = vrot.slane %v6197_v41, %v7863_v14  ;;  %v5364_v3 = vcombine.low %v10731_v31, %v10730_v0  ;;  %v6133_v30 = vrot.slane %v6807_v23, %v7863_v14  ;;  %v6214_v4 = vcombine.low %v9925_v13, %v4683_v5  ;;  %6339 = vperm.xlu0 %7202, %v5968_v42   ;;  %v10734_v23 = vld [vmem:[#allocation43_spill] sm:$0xff] }
 0x6dc   :  { %v6811_v22 = vcombine.high %v9925_v13, %v4683_v5  ;;  %v6099_v54 = vcombine.low %v10733_v49, %v10732_v48  ;;  %v5331_v24 = vcombine.low %v5323_v8, %v5330_v34  ;;  %v5379_v39 = vrot.slane %v5365_v60, %v7863_v14  ;;  %v10735_v13 = vld [vmem:[#allocation42_spill] sm:$0xff] }
 0x6dd   :  { %v6213_v20 = vcombine.low %v6205_v43, %v6212_v55  ;;  %v5463_v1 = vcombine.low %v5454_v61, %v5461_v16  ;;  %v6114_v29 = vrot.slane %v6100_v45, %v7863_v14  ;;  %v6149_v59 = vcombine.low %v6140_v6, %v6147_v25  ;;  %v10737_v6 = vld [vmem:[#allocation5_spill] sm:$0xff] }
 0x6de   :  { %v6238_v37 = vrot.slane %v6216_v50, %v7863_v14  ;;  %v6245_v44 = vrot.slane %v6812_v2, %v7863_v14  ;;  %6300 = vperm.xlu1 %7203, %v5331_v24   ;;  %v5372_v7 = vrot.slane %v5364_v3, %v7863_v14  ;;  %v5462_v36 = vcombine.low %v10735_v13, %v10734_v23 }
 0x6df   :  { %v6224_v46 = vrot.slane %v6214_v4, %v7863_v14  ;;  %v6231_v35 = vrot.slane %v6811_v22, %v7863_v14  ;;  %6354 = vperm.xlu0 %7202, %v6213_v20   ;;  %v6107_v62 = vrot.slane %v6099_v54, %v7863_v14  ;;  %v6148_v51 = vcombine.low %v6126_v21, %v6133_v30 }
 0x6e0   :  { %v5380_v52 = vcombine.low %v5372_v7, %v5379_v39  ;;  %v5477_v15 = vrot.slane %v5463_v1, %v7863_v14  ;;  %v6163_v10 = vrot.slane %v6149_v59, %v7863_v14  ;;  %v6247_v47 = vcombine.low %v6238_v37, %v6245_v44 }
 0x6e1   :  { %v6115_v40 = vcombine.low %v6107_v62, %v6114_v29  ;;  %v5470_v38 = vrot.slane %v5462_v36, %v7863_v14  ;;  %v6156_v32 = vrot.slane %v6148_v51, %v7863_v14  ;;  %v6246_v19 = vcombine.low %v6224_v46, %v6231_v35 }
 0x6e2   :  { %6303 = vperm.xlu1 %7203, %v5380_v52   ;;  %v6261_v12 = vrot.slane %v6247_v47, %v7863_v14  ;;  %v10736_v58 = vlaneseq }
 0x6e3   :  { %6348 = vperm.xlu0 %7202, %v6115_v40   ;;  %v5478_v28 = vcombine.low %v5470_v38, %v5477_v15  ;;  %v6164_v53 = vcombine.low %v6156_v32, %v6163_v10  ;;  %v6254_v5 = vrot.slane %v6246_v19, %v7863_v14 }
 0x6e4   :  { %v10077_v57 = vand.u32 127, %v10736_v58  ;;  %vm6567_vm9 = vcmp.lt.s32.totalorder %v10736_v58, 256 }
 0x6e5   :  { %v6262_v50 = vcombine.low %v6254_v5, %v6261_v12 }
 0x6e6   :  { %6309 = vperm.xlu1 %7203, %v5478_v28   ;;  %v6365_v16 = vadd.s32 4294967288, %v10077_v57  ;;  %v6363_v21 = vsub.s32 %v10077_v57, %v10737_v6  ;;  %v6379_v8 = vadd.s32 4294967272, %v10077_v57  ;;  %v6372_v43 = vadd.s32 4294967280, %v10077_v57 }
 0x6e7   :  { %6351 = vperm.xlu0 %7202, %v6164_v53   ;;  %v6386_v0 = vadd.s32 4294967264, %v10077_v57  ;;  %v6393_v3 = vadd.s32 4294967256, %v10077_v57  ;;  %v6400_v37 = vadd.s32 4294967248, %v10077_v57  ;;  %v6407_v13 = vadd.s32 4294967240, %v10077_v57 }
 0x6e8   :  { %v6368_v25 = vsub.s32 %v6365_v16, %v10737_v6  ;;  %v6382_v49 = vsub.s32 %v6379_v8, %v10737_v6  ;;  %v6375_v54 = vsub.s32 %v6372_v43, %v10737_v6  ;;  %v6414_v36 = vadd.s32 4294967232, %v10077_v57 }
 0x6e9   :  { %v6389_v24 = vsub.s32 %v6386_v0, %v10737_v6  ;;  %v6396_v1 = vsub.s32 %v6393_v3, %v10737_v6  ;;  %v6421_v10 = vadd.s32 4294967224, %v10077_v57  ;;  %v6403_v32 = vsub.s32 %v6400_v37, %v10737_v6 }
 0x6ea   :  { %v6449_v16 = vadd.s32 4294967192, %v10077_v57 }
 0x6eb   :  { %6357 = vperm.xlu0 %7202, %v6262_v50   ;;  %v6417_v50 = vsub.s32 %v6414_v36, %v10737_v6 }
 0x719   :  { %v6271_v27 = vpop.permute.xlu1 %6270 }
 0x71a   :  { %v6376_v46 = vrot.slane %v6271_v27, %v6375_v54 }
 0x71c   :  { %v6268_v63 = vpop.permute.xlu0 %6267 }
 0x71d   :  { %v6369_v20 = vrot.slane %v6268_v63, %v6368_v25  ;;  %v6410_v63 = vsub.s32 %v6407_v13, %v10737_v6 }
 0x71f   :  { %v6265_v18 = vpop.permute.xlu1 %6264 }
 0x720   :  { %v6319_v17 = vpop.permute.xlu0 %6318  ;;  %v6364_v22 = vrot.slane %v6265_v18, %v6363_v21  ;;  %v6424_v18 = vsub.s32 %v6421_v10, %v10737_v6 }
 0x721   :  { %v6482_v59 = vrot.slane %v6319_v17, %v6375_v54 }
 0x722   :  { %v6371_v7 = vsel %vm6370_vm10, %v6369_v20, %v6364_v22 }
 0x723   :  { %v6378_v38 = vsel %vm6377_vm11, %v6376_v46, %v6371_v7  ;;  %v6456_v7 = vadd.s32 4294967184, %v10077_v57 }
 0x724   :  { %v6313_v11 = vpop.permute.xlu0 %6312 }
 0x725   :  { %v6473_v48 = vrot.slane %v6313_v11, %v6363_v21 }
 0x727   :  { %v6274_v41 = vpop.permute.xlu1 %6273 }
 0x728   :  { %v6383_v23 = vrot.slane %v6274_v41, %v6382_v49 }
 0x72a   :  { %v6385_v28 = vsel %vm6384_vm12, %v6383_v23, %v6378_v38 }
 0x72c   :  { %v6322_v2 = vpop.permute.xlu0 %6321 }
 0x72d   :  { %v6487_v52 = vrot.slane %v6322_v2, %v6382_v49 }
 0x730   :  { %v10070_v26 = vpop.permute.xlu1 %6282  ;;  %v6316_v33 = vpop.permute.xlu0 %6315 }
 0x731   :  { %v6477_v31 = vrot.slane %v6316_v33, %v6368_v25  ;;  %v6404_v41 = vrot.slane %v10070_v26, %v6403_v32  ;;  %v6428_v33 = vadd.s32 4294967216, %v10077_v57 }
 0x733   :  { %v6478_v39 = vsel %vm6370_vm10, %v6477_v31, %v6473_v48  ;;  %v6431_v3 = vsub.s32 %v6428_v33, %v10737_v6 }
 0x734   :  { %v6277_v34 = vpop.permute.xlu1 %6276  ;;  %v6483_v35 = vsel %vm6377_vm11, %v6482_v59, %v6478_v39  ;;  %v6452_v39 = vsub.s32 %v6449_v16, %v10737_v6  ;;  %v6463_v59 = vadd.s32 4294967176, %v10077_v57 }
 0x735   :  { %v6390_v62 = vrot.slane %v6277_v34, %v6389_v24  ;;  %v6488_v53 = vsel %vm6384_vm12, %v6487_v52, %v6483_v35 }
 0x736   :  { %v10072_v55 = vpop.permute.xlu0 %6330 }
 0x737   :  { %v6392_v12 = vsel %vm6391_vm13, %v6390_v62, %v6385_v28  ;;  %v6502_v2 = vrot.slane %v10072_v55, %v6403_v32 }
 0x73a   :  { %v10074_v60 = vpop.permute.xlu1 %6285 }
 0x73b   :  { %v6325_v56 = vpop.permute.xlu0 %6324  ;;  %v6411_v55 = vrot.slane %v10074_v60, %v6410_v63 }
 0x73c   :  { %v6492_v51 = vrot.slane %v6325_v56, %v6389_v24  ;;  %v6435_v56 = vadd.s32 4294967208, %v10077_v57 }
 0x73e   :  { %v6280_v61 = vpop.permute.xlu1 %6279  ;;  %v6493_v5 = vsel %vm6391_vm13, %v6492_v51, %v6488_v53 }
 0x73f   :  { %v6397_v15 = vrot.slane %v6280_v61, %v6396_v1  ;;  %v6442_v61 = vadd.s32 4294967200, %v10077_v57 }
 0x740   :  { %v10079_v9 = vpop.permute.xlu0 %6333 }
 0x741   :  { %v6399_v27 = vsel %vm6398_vm14, %v6397_v15, %v6392_v12  ;;  %v6507_v8 = vrot.slane %v10079_v9, %v6410_v63  ;;  %v6445_v9 = vsub.s32 %v6442_v61, %v10737_v6 }
 0x744   :  { %v10082_v42 = vpop.permute.xlu1 %6294 }
 0x745   :  { %v6328_v45 = vpop.permute.xlu0 %6327  ;;  %v6432_v37 = vrot.slane %v10082_v42, %v6431_v3  ;;  %v6466_v42 = vsub.s32 %v6463_v59, %v10737_v6 }
 0x746   :  { %v6497_v40 = vrot.slane %v6328_v45, %v6396_v1  ;;  %v6406_v45 = vsel %vm6405_vm15, %v6404_v41, %v6399_v27 }
 0x747   :  { %v6413_v48 = vsel %vm6412_vm0, %v6411_v55, %v6406_v45 }
 0x748   :  { %v6498_v17 = vsel %vm6398_vm14, %v6497_v40, %v6493_v5 }
 0x749   :  { %v10091_v30 = vpop.permute.xlu1 %6288  ;;  %v6503_v25 = vsel %vm6405_vm15, %v6502_v2, %v6498_v17 }
 0x74a   :  { %v10093_v4 = vpop.permute.xlu0 %6342  ;;  %v6418_v21 = vrot.slane %v10091_v30, %v6417_v50  ;;  %v6508_v49 = vsel %vm6412_vm0, %v6507_v8, %v6503_v25  ;;  %v6438_v30 = vsub.s32 %v6435_v56, %v10737_v6 }
 0x74c   :  { %v6420_v54 = vsel %vm6419_vm1, %v6418_v21, %v6413_v48 }
 0x74d   :  { %v10099_v29 = vpop.permute.xlu1 %6297 }
 0x74e   :  { %v6439_v62 = vrot.slane %v10099_v29, %v6438_v30 }
 0x750   :  { %v6337_v44 = vpop.permute.xlu0 %6336 }
 0x751   :  { %v6512_v26 = vrot.slane %v6337_v44, %v6417_v50  ;;  %v6522_v44 = vrot.slane %v10093_v4, %v6431_v3  ;;  %v6459_v4 = vsub.s32 %v6456_v7, %v10737_v6 }
 0x752   :  { %v6292_v47 = vpop.permute.xlu1 %6291 }
 0x753   :  { %v6425_v43 = vrot.slane %v6292_v47, %v6424_v18  ;;  %v6513_v60 = vsel %vm6419_vm1, %v6512_v26, %v6508_v49 }
 0x754   :  { %v10108_v19 = vpop.permute.xlu0 %6345 }
 0x755   :  { %v6427_v24 = vsel %vm6426_vm2, %v6425_v43, %v6420_v54  ;;  %v6527_v51 = vrot.slane %v10108_v19, %v6438_v30 }
 0x756   :  { %v6434_v13 = vsel %vm6433_vm3, %v6432_v37, %v6427_v24 }
 0x757   :  { %v6441_v40 = vsel %vm6440_vm4, %v6439_v62, %v6434_v13 }
 0x758   :  { %v10117_v11 = vpop.permute.xlu1 %6306 }
 0x759   :  { %v6460_v19 = vrot.slane %v10117_v11, %v6459_v4 }
 0x75a   :  { %v6340_v34 = vpop.permute.xlu0 %6339 }
 0x75b   :  { %v6517_v0 = vrot.slane %v6340_v34, %v6424_v18 }
 0x75d   :  { %v6301_v31 = vpop.permute.xlu1 %6300  ;;  %v6518_v20 = vsel %vm6426_vm2, %v6517_v0, %v6513_v60 }
 0x75e   :  { %v6355_v22 = vpop.permute.xlu0 %6354  ;;  %v6523_v36 = vsel %vm6433_vm3, %v6522_v44, %v6518_v20  ;;  %v6446_v46 = vrot.slane %v6301_v31, %v6445_v9 }
 0x75f   :  { %v6528_v10 = vsel %vm6440_vm4, %v6527_v51, %v6523_v36  ;;  %v6542_v12 = vrot.slane %v6355_v22, %v6459_v4 }
 0x760   :  { %v6448_v38 = vsel %vm6447_vm5, %v6446_v46, %v6441_v40 }
 0x761   :  { %v6304_v1 = vpop.permute.xlu1 %6303 }
 0x762   :  { %v6349_v23 = vpop.permute.xlu0 %6348  ;;  %v6453_v52 = vrot.slane %v6304_v1, %v6452_v39 }
 0x763   :  { %v6532_v35 = vrot.slane %v6349_v23, %v6445_v9 }
 0x764   :  { %v6455_v28 = vsel %vm6454_vm6, %v6453_v52, %v6448_v38 }
 0x765   :  { %v6310_v57 = vpop.permute.xlu1 %6309  ;;  %v6533_v32 = vsel %vm6447_vm5, %v6532_v35, %v6528_v10  ;;  %v6462_v50 = vsel %vm6461_vm7, %v6460_v19, %v6455_v28 }
 0x766   :  { %v6352_v15 = vpop.permute.xlu0 %6351  ;;  %v6467_v29 = vrot.slane %v6310_v57, %v6466_v42 }
 0x767   :  { %v6537_v47 = vrot.slane %v6352_v15, %v6452_v39 }
 0x768   :  { %v6469_v27 = vsel %vm6468_vm8, %v6467_v29, %v6462_v50 }
 0x769   :  { %v6538_v53 = vsel %vm6454_vm6, %v6537_v47, %v6533_v32 }
 0x76a   :  { %v6358_v5 = vpop.permute.xlu0 %6357  ;;  %v6543_v63 = vsel %vm6461_vm7, %v6542_v12, %v6538_v53 }
 0x76b   :  { %v6547_v6 = vrot.slane %v6358_v5, %v6466_v42 }
 0x76d   :  { %v6548_v17 = vsel %vm6468_vm8, %v6547_v6, %v6543_v63 }
 0x76e   :  { %v6549_v18 = vcombine.low %v6469_v27, %v6548_v17 }
 0x770   :  { %v6556_v41 = vrot.slane %v6549_v18, %v7863_v14 }
 0x772   :  { %v6563_v2 = vrot.slane %v6556_v41, %v7863_v14 }
 0x774   :  { %6569 = vst.msk [vmem:[#allocation2] sm:$0x3] %vm6567_vm9, %v6563_v2 }
 0x775   :  { %7260 = shalt.err (!%p7257_p4)
}
 0x776   :  { %s7261_s0 = scalar_lea.hbm %s10169_s3, 32 }
 0x777   :  { %p7262_p5 = scmp.ne.s32.totalorder %s10169_s3, %s7261_s0  ;;  %p7265_p6 = scmp.lt.u32.totalorder %s7261_s0, %s10169_s3 }
 0x779   :  { %p7267_p7 = pnand %p7265_p6, %p7262_p5 }
 0x77b   :  { %7270 = shalt.err (!%p7267_p7)
}
 0x77c   :  { %6579 = dma.vmem_to_hbm [thread:$0]  %s6577_s7, 32, %s10169_s3, [#allocation3]  }
 0x77d   :  { %7271 = dma.done.wait [#allocation3], 32  }
 0x77e   :  { %7272 = vsyncadd [#allocation3], 4294967264 }
 0x77f   :  { %6583 = vsyncpa [#allocation3], 1 }

</bundles_post_ra>
